<compile_context>
chip_gen: v6e
topology: v6e:2x2x1
jax: 0.10.0
libtpu: 0.0.40
codegen_flags: <defaults>
</compile_context>

<pallas_src>
import math

import jax
import jax.numpy as jnp
from jax.experimental import pallas as pl
from jax.experimental.pallas import tpu as pltpu

# ---------------- configuration (small, consistent with the module) ----------
BATCH = 2
MAX_LEN = 8            # sequence length == max_len
N_LAYERS = 2
N_HEADS = 2
HIDDEN = 32            # hidden_size
ATTR_HIDDEN = 16       # attribute_hidden_size[0]
INTER = 64             # intermediate_size
EPS = 1e-12            # layer_norm_eps
FEAT_NUM = 1
N_CROSS = (2 + FEAT_NUM) ** 2      # 9 raw attention maps (item stream)
N_CROSS_C = (1 + FEAT_NUM) ** 2    # 4 raw attention maps (attribute stream)

HEAD_H = HIDDEN // N_HEADS         # 16
HEAD_A = ATTR_HIDDEN // N_HEADS    # 8

# per-head packed-projection column layout (head-major):
#   [ qs_ki(16) | qs_ka(8) | qs_kp(16) |      <- fused item-stream Q (concat-K)
#     k_item(16)| k_attr(8)| k_pos(16) |      <- item-stream concat K
#     qcs_kha(8)| qcs_kp(16)|                 <- fused attribute-stream Q
#     k_hattr(8)| k_pos(16) |                 <- attribute-stream concat K
#     v_item(16)| v_attr(8) ]                 <- values
QI_W = 2 * HEAD_H + HEAD_A         # 40
QA_W = HEAD_H + HEAD_A             # 24
O_QI = 0
O_KI = O_QI + QI_W
O_QA = O_KI + QI_W
O_KA = O_QA + QA_W
O_VI = O_KA + QA_W
O_VA = O_VI + HEAD_H
PB = O_VA + HEAD_A                 # 152 lanes per head, 304 total


# ---------------- in-kernel helpers ------------------------------------------
def _layer_norm(x, gamma, beta):
    mean = jnp.mean(x, axis=-1, keepdims=True)
    var = jnp.mean(jnp.square(x - mean), axis=-1, keepdims=True)
    return (x - mean) * jax.lax.rsqrt(var + EPS) * gamma + beta


def _gelu(x):
    # recbole 'gelu': x * 0.5 * (1 + erf(x / sqrt(2))), exact erf form for
    # fidelity with torch.  (tanh approx would move this to the EUP on v5e.)
    return x * 0.5 * (1.0 + jax.lax.erf(x * (1.0 / math.sqrt(2.0))))


def _softmax_last(a):
    m = jnp.max(a, axis=-1, keepdims=True)
    e = jnp.exp(a - m)
    return e / jnp.sum(e, axis=-1, keepdims=True)    # exact divide (review note)


# ---------------- the kernel: the full N_LAYERS encoder -----------------------
def acg_encoder_kernel(
    state_ref,            # (B*L, H+A)   [item_hidden | attr_hidden], layer-0 input
    const_ref,            # (B*L, H+A)   [pos | attribute_table], constant
    mask_ref,             # (L, L)       additive attention mask
    w_ref, b_ref,         # (NL, 2H+2A, 2*PB) / (NL, 1, 2*PB)  fused projection
    wo_ref, bo_ref,       # (NL, H+A, H+A) / (NL, 1, H+A)  blockdiag(dense, dense_attr)
    ln_i_ref, ln_a_ref,   # (NL, 4, H) / (NL, 4, A): [LN_g, LN_b, FFLN_g, FFLN_b]
    wf1_ref, bf1_ref,     # (NL, H+A, 2*INTER) / (NL, 1, 2*INTER)  packed FF dense_1
    wf2_ref, bf2_ref,     # (NL, 2*INTER, H+A) / (NL, 1, H+A)      packed FF dense_2
    out_ref,              # (NL, B*L, H+A)
):
    BL = state_ref.shape[0]
    L = mask_ref.shape[0]
    B = BL // L
    H, A = HIDDEN, ATTR_HIDDEN
    NHB = N_HEADS * B

    const = const_ref[...]
    state = state_ref[...]
    # hoisted once: JAX does not CSE broadcast_in_dim, so one broadcast serves
    # every score-add in both layers / both streams.
    maskb = jnp.broadcast_to(mask_ref[...][None, :, :], (NHB, L, L))

    def qkt(q, k):   # batched Q·Kᵀ, contraction over the concat-K axis
        return jax.lax.dot_general(q, k, (((2,), (2,)), ((0,), (0,))),
                                   preferred_element_type=jnp.float32)

    def pv(p, v):    # batched probs·V
        return jax.lax.dot_general(p, v, (((2,), (1,)), ((0,), (0,))),
                                   preferred_element_type=jnp.float32)

    def heads_to_lanes(c, d):
        # (NH*B, L, d) -> (B*L, NH*d) in torch's head-concat order
        return jnp.concatenate(
            [c[h * B:(h + 1) * B].reshape(BL, d) for h in range(N_HEADS)], axis=-1)

    for l in range(N_LAYERS):          # static unroll: both layers in one kernel
        # ---- single fused projection (all used nn.Linear's of this layer) ----
        inp = jnp.concatenate([state, const], axis=-1)                 # (BL, 2H+2A)
        proj = jnp.dot(inp, w_ref[l],
                       preferred_element_type=jnp.float32) + b_ref[l]  # (BL, 2*PB)

        # stack heads along rows -> batch index (head, batch); leading-dim
        # reshapes only (layout preserving, 2*BL is a multiple of 8 sublanes).
        ph = jnp.concatenate([proj[:, :PB], proj[:, PB:]], axis=0)     # (NH*BL, PB)

        def hb(lo, hi):
            return ph[:, lo:hi].reshape(NHB, L, hi - lo)

        qi, ki = hb(O_QI, O_KI), hb(O_KI, O_QA)
        qa, ka = hb(O_QA, O_KA), hb(O_KA, O_VI)
        vi, va = hb(O_VI, O_VA), hb(O_VA, PB)

        # ---- attention: fusion weights + 1/sqrt(head_size) are pre-folded ----
        # into the Q columns; the weighted sum of the 9 / 4 raw maps is a
        # single matmul via concatenation along the contraction axis.
        pi = _softmax_last(qkt(qi, ki) + maskb)        # attn_dropout = identity
        pa = _softmax_last(qkt(qa, ka) + maskb)
        ctx = jnp.concatenate([heads_to_lanes(pv(pi, vi), HEAD_H),
                               heads_to_lanes(pv(pa, va), HEAD_A)],
                              axis=-1)                                  # (BL, H+A)

        # ---- packed output projection (dense | dense_attr) + residual ----
        hid = jnp.dot(ctx, wo_ref[l],
                      preferred_element_type=jnp.float32) + bo_ref[l] + state

        ln_i = ln_i_ref[l]
        ln_a = ln_a_ref[l]
        a1 = jnp.concatenate([_layer_norm(hid[:, :H], ln_i[0:1], ln_i[1:2]),
                              _layer_norm(hid[:, H:], ln_a[0:1], ln_a[1:2])],
                             axis=-1)

        # ---- packed FeedForward for both streams (block-diagonal weights) ----
        f = _gelu(jnp.dot(a1, wf1_ref[l],
                          preferred_element_type=jnp.float32) + bf1_ref[l])
        f = jnp.dot(f, wf2_ref[l],
                    preferred_element_type=jnp.float32) + bf2_ref[l] + a1
        state = jnp.concatenate([_layer_norm(f[:, :H], ln_i[2:3], ln_i[3:4]),
                                 _layer_norm(f[:, H:], ln_a[2:3], ln_a[3:4])],
                                axis=-1)

        out_ref[l] = state             # single full-slab store per layer


# ---------------- wrapper: the whole encoder in one pallas_call ----------------
def acg_transformer_encoder(hidden_states, attribute_hidden_states,
                            position_embedding, attention_mask_2d,
                            packed_params, output_all_encoded_layers=True):
    B, L, H = hidden_states.shape
    attr = attribute_hidden_states[0]            # attribute_table (constant)
    A = attr.shape[-1]
    BL = B * L

    state0 = jnp.concatenate([hidden_states.reshape(BL, H),
                              attr.reshape(BL, A)], axis=-1)      # hattr0 = attr
    consts = jnp.concatenate([position_embedding.reshape(BL, H),
                              attr.reshape(BL, A)], axis=-1)

    vmem = pl.BlockSpec(memory_space=pltpu.MemorySpace.VMEM)
    out = pl.pallas_call(
        acg_encoder_kernel,
        in_specs=[vmem] * (3 + len(packed_params)),
        out_specs=vmem,
        out_shape=jax.ShapeDtypeStruct((N_LAYERS, BL, H + A), jnp.float32),
    )(state0, consts, attention_mask_2d, *packed_params)

    all_h = [out[l, :, :H].reshape(B, L, H) for l in range(N_LAYERS)]
    all_a = [out[l, :, H:].reshape(B, L, A) for l in range(N_LAYERS)]
    if not output_all_encoded_layers:
        all_h, all_a = [all_h[-1]], [all_a[-1]]
    return all_h, all_a


# ---------------- deterministic torch-style params + host-side packing ---------
def init_raw_layer_params(key):
    ks = iter(jax.random.split(key, 48))

    def nrm(shape):
        return jax.random.normal(next(ks), shape, jnp.float32) * 0.02

    H, A, I = HIDDEN, ATTR_HIDDEN, INTER
    # torch-style Linears stored as [in, out] (value_p and value(attr_table)
    # of the reference are never consumed by the forward pass -> omitted).
    return dict(
        wq=nrm((H, H)), bq=nrm((H,)), wk=nrm((H, H)), bk=nrm((H,)),
        wv=nrm((H, H)), bv=nrm((H,)),
        wqp=nrm((H, H)), bqp=nrm((H,)), wkp=nrm((H, H)), bkp=nrm((H,)),
        wqic=nrm((H, A)), bqic=nrm((A,)), wqpc=nrm((H, A)), bqpc=nrm((A,)),
        wqci=nrm((A, H)), bqci=nrm((H,)), wqcp=nrm((A, H)), bqcp=nrm((H,)),
        wqa=nrm((A, A)), bqa=nrm((A,)), wka=nrm((A, A)), bka=nrm((A,)),
        wva=nrm((A, A)), bva=nrm((A,)),
        wd=nrm((H, H)), bd=nrm((H,)), wda=nrm((A, A)), bda=nrm((A,)),
        ln1_g=jnp.ones((H,)), ln1_b=jnp.zeros((H,)),
        ln1a_g=jnp.ones((A,)), ln1a_b=jnp.zeros((A,)),
        ln2_g=jnp.ones((H,)), ln2_b=jnp.zeros((H,)),
        ln2a_g=jnp.ones((A,)), ln2a_b=jnp.zeros((A,)),
        ff_w1=nrm((H, I)), ff_b1=nrm((I,)), ff_w2=nrm((I, H)), ff_b2=nrm((H,)),
        ffa_w1=nrm((A, I)), ffa_b1=nrm((I,)), ffa_w2=nrm((I, A)), ffa_b2=nrm((A,)),
    )


def _col_block(width, x=None, ha=None, p_=None, at=None):
    """Stack input-row-block contributions [x(H); hattr(A); pos(H); attr(A)]."""
    H, A = HIDDEN, ATTR_HIDDEN

    def blk(m, rows):
        return m if m is not None else jnp.zeros((rows, width), jnp.float32)

    return jnp.concatenate([blk(x, H), blk(ha, A), blk(p_, H), blk(at, A)], axis=0)


def pack_layer(p, fw, fwc):
    """Pack one ACGTransformerLayer's weights.  fw/fwc are the 'sum' fusion
    weights (ada_fuse=0 -> ones); they and the 1/sqrt(head_size) scale are
    folded into the Q columns (valid only for constant fusion weights)."""
    H, A = HIDDEN, ATTR_HIDDEN
    dh, da = HEAD_H, HEAD_A
    s = 1.0 / math.sqrt(dh)   # reference scales BOTH streams by item head size

    w_cols, b_cols = [], []
    for h in range(N_HEADS):
        shi = slice(h * dh, (h + 1) * dh)
        sha = slice(h * da, (h + 1) * da)
        # fused item-stream Q, grouped by shared K (maps 0..8 of the reference)
        w_cols.append(_col_block(dh, x=s * fw[0] * p['wq'][:, shi],
                                 p_=s * fw[6] * p['wqp'][:, shi],
                                 at=s * fw[3] * p['wqci'][:, shi]))
        b_cols.append(s * (fw[0] * p['bq'][shi] + fw[3] * p['bqci'][shi]
                           + fw[6] * p['bqp'][shi]))
        w_cols.append(_col_block(da, x=s * fw[1] * p['wqic'][:, sha],
                                 p_=s * fw[7] * p['wqpc'][:, sha],
                                 at=s * fw[4] * p['wqa'][:, sha]))
        b_cols.append(s * (fw[1] * p['bqic'][sha] + fw[4] * p['bqa'][sha]
                           + fw[7] * p['bqpc'][sha]))
        w_cols.append(_col_block(dh, x=s * fw[2] * p['wq'][:, shi],
                                 p_=s * fw[8] * p['wqp'][:, shi],
                                 at=s * fw[5] * p['wqcp'][:, shi]))
        b_cols.append(s * (fw[2] * p['bq'][shi] + fw[5] * p['bqcp'][shi]
                           + fw[8] * p['bqp'][shi]))
        # item-stream concat K: [k_item | k_attr | k_pos]
        w_cols.append(_col_block(dh, x=p['wk'][:, shi])); b_cols.append(p['bk'][shi])
        w_cols.append(_col_block(da, at=p['wka'][:, sha])); b_cols.append(p['bka'][sha])
        w_cols.append(_col_block(dh, p_=p['wkp'][:, shi])); b_cols.append(p['bkp'][shi])
        # fused attribute-stream Q (maps 0..3), grouped by shared K
        w_cols.append(_col_block(da, ha=s * fwc[0] * p['wqa'][:, sha],
                                 p_=s * fwc[2] * p['wqpc'][:, sha]))
        b_cols.append(s * (fwc[0] * p['bqa'][sha] + fwc[2] * p['bqpc'][sha]))
        w_cols.append(_col_block(dh, ha=s * fwc[1] * p['wqcp'][:, shi],
                                 p_=s * fwc[3] * p['wqp'][:, shi]))
        b_cols.append(s * (fwc[1] * p['bqcp'][shi] + fwc[3] * p['bqp'][shi]))
        # attribute-stream concat K: [k_hattr | k_pos]
        w_cols.append(_col_block(da, ha=p['wka'][:, sha])); b_cols.append(p['bka'][sha])
        w_cols.append(_col_block(dh, p_=p['wkp'][:, shi])); b_cols.append(p['bkp'][shi])
        # values
        w_cols.append(_col_block(dh, x=p['wv'][:, shi])); b_cols.append(p['bv'][shi])
        w_cols.append(_col_block(da, ha=p['wva'][:, sha])); b_cols.append(p['bva'][sha])

    W = jnp.concatenate(w_cols, axis=1)          # (2H+2A, 2*PB) = (96, 304)
    b = jnp.concatenate(b_cols)[None, :]         # (1, 304)

    z = lambda r, c: jnp.zeros((r, c), jnp.float32)
    Wo = jnp.concatenate([jnp.concatenate([p['wd'], z(H, A)], axis=1),
                          jnp.concatenate([z(A, H), p['wda']], axis=1)], axis=0)
    bo = jnp.concatenate([p['bd'], p['bda']])[None, :]
    ln_i = jnp.stack([p['ln1_g'], p['ln1_b'], p['ln2_g'], p['ln2_b']])
    ln_a = jnp.stack([p['ln1a_g'], p['ln1a_b'], p['ln2a_g'], p['ln2a_b']])
    Wf1 = jnp.concatenate([jnp.concatenate([p['ff_w1'], z(H, INTER)], axis=1),
                           jnp.concatenate([z(A, INTER), p['ffa_w1']], axis=1)], axis=0)
    bf1 = jnp.concatenate([p['ff_b1'], p['ffa_b1']])[None, :]
    Wf2 = jnp.concatenate([jnp.concatenate([p['ff_w2'], z(INTER, A)], axis=1),
                           jnp.concatenate([z(INTER, H), p['ffa_w2']], axis=1)], axis=0)
    bf2 = jnp.concatenate([p['ff_b2'], p['ffa_b2']])[None, :]
    return (W, b, Wo, bo, ln_i, ln_a, Wf1, bf1, Wf2, bf2)


def pack_encoder_params(raw_layers, fusion_w, fusion_wc):
    packed = [pack_layer(p, fusion_w, fusion_wc) for p in raw_layers]
    return tuple(jnp.stack(parts) for parts in zip(*packed))


# ---------------- main ----------------------------------------------------------
if __name__ == "__main__":
    key = jax.random.PRNGKey(0)
    kl0, kl1, kx, ka, kp = jax.random.split(key, 5)

    # ada_fuse == 0 -> fusion weights are torch.ones_like (constants), folded
    # into the packed projection weights on the host.
    # TODO(synk): ada_fuse=1 (learned softmax fusion weights), fusion_type
    # 'concat'/'gate' and training-mode dropout are not implemented; this
    # realizes fusion_type='sum', ada_fuse=0, eval-mode dropout.
    fusion_w = jnp.ones((N_CROSS,), jnp.float32)
    fusion_wc = jnp.ones((N_CROSS_C,), jnp.float32)

    raw_layers = [init_raw_layer_params(kl0), init_raw_layer_params(kl1)]
    packed_params = pack_encoder_params(raw_layers, fusion_w, fusion_wc)

    hidden_states = jax.random.normal(kx, (BATCH, MAX_LEN, HIDDEN), jnp.float32)
    attribute_hidden_states = [
        jax.random.normal(ka, (BATCH, MAX_LEN, ATTR_HIDDEN), jnp.float32)]
    position_embedding = jax.random.normal(kp, (BATCH, MAX_LEN, HIDDEN), jnp.float32)

    # batch-invariant causal additive mask (0 where allowed, -10000 elsewhere)
    # TODO(synk): per-batch padding masks would need a (B, L, L) mask input.
    causal = jnp.tril(jnp.ones((MAX_LEN, MAX_LEN), jnp.float32))
    attention_mask = (1.0 - causal) * (-10000.0)

    all_h, all_a = acg_transformer_encoder(
        hidden_states, attribute_hidden_states, position_embedding,
        attention_mask, packed_params, output_all_encoded_layers=True)

    jax.block_until_ready((all_h, all_a))
    print("KERNEL_OK")
</pallas_src>

<mosaic_0001>
module attributes {stable_mosaic.version = 11 : i64} {
  func.func @acg_encoder_kernel(%arg0: memref<16x48xf32, #tpu.memory_space<vmem>>, %arg1: memref<16x48xf32, #tpu.memory_space<vmem>>, %arg2: memref<8x8xf32, #tpu.memory_space<vmem>>, %arg3: memref<2x96x304xf32, #tpu.memory_space<vmem>>, %arg4: memref<2x1x304xf32, #tpu.memory_space<vmem>>, %arg5: memref<2x48x48xf32, #tpu.memory_space<vmem>>, %arg6: memref<2x1x48xf32, #tpu.memory_space<vmem>>, %arg7: memref<2x4x32xf32, #tpu.memory_space<vmem>>, %arg8: memref<2x4x16xf32, #tpu.memory_space<vmem>>, %arg9: memref<2x48x128xf32, #tpu.memory_space<vmem>>, %arg10: memref<2x1x128xf32, #tpu.memory_space<vmem>>, %arg11: memref<2x128x48xf32, #tpu.memory_space<vmem>>, %arg12: memref<2x1x48xf32, #tpu.memory_space<vmem>>, %arg13: memref<2x16x48xf32, #tpu.memory_space<vmem>>) attributes {dimension_semantics = [], scalar_prefetch = 0 : i64, scratch_operands = 0 : i64, tpu.core_type = #tpu.core_type<tc>} {
    %c0 = arith.constant 0 : index
    %c0_0 = arith.constant 0 : index
    %0 = vector.load %arg1[%c0, %c0_0] : memref<16x48xf32, #tpu.memory_space<vmem>>, vector<16x48xf32>
    %c0_1 = arith.constant 0 : index
    %c0_2 = arith.constant 0 : index
    %1 = vector.load %arg0[%c0_1, %c0_2] : memref<16x48xf32, #tpu.memory_space<vmem>>, vector<16x48xf32>
    %c0_3 = arith.constant 0 : index
    %c0_4 = arith.constant 0 : index
    %2 = vector.load %arg2[%c0_3, %c0_4] : memref<8x8xf32, #tpu.memory_space<vmem>>, vector<8x8xf32>
    %3 = vector.shape_cast %2 : vector<8x8xf32> to vector<1x8x8xf32>
    %4 = vector.shape_cast %3 : vector<1x8x8xf32> to vector<1x8x8xf32>
    %5 = vector.broadcast %4 : vector<1x8x8xf32> to vector<4x8x8xf32>
    %6 = tpu.concatenate %1, %0 in 1 : vector<16x48xf32>, vector<16x48xf32> -> vector<16x96xf32>
    %c0_5 = arith.constant 0 : index
    %c0_6 = arith.constant 0 : index
    %c0_7 = arith.constant 0 : index
    %7 = vector.load %arg3[%c0_5, %c0_6, %c0_7] : memref<2x96x304xf32, #tpu.memory_space<vmem>>, vector<1x96x304xf32>
    %8 = vector.shape_cast %7 : vector<1x96x304xf32> to vector<96x304xf32>
    %cst = arith.constant dense<0.000000e+00> : vector<16x304xf32>
    %9 = tpu.matmul %6, %8, %cst {dimension_numbers = #tpu.dot_dimension_numbers<[1], [0], [0], [1], [0, 0, 1, 1], [], []>} : vector<16x96xf32>, vector<96x304xf32>, vector<16x304xf32> -> vector<16x304xf32>
    %c0_8 = arith.constant 0 : index
    %c0_9 = arith.constant 0 : index
    %c0_10 = arith.constant 0 : index
    %10 = vector.load %arg4[%c0_8, %c0_9, %c0_10] : memref<2x1x304xf32, #tpu.memory_space<vmem>>, vector<1x1x304xf32>
    %11 = vector.shape_cast %10 : vector<1x1x304xf32> to vector<1x304xf32>
    %12 = vector.broadcast %11 : vector<1x304xf32> to vector<16x304xf32>
    %13 = arith.addf %9, %12 : vector<16x304xf32>
    %14 = vector.extract_strided_slice %13 {offsets = [0, 0], sizes = [16, 152], strides = [1, 1]} : vector<16x304xf32> to vector<16x152xf32>
    %15 = vector.extract_strided_slice %13 {offsets = [0, 152], sizes = [16, 152], strides = [1, 1]} : vector<16x304xf32> to vector<16x152xf32>
    %16 = tpu.concatenate %14, %15 in 0 : vector<16x152xf32>, vector<16x152xf32> -> vector<32x152xf32>
    %17 = vector.extract_strided_slice %16 {offsets = [0, 0], sizes = [32, 40], strides = [1, 1]} : vector<32x152xf32> to vector<32x40xf32>
    %18 = vector.shape_cast %17 : vector<32x40xf32> to vector<4x8x40xf32>
    %19 = vector.extract_strided_slice %16 {offsets = [0, 40], sizes = [32, 40], strides = [1, 1]} : vector<32x152xf32> to vector<32x40xf32>
    %20 = vector.shape_cast %19 : vector<32x40xf32> to vector<4x8x40xf32>
    %21 = vector.extract_strided_slice %16 {offsets = [0, 80], sizes = [32, 24], strides = [1, 1]} : vector<32x152xf32> to vector<32x24xf32>
    %22 = vector.shape_cast %21 : vector<32x24xf32> to vector<4x8x24xf32>
    %23 = vector.extract_strided_slice %16 {offsets = [0, 104], sizes = [32, 24], strides = [1, 1]} : vector<32x152xf32> to vector<32x24xf32>
    %24 = vector.shape_cast %23 : vector<32x24xf32> to vector<4x8x24xf32>
    %25 = vector.extract_strided_slice %16 {offsets = [0, 128], sizes = [32, 16], strides = [1, 1]} : vector<32x152xf32> to vector<32x16xf32>
    %26 = vector.shape_cast %25 : vector<32x16xf32> to vector<4x8x16xf32>
    %27 = vector.extract_strided_slice %16 {offsets = [0, 144], sizes = [32, 8], strides = [1, 1]} : vector<32x152xf32> to vector<32x8xf32>
    %28 = vector.shape_cast %27 : vector<32x8xf32> to vector<4x8x8xf32>
    %cst_11 = arith.constant dense<0.000000e+00> : vector<4x8x8xf32>
    %29 = tpu.matmul %18, %20, %cst_11 {dimension_numbers = #tpu.dot_dimension_numbers<[2], [2], [1], [1], [0, 0, 0, 1, 1, 1], [0], [0]>} : vector<4x8x40xf32>, vector<4x8x40xf32>, vector<4x8x8xf32> -> vector<4x8x8xf32>
    %30 = arith.addf %29, %5 : vector<4x8x8xf32>
    %cst_12 = arith.constant dense<0xFF800000> : vector<4x8xf32>
    %31 = vector.multi_reduction <maximumf>, %30, %cst_12 [2] : vector<4x8x8xf32> to vector<4x8xf32>
    %32 = vector.shape_cast %31 : vector<4x8xf32> to vector<4x8x1xf32>
    %33 = vector.broadcast %32 : vector<4x8x1xf32> to vector<4x8x8xf32>
    %34 = arith.subf %30, %33 : vector<4x8x8xf32>
    %35 = math.exp %34 : vector<4x8x8xf32>
    %cst_13 = arith.constant dense<0.000000e+00> : vector<4x8xf32>
    %36 = vector.multi_reduction <add>, %35, %cst_13 [2] : vector<4x8x8xf32> to vector<4x8xf32>
    %37 = vector.shape_cast %36 : vector<4x8xf32> to vector<4x8x1xf32>
    %38 = vector.broadcast %37 : vector<4x8x1xf32> to vector<4x8x8xf32>
    %39 = arith.divf %35, %38 : vector<4x8x8xf32>
    %cst_14 = arith.constant dense<0.000000e+00> : vector<4x8x8xf32>
    %40 = tpu.matmul %22, %24, %cst_14 {dimension_numbers = #tpu.dot_dimension_numbers<[2], [2], [1], [1], [0, 0, 0, 1, 1, 1], [0], [0]>} : vector<4x8x24xf32>, vector<4x8x24xf32>, vector<4x8x8xf32> -> vector<4x8x8xf32>
    %41 = arith.addf %40, %5 : vector<4x8x8xf32>
    %cst_15 = arith.constant dense<0xFF800000> : vector<4x8xf32>
    %42 = vector.multi_reduction <maximumf>, %41, %cst_15 [2] : vector<4x8x8xf32> to vector<4x8xf32>
    %43 = vector.shape_cast %42 : vector<4x8xf32> to vector<4x8x1xf32>
    %44 = vector.broadcast %43 : vector<4x8x1xf32> to vector<4x8x8xf32>
    %45 = arith.subf %41, %44 : vector<4x8x8xf32>
    %46 = math.exp %45 : vector<4x8x8xf32>
    %cst_16 = arith.constant dense<0.000000e+00> : vector<4x8xf32>
    %47 = vector.multi_reduction <add>, %46, %cst_16 [2] : vector<4x8x8xf32> to vector<4x8xf32>
    %48 = vector.shape_cast %47 : vector<4x8xf32> to vector<4x8x1xf32>
    %49 = vector.broadcast %48 : vector<4x8x1xf32> to vector<4x8x8xf32>
    %50 = arith.divf %46, %49 : vector<4x8x8xf32>
    %cst_17 = arith.constant dense<0.000000e+00> : vector<4x8x16xf32>
    %51 = tpu.matmul %39, %26, %cst_17 {dimension_numbers = #tpu.dot_dimension_numbers<[2], [1], [1], [2], [0, 0, 0, 1, 1, 2], [0], [0]>} : vector<4x8x8xf32>, vector<4x8x16xf32>, vector<4x8x16xf32> -> vector<4x8x16xf32>
    %52 = vector.extract_strided_slice %51 {offsets = [0, 0, 0], sizes = [2, 8, 16], strides = [1, 1, 1]} : vector<4x8x16xf32> to vector<2x8x16xf32>
    %53 = vector.shape_cast %52 : vector<2x8x16xf32> to vector<16x16xf32>
    %54 = vector.extract_strided_slice %51 {offsets = [2, 0, 0], sizes = [2, 8, 16], strides = [1, 1, 1]} : vector<4x8x16xf32> to vector<2x8x16xf32>
    %55 = vector.shape_cast %54 : vector<2x8x16xf32> to vector<16x16xf32>
    %56 = tpu.concatenate %53, %55 in 1 : vector<16x16xf32>, vector<16x16xf32> -> vector<16x32xf32>
    %cst_18 = arith.constant dense<0.000000e+00> : vector<4x8x8xf32>
    %57 = tpu.matmul %50, %28, %cst_18 {dimension_numbers = #tpu.dot_dimension_numbers<[2], [1], [1], [2], [0, 0, 0, 1, 1, 2], [0], [0]>} : vector<4x8x8xf32>, vector<4x8x8xf32>, vector<4x8x8xf32> -> vector<4x8x8xf32>
    %58 = vector.extract_strided_slice %57 {offsets = [0, 0, 0], sizes = [2, 8, 8], strides = [1, 1, 1]} : vector<4x8x8xf32> to vector<2x8x8xf32>
    %59 = vector.shape_cast %58 : vector<2x8x8xf32> to vector<16x8xf32>
    %60 = vector.extract_strided_slice %57 {offsets = [2, 0, 0], sizes = [2, 8, 8], strides = [1, 1, 1]} : vector<4x8x8xf32> to vector<2x8x8xf32>
    %61 = vector.shape_cast %60 : vector<2x8x8xf32> to vector<16x8xf32>
    %62 = tpu.concatenate %59, %61 in 1 : vector<16x8xf32>, vector<16x8xf32> -> vector<16x16xf32>
    %63 = tpu.concatenate %56, %62 in 1 : vector<16x32xf32>, vector<16x16xf32> -> vector<16x48xf32>
    %c0_19 = arith.constant 0 : index
    %c0_20 = arith.constant 0 : index
    %c0_21 = arith.constant 0 : index
    %64 = vector.load %arg5[%c0_19, %c0_20, %c0_21] : memref<2x48x48xf32, #tpu.memory_space<vmem>>, vector<1x48x48xf32>
    %65 = vector.shape_cast %64 : vector<1x48x48xf32> to vector<48x48xf32>
    %cst_22 = arith.constant dense<0.000000e+00> : vector<16x48xf32>
    %66 = tpu.matmul %63, %65, %cst_22 {dimension_numbers = #tpu.dot_dimension_numbers<[1], [0], [0], [1], [0, 0, 1, 1], [], []>} : vector<16x48xf32>, vector<48x48xf32>, vector<16x48xf32> -> vector<16x48xf32>
    %c0_23 = arith.constant 0 : index
    %c0_24 = arith.constant 0 : index
    %c0_25 = arith.constant 0 : index
    %67 = vector.load %arg6[%c0_23, %c0_24, %c0_25] : memref<2x1x48xf32, #tpu.memory_space<vmem>>, vector<1x1x48xf32>
    %68 = vector.shape_cast %67 : vector<1x1x48xf32> to vector<1x48xf32>
    %69 = vector.broadcast %68 : vector<1x48xf32> to vector<16x48xf32>
    %70 = arith.addf %66, %69 : vector<16x48xf32>
    %71 = arith.addf %70, %1 : vector<16x48xf32>
    %c0_26 = arith.constant 0 : index
    %c0_27 = arith.constant 0 : index
    %c0_28 = arith.constant 0 : index
    %72 = vector.load %arg7[%c0_26, %c0_27, %c0_28] : memref<2x4x32xf32, #tpu.memory_space<vmem>>, vector<1x4x32xf32>
    %73 = vector.shape_cast %72 : vector<1x4x32xf32> to vector<4x32xf32>
    %c0_29 = arith.constant 0 : index
    %c0_30 = arith.constant 0 : index
    %c0_31 = arith.constant 0 : index
    %74 = vector.load %arg8[%c0_29, %c0_30, %c0_31] : memref<2x4x16xf32, #tpu.memory_space<vmem>>, vector<1x4x16xf32>
    %75 = vector.shape_cast %74 : vector<1x4x16xf32> to vector<4x16xf32>
    %76 = vector.extract_strided_slice %71 {offsets = [0, 0], sizes = [16, 32], strides = [1, 1]} : vector<16x48xf32> to vector<16x32xf32>
    %77 = vector.extract_strided_slice %73 {offsets = [0, 0], sizes = [1, 32], strides = [1, 1]} : vector<4x32xf32> to vector<1x32xf32>
    %78 = vector.extract_strided_slice %73 {offsets = [1, 0], sizes = [1, 32], strides = [1, 1]} : vector<4x32xf32> to vector<1x32xf32>
    %cst_32 = arith.constant dense<0.000000e+00> : vector<16xf32>
    %79 = vector.multi_reduction <add>, %76, %cst_32 [1] : vector<16x32xf32> to vector<16xf32>
    %80 = vector.shape_cast %79 : vector<16xf32> to vector<16x1xf32>
    %cst_33 = arith.constant 3.200000e+01 : f32
    %81 = vector.broadcast %cst_33 : f32 to vector<16x1xf32>
    %82 = arith.divf %80, %81 : vector<16x1xf32>
    %83 = vector.broadcast %82 : vector<16x1xf32> to vector<16x32xf32>
    %84 = arith.subf %76, %83 : vector<16x32xf32>
    %85 = arith.mulf %84, %84 : vector<16x32xf32>
    %cst_34 = arith.constant dense<0.000000e+00> : vector<16xf32>
    %86 = vector.multi_reduction <add>, %85, %cst_34 [1] : vector<16x32xf32> to vector<16xf32>
    %87 = vector.shape_cast %86 : vector<16xf32> to vector<16x1xf32>
    %cst_35 = arith.constant 3.200000e+01 : f32
    %88 = vector.broadcast %cst_35 : f32 to vector<16x1xf32>
    %89 = arith.divf %87, %88 : vector<16x1xf32>
    %90 = vector.broadcast %82 : vector<16x1xf32> to vector<16x32xf32>
    %91 = arith.subf %76, %90 : vector<16x32xf32>
    %cst_36 = arith.constant 9.99999996E-13 : f32
    %92 = vector.broadcast %cst_36 : f32 to vector<16x1xf32>
    %93 = arith.addf %89, %92 : vector<16x1xf32>
    %94 = math.rsqrt %93 : vector<16x1xf32>
    %95 = vector.broadcast %94 : vector<16x1xf32> to vector<16x32xf32>
    %96 = arith.mulf %91, %95 : vector<16x32xf32>
    %97 = vector.broadcast %77 : vector<1x32xf32> to vector<16x32xf32>
    %98 = arith.mulf %96, %97 : vector<16x32xf32>
    %99 = vector.broadcast %78 : vector<1x32xf32> to vector<16x32xf32>
    %100 = arith.addf %98, %99 : vector<16x32xf32>
    %101 = vector.extract_strided_slice %71 {offsets = [0, 32], sizes = [16, 16], strides = [1, 1]} : vector<16x48xf32> to vector<16x16xf32>
    %102 = vector.extract_strided_slice %75 {offsets = [0, 0], sizes = [1, 16], strides = [1, 1]} : vector<4x16xf32> to vector<1x16xf32>
    %103 = vector.extract_strided_slice %75 {offsets = [1, 0], sizes = [1, 16], strides = [1, 1]} : vector<4x16xf32> to vector<1x16xf32>
    %cst_37 = arith.constant dense<0.000000e+00> : vector<16xf32>
    %104 = vector.multi_reduction <add>, %101, %cst_37 [1] : vector<16x16xf32> to vector<16xf32>
    %105 = vector.shape_cast %104 : vector<16xf32> to vector<16x1xf32>
    %cst_38 = arith.constant 1.600000e+01 : f32
    %106 = vector.broadcast %cst_38 : f32 to vector<16x1xf32>
    %107 = arith.divf %105, %106 : vector<16x1xf32>
    %108 = vector.broadcast %107 : vector<16x1xf32> to vector<16x16xf32>
    %109 = arith.subf %101, %108 : vector<16x16xf32>
    %110 = arith.mulf %109, %109 : vector<16x16xf32>
    %cst_39 = arith.constant dense<0.000000e+00> : vector<16xf32>
    %111 = vector.multi_reduction <add>, %110, %cst_39 [1] : vector<16x16xf32> to vector<16xf32>
    %112 = vector.shape_cast %111 : vector<16xf32> to vector<16x1xf32>
    %cst_40 = arith.constant 1.600000e+01 : f32
    %113 = vector.broadcast %cst_40 : f32 to vector<16x1xf32>
    %114 = arith.divf %112, %113 : vector<16x1xf32>
    %115 = vector.broadcast %107 : vector<16x1xf32> to vector<16x16xf32>
    %116 = arith.subf %101, %115 : vector<16x16xf32>
    %cst_41 = arith.constant 9.99999996E-13 : f32
    %117 = vector.broadcast %cst_41 : f32 to vector<16x1xf32>
    %118 = arith.addf %114, %117 : vector<16x1xf32>
    %119 = math.rsqrt %118 : vector<16x1xf32>
    %120 = vector.broadcast %119 : vector<16x1xf32> to vector<16x16xf32>
    %121 = arith.mulf %116, %120 : vector<16x16xf32>
    %122 = vector.broadcast %102 : vector<1x16xf32> to vector<16x16xf32>
    %123 = arith.mulf %121, %122 : vector<16x16xf32>
    %124 = vector.broadcast %103 : vector<1x16xf32> to vector<16x16xf32>
    %125 = arith.addf %123, %124 : vector<16x16xf32>
    %126 = tpu.concatenate %100, %125 in 1 : vector<16x32xf32>, vector<16x16xf32> -> vector<16x48xf32>
    %c0_42 = arith.constant 0 : index
    %c0_43 = arith.constant 0 : index
    %c0_44 = arith.constant 0 : index
    %127 = vector.load %arg9[%c0_42, %c0_43, %c0_44] : memref<2x48x128xf32, #tpu.memory_space<vmem>>, vector<1x48x128xf32>
    %128 = vector.shape_cast %127 : vector<1x48x128xf32> to vector<48x128xf32>
    %cst_45 = arith.constant dense<0.000000e+00> : vector<16x128xf32>
    %129 = tpu.matmul %126, %128, %cst_45 {dimension_numbers = #tpu.dot_dimension_numbers<[1], [0], [0], [1], [0, 0, 1, 1], [], []>} : vector<16x48xf32>, vector<48x128xf32>, vector<16x128xf32> -> vector<16x128xf32>
    %c0_46 = arith.constant 0 : index
    %c0_47 = arith.constant 0 : index
    %c0_48 = arith.constant 0 : index
    %130 = vector.load %arg10[%c0_46, %c0_47, %c0_48] : memref<2x1x128xf32, #tpu.memory_space<vmem>>, vector<1x1x128xf32>
    %131 = vector.shape_cast %130 : vector<1x1x128xf32> to vector<1x128xf32>
    %132 = vector.broadcast %131 : vector<1x128xf32> to vector<16x128xf32>
    %133 = arith.addf %129, %132 : vector<16x128xf32>
    %cst_49 = arith.constant 5.000000e-01 : f32
    %134 = vector.broadcast %cst_49 : f32 to vector<16x128xf32>
    %135 = arith.mulf %133, %134 : vector<16x128xf32>
    %cst_50 = arith.constant 0.707106769 : f32
    %136 = vector.broadcast %cst_50 : f32 to vector<16x128xf32>
    %137 = arith.mulf %133, %136 : vector<16x128xf32>
    %138 = math.erf %137 : vector<16x128xf32>
    %cst_51 = arith.constant 1.000000e+00 : f32
    %139 = vector.broadcast %cst_51 : f32 to vector<16x128xf32>
    %140 = arith.addf %139, %138 : vector<16x128xf32>
    %141 = arith.mulf %135, %140 : vector<16x128xf32>
    %c0_52 = arith.constant 0 : index
    %c0_53 = arith.constant 0 : index
    %c0_54 = arith.constant 0 : index
    %142 = vector.load %arg11[%c0_52, %c0_53, %c0_54] : memref<2x128x48xf32, #tpu.memory_space<vmem>>, vector<1x128x48xf32>
    %143 = vector.shape_cast %142 : vector<1x128x48xf32> to vector<128x48xf32>
    %cst_55 = arith.constant dense<0.000000e+00> : vector<16x48xf32>
    %144 = tpu.matmul %141, %143, %cst_55 {dimension_numbers = #tpu.dot_dimension_numbers<[1], [0], [0], [1], [0, 0, 1, 1], [], []>} : vector<16x128xf32>, vector<128x48xf32>, vector<16x48xf32> -> vector<16x48xf32>
    %c0_56 = arith.constant 0 : index
    %c0_57 = arith.constant 0 : index
    %c0_58 = arith.constant 0 : index
    %145 = vector.load %arg12[%c0_56, %c0_57, %c0_58] : memref<2x1x48xf32, #tpu.memory_space<vmem>>, vector<1x1x48xf32>
    %146 = vector.shape_cast %145 : vector<1x1x48xf32> to vector<1x48xf32>
    %147 = vector.broadcast %146 : vector<1x48xf32> to vector<16x48xf32>
    %148 = arith.addf %144, %147 : vector<16x48xf32>
    %149 = arith.addf %148, %126 : vector<16x48xf32>
    %150 = vector.extract_strided_slice %149 {offsets = [0, 0], sizes = [16, 32], strides = [1, 1]} : vector<16x48xf32> to vector<16x32xf32>
    %151 = vector.extract_strided_slice %73 {offsets = [2, 0], sizes = [1, 32], strides = [1, 1]} : vector<4x32xf32> to vector<1x32xf32>
    %152 = vector.extract_strided_slice %73 {offsets = [3, 0], sizes = [1, 32], strides = [1, 1]} : vector<4x32xf32> to vector<1x32xf32>
    %cst_59 = arith.constant dense<0.000000e+00> : vector<16xf32>
    %153 = vector.multi_reduction <add>, %150, %cst_59 [1] : vector<16x32xf32> to vector<16xf32>
    %154 = vector.shape_cast %153 : vector<16xf32> to vector<16x1xf32>
    %cst_60 = arith.constant 3.200000e+01 : f32
    %155 = vector.broadcast %cst_60 : f32 to vector<16x1xf32>
    %156 = arith.divf %154, %155 : vector<16x1xf32>
    %157 = vector.broadcast %156 : vector<16x1xf32> to vector<16x32xf32>
    %158 = arith.subf %150, %157 : vector<16x32xf32>
    %159 = arith.mulf %158, %158 : vector<16x32xf32>
    %cst_61 = arith.constant dense<0.000000e+00> : vector<16xf32>
    %160 = vector.multi_reduction <add>, %159, %cst_61 [1] : vector<16x32xf32> to vector<16xf32>
    %161 = vector.shape_cast %160 : vector<16xf32> to vector<16x1xf32>
    %cst_62 = arith.constant 3.200000e+01 : f32
    %162 = vector.broadcast %cst_62 : f32 to vector<16x1xf32>
    %163 = arith.divf %161, %162 : vector<16x1xf32>
    %164 = vector.broadcast %156 : vector<16x1xf32> to vector<16x32xf32>
    %165 = arith.subf %150, %164 : vector<16x32xf32>
    %cst_63 = arith.constant 9.99999996E-13 : f32
    %166 = vector.broadcast %cst_63 : f32 to vector<16x1xf32>
    %167 = arith.addf %163, %166 : vector<16x1xf32>
    %168 = math.rsqrt %167 : vector<16x1xf32>
    %169 = vector.broadcast %168 : vector<16x1xf32> to vector<16x32xf32>
    %170 = arith.mulf %165, %169 : vector<16x32xf32>
    %171 = vector.broadcast %151 : vector<1x32xf32> to vector<16x32xf32>
    %172 = arith.mulf %170, %171 : vector<16x32xf32>
    %173 = vector.broadcast %152 : vector<1x32xf32> to vector<16x32xf32>
    %174 = arith.addf %172, %173 : vector<16x32xf32>
    %175 = vector.extract_strided_slice %149 {offsets = [0, 32], sizes = [16, 16], strides = [1, 1]} : vector<16x48xf32> to vector<16x16xf32>
    %176 = vector.extract_strided_slice %75 {offsets = [2, 0], sizes = [1, 16], strides = [1, 1]} : vector<4x16xf32> to vector<1x16xf32>
    %177 = vector.extract_strided_slice %75 {offsets = [3, 0], sizes = [1, 16], strides = [1, 1]} : vector<4x16xf32> to vector<1x16xf32>
    %cst_64 = arith.constant dense<0.000000e+00> : vector<16xf32>
    %178 = vector.multi_reduction <add>, %175, %cst_64 [1] : vector<16x16xf32> to vector<16xf32>
    %179 = vector.shape_cast %178 : vector<16xf32> to vector<16x1xf32>
    %cst_65 = arith.constant 1.600000e+01 : f32
    %180 = vector.broadcast %cst_65 : f32 to vector<16x1xf32>
    %181 = arith.divf %179, %180 : vector<16x1xf32>
    %182 = vector.broadcast %181 : vector<16x1xf32> to vector<16x16xf32>
    %183 = arith.subf %175, %182 : vector<16x16xf32>
    %184 = arith.mulf %183, %183 : vector<16x16xf32>
    %cst_66 = arith.constant dense<0.000000e+00> : vector<16xf32>
    %185 = vector.multi_reduction <add>, %184, %cst_66 [1] : vector<16x16xf32> to vector<16xf32>
    %186 = vector.shape_cast %185 : vector<16xf32> to vector<16x1xf32>
    %cst_67 = arith.constant 1.600000e+01 : f32
    %187 = vector.broadcast %cst_67 : f32 to vector<16x1xf32>
    %188 = arith.divf %186, %187 : vector<16x1xf32>
    %189 = vector.broadcast %181 : vector<16x1xf32> to vector<16x16xf32>
    %190 = arith.subf %175, %189 : vector<16x16xf32>
    %cst_68 = arith.constant 9.99999996E-13 : f32
    %191 = vector.broadcast %cst_68 : f32 to vector<16x1xf32>
    %192 = arith.addf %188, %191 : vector<16x1xf32>
    %193 = math.rsqrt %192 : vector<16x1xf32>
    %194 = vector.broadcast %193 : vector<16x1xf32> to vector<16x16xf32>
    %195 = arith.mulf %190, %194 : vector<16x16xf32>
    %196 = vector.broadcast %176 : vector<1x16xf32> to vector<16x16xf32>
    %197 = arith.mulf %195, %196 : vector<16x16xf32>
    %198 = vector.broadcast %177 : vector<1x16xf32> to vector<16x16xf32>
    %199 = arith.addf %197, %198 : vector<16x16xf32>
    %200 = tpu.concatenate %174, %199 in 1 : vector<16x32xf32>, vector<16x16xf32> -> vector<16x48xf32>
    %c0_69 = arith.constant 0 : index
    %c0_70 = arith.constant 0 : index
    %c0_71 = arith.constant 0 : index
    %201 = vector.load %arg13[%c0_69, %c0_70, %c0_71] : memref<2x16x48xf32, #tpu.memory_space<vmem>>, vector<1x16x48xf32>
    %202 = vector.shape_cast %201 : vector<1x16x48xf32> to vector<16x48xf32>
    %203 = vector.shape_cast %200 : vector<16x48xf32> to vector<1x16x48xf32>
    tpu.vector_store %arg13[%c0_69, %c0_70, %c0_71], %203 {strides = array<i32>} : memref<2x16x48xf32, #tpu.memory_space<vmem>>, vector<1x16x48xf32>,
    %204 = tpu.concatenate %200, %0 in 1 : vector<16x48xf32>, vector<16x48xf32> -> vector<16x96xf32>
    %c1 = arith.constant 1 : index
    %c0_72 = arith.constant 0 : index
    %c0_73 = arith.constant 0 : index
    %205 = vector.load %arg3[%c1, %c0_72, %c0_73] : memref<2x96x304xf32, #tpu.memory_space<vmem>>, vector<1x96x304xf32>
    %206 = vector.shape_cast %205 : vector<1x96x304xf32> to vector<96x304xf32>
    %cst_74 = arith.constant dense<0.000000e+00> : vector<16x304xf32>
    %207 = tpu.matmul %204, %206, %cst_74 {dimension_numbers = #tpu.dot_dimension_numbers<[1], [0], [0], [1], [0, 0, 1, 1], [], []>} : vector<16x96xf32>, vector<96x304xf32>, vector<16x304xf32> -> vector<16x304xf32>
    %c1_75 = arith.constant 1 : index
    %c0_76 = arith.constant 0 : index
    %c0_77 = arith.constant 0 : index
    %208 = vector.load %arg4[%c1_75, %c0_76, %c0_77] : memref<2x1x304xf32, #tpu.memory_space<vmem>>, vector<1x1x304xf32>
    %209 = vector.shape_cast %208 : vector<1x1x304xf32> to vector<1x304xf32>
    %210 = vector.broadcast %209 : vector<1x304xf32> to vector<16x304xf32>
    %211 = arith.addf %207, %210 : vector<16x304xf32>
    %212 = vector.extract_strided_slice %211 {offsets = [0, 0], sizes = [16, 152], strides = [1, 1]} : vector<16x304xf32> to vector<16x152xf32>
    %213 = vector.extract_strided_slice %211 {offsets = [0, 152], sizes = [16, 152], strides = [1, 1]} : vector<16x304xf32> to vector<16x152xf32>
    %214 = tpu.concatenate %212, %213 in 0 : vector<16x152xf32>, vector<16x152xf32> -> vector<32x152xf32>
    %215 = vector.extract_strided_slice %214 {offsets = [0, 0], sizes = [32, 40], strides = [1, 1]} : vector<32x152xf32> to vector<32x40xf32>
    %216 = vector.shape_cast %215 : vector<32x40xf32> to vector<4x8x40xf32>
    %217 = vector.extract_strided_slice %214 {offsets = [0, 40], sizes = [32, 40], strides = [1, 1]} : vector<32x152xf32> to vector<32x40xf32>
    %218 = vector.shape_cast %217 : vector<32x40xf32> to vector<4x8x40xf32>
    %219 = vector.extract_strided_slice %214 {offsets = [0, 80], sizes = [32, 24], strides = [1, 1]} : vector<32x152xf32> to vector<32x24xf32>
    %220 = vector.shape_cast %219 : vector<32x24xf32> to vector<4x8x24xf32>
    %221 = vector.extract_strided_slice %214 {offsets = [0, 104], sizes = [32, 24], strides = [1, 1]} : vector<32x152xf32> to vector<32x24xf32>
    %222 = vector.shape_cast %221 : vector<32x24xf32> to vector<4x8x24xf32>
    %223 = vector.extract_strided_slice %214 {offsets = [0, 128], sizes = [32, 16], strides = [1, 1]} : vector<32x152xf32> to vector<32x16xf32>
    %224 = vector.shape_cast %223 : vector<32x16xf32> to vector<4x8x16xf32>
    %225 = vector.extract_strided_slice %214 {offsets = [0, 144], sizes = [32, 8], strides = [1, 1]} : vector<32x152xf32> to vector<32x8xf32>
    %226 = vector.shape_cast %225 : vector<32x8xf32> to vector<4x8x8xf32>
    %cst_78 = arith.constant dense<0.000000e+00> : vector<4x8x8xf32>
    %227 = tpu.matmul %216, %218, %cst_78 {dimension_numbers = #tpu.dot_dimension_numbers<[2], [2], [1], [1], [0, 0, 0, 1, 1, 1], [0], [0]>} : vector<4x8x40xf32>, vector<4x8x40xf32>, vector<4x8x8xf32> -> vector<4x8x8xf32>
    %228 = arith.addf %227, %5 : vector<4x8x8xf32>
    %cst_79 = arith.constant dense<0xFF800000> : vector<4x8xf32>
    %229 = vector.multi_reduction <maximumf>, %228, %cst_79 [2] : vector<4x8x8xf32> to vector<4x8xf32>
    %230 = vector.shape_cast %229 : vector<4x8xf32> to vector<4x8x1xf32>
    %231 = vector.broadcast %230 : vector<4x8x1xf32> to vector<4x8x8xf32>
    %232 = arith.subf %228, %231 : vector<4x8x8xf32>
    %233 = math.exp %232 : vector<4x8x8xf32>
    %cst_80 = arith.constant dense<0.000000e+00> : vector<4x8xf32>
    %234 = vector.multi_reduction <add>, %233, %cst_80 [2] : vector<4x8x8xf32> to vector<4x8xf32>
    %235 = vector.shape_cast %234 : vector<4x8xf32> to vector<4x8x1xf32>
    %236 = vector.broadcast %235 : vector<4x8x1xf32> to vector<4x8x8xf32>
    %237 = arith.divf %233, %236 : vector<4x8x8xf32>
    %cst_81 = arith.constant dense<0.000000e+00> : vector<4x8x8xf32>
    %238 = tpu.matmul %220, %222, %cst_81 {dimension_numbers = #tpu.dot_dimension_numbers<[2], [2], [1], [1], [0, 0, 0, 1, 1, 1], [0], [0]>} : vector<4x8x24xf32>, vector<4x8x24xf32>, vector<4x8x8xf32> -> vector<4x8x8xf32>
    %239 = arith.addf %238, %5 : vector<4x8x8xf32>
    %cst_82 = arith.constant dense<0xFF800000> : vector<4x8xf32>
    %240 = vector.multi_reduction <maximumf>, %239, %cst_82 [2] : vector<4x8x8xf32> to vector<4x8xf32>
    %241 = vector.shape_cast %240 : vector<4x8xf32> to vector<4x8x1xf32>
    %242 = vector.broadcast %241 : vector<4x8x1xf32> to vector<4x8x8xf32>
    %243 = arith.subf %239, %242 : vector<4x8x8xf32>
    %244 = math.exp %243 : vector<4x8x8xf32>
    %cst_83 = arith.constant dense<0.000000e+00> : vector<4x8xf32>
    %245 = vector.multi_reduction <add>, %244, %cst_83 [2] : vector<4x8x8xf32> to vector<4x8xf32>
    %246 = vector.shape_cast %245 : vector<4x8xf32> to vector<4x8x1xf32>
    %247 = vector.broadcast %246 : vector<4x8x1xf32> to vector<4x8x8xf32>
    %248 = arith.divf %244, %247 : vector<4x8x8xf32>
    %cst_84 = arith.constant dense<0.000000e+00> : vector<4x8x16xf32>
    %249 = tpu.matmul %237, %224, %cst_84 {dimension_numbers = #tpu.dot_dimension_numbers<[2], [1], [1], [2], [0, 0, 0, 1, 1, 2], [0], [0]>} : vector<4x8x8xf32>, vector<4x8x16xf32>, vector<4x8x16xf32> -> vector<4x8x16xf32>
    %250 = vector.extract_strided_slice %249 {offsets = [0, 0, 0], sizes = [2, 8, 16], strides = [1, 1, 1]} : vector<4x8x16xf32> to vector<2x8x16xf32>
    %251 = vector.shape_cast %250 : vector<2x8x16xf32> to vector<16x16xf32>
    %252 = vector.extract_strided_slice %249 {offsets = [2, 0, 0], sizes = [2, 8, 16], strides = [1, 1, 1]} : vector<4x8x16xf32> to vector<2x8x16xf32>
    %253 = vector.shape_cast %252 : vector<2x8x16xf32> to vector<16x16xf32>
    %254 = tpu.concatenate %251, %253 in 1 : vector<16x16xf32>, vector<16x16xf32> -> vector<16x32xf32>
    %cst_85 = arith.constant dense<0.000000e+00> : vector<4x8x8xf32>
    %255 = tpu.matmul %248, %226, %cst_85 {dimension_numbers = #tpu.dot_dimension_numbers<[2], [1], [1], [2], [0, 0, 0, 1, 1, 2], [0], [0]>} : vector<4x8x8xf32>, vector<4x8x8xf32>, vector<4x8x8xf32> -> vector<4x8x8xf32>
    %256 = vector.extract_strided_slice %255 {offsets = [0, 0, 0], sizes = [2, 8, 8], strides = [1, 1, 1]} : vector<4x8x8xf32> to vector<2x8x8xf32>
    %257 = vector.shape_cast %256 : vector<2x8x8xf32> to vector<16x8xf32>
    %258 = vector.extract_strided_slice %255 {offsets = [2, 0, 0], sizes = [2, 8, 8], strides = [1, 1, 1]} : vector<4x8x8xf32> to vector<2x8x8xf32>
    %259 = vector.shape_cast %258 : vector<2x8x8xf32> to vector<16x8xf32>
    %260 = tpu.concatenate %257, %259 in 1 : vector<16x8xf32>, vector<16x8xf32> -> vector<16x16xf32>
    %261 = tpu.concatenate %254, %260 in 1 : vector<16x32xf32>, vector<16x16xf32> -> vector<16x48xf32>
    %c1_86 = arith.constant 1 : index
    %c0_87 = arith.constant 0 : index
    %c0_88 = arith.constant 0 : index
    %262 = vector.load %arg5[%c1_86, %c0_87, %c0_88] : memref<2x48x48xf32, #tpu.memory_space<vmem>>, vector<1x48x48xf32>
    %263 = vector.shape_cast %262 : vector<1x48x48xf32> to vector<48x48xf32>
    %cst_89 = arith.constant dense<0.000000e+00> : vector<16x48xf32>
    %264 = tpu.matmul %261, %263, %cst_89 {dimension_numbers = #tpu.dot_dimension_numbers<[1], [0], [0], [1], [0, 0, 1, 1], [], []>} : vector<16x48xf32>, vector<48x48xf32>, vector<16x48xf32> -> vector<16x48xf32>
    %c1_90 = arith.constant 1 : index
    %c0_91 = arith.constant 0 : index
    %c0_92 = arith.constant 0 : index
    %265 = vector.load %arg6[%c1_90, %c0_91, %c0_92] : memref<2x1x48xf32, #tpu.memory_space<vmem>>, vector<1x1x48xf32>
    %266 = vector.shape_cast %265 : vector<1x1x48xf32> to vector<1x48xf32>
    %267 = vector.broadcast %266 : vector<1x48xf32> to vector<16x48xf32>
    %268 = arith.addf %264, %267 : vector<16x48xf32>
    %269 = arith.addf %268, %200 : vector<16x48xf32>
    %c1_93 = arith.constant 1 : index
    %c0_94 = arith.constant 0 : index
    %c0_95 = arith.constant 0 : index
    %270 = vector.load %arg7[%c1_93, %c0_94, %c0_95] : memref<2x4x32xf32, #tpu.memory_space<vmem>>, vector<1x4x32xf32>
    %271 = vector.shape_cast %270 : vector<1x4x32xf32> to vector<4x32xf32>
    %c1_96 = arith.constant 1 : index
    %c0_97 = arith.constant 0 : index
    %c0_98 = arith.constant 0 : index
    %272 = vector.load %arg8[%c1_96, %c0_97, %c0_98] : memref<2x4x16xf32, #tpu.memory_space<vmem>>, vector<1x4x16xf32>
    %273 = vector.shape_cast %272 : vector<1x4x16xf32> to vector<4x16xf32>
    %274 = vector.extract_strided_slice %269 {offsets = [0, 0], sizes = [16, 32], strides = [1, 1]} : vector<16x48xf32> to vector<16x32xf32>
    %275 = vector.extract_strided_slice %271 {offsets = [0, 0], sizes = [1, 32], strides = [1, 1]} : vector<4x32xf32> to vector<1x32xf32>
    %276 = vector.extract_strided_slice %271 {offsets = [1, 0], sizes = [1, 32], strides = [1, 1]} : vector<4x32xf32> to vector<1x32xf32>
    %cst_99 = arith.constant dense<0.000000e+00> : vector<16xf32>
    %277 = vector.multi_reduction <add>, %274, %cst_99 [1] : vector<16x32xf32> to vector<16xf32>
    %278 = vector.shape_cast %277 : vector<16xf32> to vector<16x1xf32>
    %cst_100 = arith.constant 3.200000e+01 : f32
    %279 = vector.broadcast %cst_100 : f32 to vector<16x1xf32>
    %280 = arith.divf %278, %279 : vector<16x1xf32>
    %281 = vector.broadcast %280 : vector<16x1xf32> to vector<16x32xf32>
    %282 = arith.subf %274, %281 : vector<16x32xf32>
    %283 = arith.mulf %282, %282 : vector<16x32xf32>
    %cst_101 = arith.constant dense<0.000000e+00> : vector<16xf32>
    %284 = vector.multi_reduction <add>, %283, %cst_101 [1] : vector<16x32xf32> to vector<16xf32>
    %285 = vector.shape_cast %284 : vector<16xf32> to vector<16x1xf32>
    %cst_102 = arith.constant 3.200000e+01 : f32
    %286 = vector.broadcast %cst_102 : f32 to vector<16x1xf32>
    %287 = arith.divf %285, %286 : vector<16x1xf32>
    %288 = vector.broadcast %280 : vector<16x1xf32> to vector<16x32xf32>
    %289 = arith.subf %274, %288 : vector<16x32xf32>
    %cst_103 = arith.constant 9.99999996E-13 : f32
    %290 = vector.broadcast %cst_103 : f32 to vector<16x1xf32>
    %291 = arith.addf %287, %290 : vector<16x1xf32>
    %292 = math.rsqrt %291 : vector<16x1xf32>
    %293 = vector.broadcast %292 : vector<16x1xf32> to vector<16x32xf32>
    %294 = arith.mulf %289, %293 : vector<16x32xf32>
    %295 = vector.broadcast %275 : vector<1x32xf32> to vector<16x32xf32>
    %296 = arith.mulf %294, %295 : vector<16x32xf32>
    %297 = vector.broadcast %276 : vector<1x32xf32> to vector<16x32xf32>
    %298 = arith.addf %296, %297 : vector<16x32xf32>
    %299 = vector.extract_strided_slice %269 {offsets = [0, 32], sizes = [16, 16], strides = [1, 1]} : vector<16x48xf32> to vector<16x16xf32>
    %300 = vector.extract_strided_slice %273 {offsets = [0, 0], sizes = [1, 16], strides = [1, 1]} : vector<4x16xf32> to vector<1x16xf32>
    %301 = vector.extract_strided_slice %273 {offsets = [1, 0], sizes = [1, 16], strides = [1, 1]} : vector<4x16xf32> to vector<1x16xf32>
    %cst_104 = arith.constant dense<0.000000e+00> : vector<16xf32>
    %302 = vector.multi_reduction <add>, %299, %cst_104 [1] : vector<16x16xf32> to vector<16xf32>
    %303 = vector.shape_cast %302 : vector<16xf32> to vector<16x1xf32>
    %cst_105 = arith.constant 1.600000e+01 : f32
    %304 = vector.broadcast %cst_105 : f32 to vector<16x1xf32>
    %305 = arith.divf %303, %304 : vector<16x1xf32>
    %306 = vector.broadcast %305 : vector<16x1xf32> to vector<16x16xf32>
    %307 = arith.subf %299, %306 : vector<16x16xf32>
    %308 = arith.mulf %307, %307 : vector<16x16xf32>
    %cst_106 = arith.constant dense<0.000000e+00> : vector<16xf32>
    %309 = vector.multi_reduction <add>, %308, %cst_106 [1] : vector<16x16xf32> to vector<16xf32>
    %310 = vector.shape_cast %309 : vector<16xf32> to vector<16x1xf32>
    %cst_107 = arith.constant 1.600000e+01 : f32
    %311 = vector.broadcast %cst_107 : f32 to vector<16x1xf32>
    %312 = arith.divf %310, %311 : vector<16x1xf32>
    %313 = vector.broadcast %305 : vector<16x1xf32> to vector<16x16xf32>
    %314 = arith.subf %299, %313 : vector<16x16xf32>
    %cst_108 = arith.constant 9.99999996E-13 : f32
    %315 = vector.broadcast %cst_108 : f32 to vector<16x1xf32>
    %316 = arith.addf %312, %315 : vector<16x1xf32>
    %317 = math.rsqrt %316 : vector<16x1xf32>
    %318 = vector.broadcast %317 : vector<16x1xf32> to vector<16x16xf32>
    %319 = arith.mulf %314, %318 : vector<16x16xf32>
    %320 = vector.broadcast %300 : vector<1x16xf32> to vector<16x16xf32>
    %321 = arith.mulf %319, %320 : vector<16x16xf32>
    %322 = vector.broadcast %301 : vector<1x16xf32> to vector<16x16xf32>
    %323 = arith.addf %321, %322 : vector<16x16xf32>
    %324 = tpu.concatenate %298, %323 in 1 : vector<16x32xf32>, vector<16x16xf32> -> vector<16x48xf32>
    %c1_109 = arith.constant 1 : index
    %c0_110 = arith.constant 0 : index
    %c0_111 = arith.constant 0 : index
    %325 = vector.load %arg9[%c1_109, %c0_110, %c0_111] : memref<2x48x128xf32, #tpu.memory_space<vmem>>, vector<1x48x128xf32>
    %326 = vector.shape_cast %325 : vector<1x48x128xf32> to vector<48x128xf32>
    %cst_112 = arith.constant dense<0.000000e+00> : vector<16x128xf32>
    %327 = tpu.matmul %324, %326, %cst_112 {dimension_numbers = #tpu.dot_dimension_numbers<[1], [0], [0], [1], [0, 0, 1, 1], [], []>} : vector<16x48xf32>, vector<48x128xf32>, vector<16x128xf32> -> vector<16x128xf32>
    %c1_113 = arith.constant 1 : index
    %c0_114 = arith.constant 0 : index
    %c0_115 = arith.constant 0 : index
    %328 = vector.load %arg10[%c1_113, %c0_114, %c0_115] : memref<2x1x128xf32, #tpu.memory_space<vmem>>, vector<1x1x128xf32>
    %329 = vector.shape_cast %328 : vector<1x1x128xf32> to vector<1x128xf32>
    %330 = vector.broadcast %329 : vector<1x128xf32> to vector<16x128xf32>
    %331 = arith.addf %327, %330 : vector<16x128xf32>
    %cst_116 = arith.constant 5.000000e-01 : f32
    %332 = vector.broadcast %cst_116 : f32 to vector<16x128xf32>
    %333 = arith.mulf %331, %332 : vector<16x128xf32>
    %cst_117 = arith.constant 0.707106769 : f32
    %334 = vector.broadcast %cst_117 : f32 to vector<16x128xf32>
    %335 = arith.mulf %331, %334 : vector<16x128xf32>
    %336 = math.erf %335 : vector<16x128xf32>
    %cst_118 = arith.constant 1.000000e+00 : f32
    %337 = vector.broadcast %cst_118 : f32 to vector<16x128xf32>
    %338 = arith.addf %337, %336 : vector<16x128xf32>
    %339 = arith.mulf %333, %338 : vector<16x128xf32>
    %c1_119 = arith.constant 1 : index
    %c0_120 = arith.constant 0 : index
    %c0_121 = arith.constant 0 : index
    %340 = vector.load %arg11[%c1_119, %c0_120, %c0_121] : memref<2x128x48xf32, #tpu.memory_space<vmem>>, vector<1x128x48xf32>
    %341 = vector.shape_cast %340 : vector<1x128x48xf32> to vector<128x48xf32>
    %cst_122 = arith.constant dense<0.000000e+00> : vector<16x48xf32>
    %342 = tpu.matmul %339, %341, %cst_122 {dimension_numbers = #tpu.dot_dimension_numbers<[1], [0], [0], [1], [0, 0, 1, 1], [], []>} : vector<16x128xf32>, vector<128x48xf32>, vector<16x48xf32> -> vector<16x48xf32>
    %c1_123 = arith.constant 1 : index
    %c0_124 = arith.constant 0 : index
    %c0_125 = arith.constant 0 : index
    %343 = vector.load %arg12[%c1_123, %c0_124, %c0_125] : memref<2x1x48xf32, #tpu.memory_space<vmem>>, vector<1x1x48xf32>
    %344 = vector.shape_cast %343 : vector<1x1x48xf32> to vector<1x48xf32>
    %345 = vector.broadcast %344 : vector<1x48xf32> to vector<16x48xf32>
    %346 = arith.addf %342, %345 : vector<16x48xf32>
    %347 = arith.addf %346, %324 : vector<16x48xf32>
    %348 = vector.extract_strided_slice %347 {offsets = [0, 0], sizes = [16, 32], strides = [1, 1]} : vector<16x48xf32> to vector<16x32xf32>
    %349 = vector.extract_strided_slice %271 {offsets = [2, 0], sizes = [1, 32], strides = [1, 1]} : vector<4x32xf32> to vector<1x32xf32>
    %350 = vector.extract_strided_slice %271 {offsets = [3, 0], sizes = [1, 32], strides = [1, 1]} : vector<4x32xf32> to vector<1x32xf32>
    %cst_126 = arith.constant dense<0.000000e+00> : vector<16xf32>
    %351 = vector.multi_reduction <add>, %348, %cst_126 [1] : vector<16x32xf32> to vector<16xf32>
    %352 = vector.shape_cast %351 : vector<16xf32> to vector<16x1xf32>
    %cst_127 = arith.constant 3.200000e+01 : f32
    %353 = vector.broadcast %cst_127 : f32 to vector<16x1xf32>
    %354 = arith.divf %352, %353 : vector<16x1xf32>
    %355 = vector.broadcast %354 : vector<16x1xf32> to vector<16x32xf32>
    %356 = arith.subf %348, %355 : vector<16x32xf32>
    %357 = arith.mulf %356, %356 : vector<16x32xf32>
    %cst_128 = arith.constant dense<0.000000e+00> : vector<16xf32>
    %358 = vector.multi_reduction <add>, %357, %cst_128 [1] : vector<16x32xf32> to vector<16xf32>
    %359 = vector.shape_cast %358 : vector<16xf32> to vector<16x1xf32>
    %cst_129 = arith.constant 3.200000e+01 : f32
    %360 = vector.broadcast %cst_129 : f32 to vector<16x1xf32>
    %361 = arith.divf %359, %360 : vector<16x1xf32>
    %362 = vector.broadcast %354 : vector<16x1xf32> to vector<16x32xf32>
    %363 = arith.subf %348, %362 : vector<16x32xf32>
    %cst_130 = arith.constant 9.99999996E-13 : f32
    %364 = vector.broadcast %cst_130 : f32 to vector<16x1xf32>
    %365 = arith.addf %361, %364 : vector<16x1xf32>
    %366 = math.rsqrt %365 : vector<16x1xf32>
    %367 = vector.broadcast %366 : vector<16x1xf32> to vector<16x32xf32>
    %368 = arith.mulf %363, %367 : vector<16x32xf32>
    %369 = vector.broadcast %349 : vector<1x32xf32> to vector<16x32xf32>
    %370 = arith.mulf %368, %369 : vector<16x32xf32>
    %371 = vector.broadcast %350 : vector<1x32xf32> to vector<16x32xf32>
    %372 = arith.addf %370, %371 : vector<16x32xf32>
    %373 = vector.extract_strided_slice %347 {offsets = [0, 32], sizes = [16, 16], strides = [1, 1]} : vector<16x48xf32> to vector<16x16xf32>
    %374 = vector.extract_strided_slice %273 {offsets = [2, 0], sizes = [1, 16], strides = [1, 1]} : vector<4x16xf32> to vector<1x16xf32>
    %375 = vector.extract_strided_slice %273 {offsets = [3, 0], sizes = [1, 16], strides = [1, 1]} : vector<4x16xf32> to vector<1x16xf32>
    %cst_131 = arith.constant dense<0.000000e+00> : vector<16xf32>
    %376 = vector.multi_reduction <add>, %373, %cst_131 [1] : vector<16x16xf32> to vector<16xf32>
    %377 = vector.shape_cast %376 : vector<16xf32> to vector<16x1xf32>
    %cst_132 = arith.constant 1.600000e+01 : f32
    %378 = vector.broadcast %cst_132 : f32 to vector<16x1xf32>
    %379 = arith.divf %377, %378 : vector<16x1xf32>
    %380 = vector.broadcast %379 : vector<16x1xf32> to vector<16x16xf32>
    %381 = arith.subf %373, %380 : vector<16x16xf32>
    %382 = arith.mulf %381, %381 : vector<16x16xf32>
    %cst_133 = arith.constant dense<0.000000e+00> : vector<16xf32>
    %383 = vector.multi_reduction <add>, %382, %cst_133 [1] : vector<16x16xf32> to vector<16xf32>
    %384 = vector.shape_cast %383 : vector<16xf32> to vector<16x1xf32>
    %cst_134 = arith.constant 1.600000e+01 : f32
    %385 = vector.broadcast %cst_134 : f32 to vector<16x1xf32>
    %386 = arith.divf %384, %385 : vector<16x1xf32>
    %387 = vector.broadcast %379 : vector<16x1xf32> to vector<16x16xf32>
    %388 = arith.subf %373, %387 : vector<16x16xf32>
    %cst_135 = arith.constant 9.99999996E-13 : f32
    %389 = vector.broadcast %cst_135 : f32 to vector<16x1xf32>
    %390 = arith.addf %386, %389 : vector<16x1xf32>
    %391 = math.rsqrt %390 : vector<16x1xf32>
    %392 = vector.broadcast %391 : vector<16x1xf32> to vector<16x16xf32>
    %393 = arith.mulf %388, %392 : vector<16x16xf32>
    %394 = vector.broadcast %374 : vector<1x16xf32> to vector<16x16xf32>
    %395 = arith.mulf %393, %394 : vector<16x16xf32>
    %396 = vector.broadcast %375 : vector<1x16xf32> to vector<16x16xf32>
    %397 = arith.addf %395, %396 : vector<16x16xf32>
    %398 = tpu.concatenate %372, %397 in 1 : vector<16x32xf32>, vector<16x16xf32> -> vector<16x48xf32>
    %c1_136 = arith.constant 1 : index
    %c0_137 = arith.constant 0 : index
    %c0_138 = arith.constant 0 : index
    %399 = vector.load %arg13[%c1_136, %c0_137, %c0_138] : memref<2x16x48xf32, #tpu.memory_space<vmem>>, vector<1x16x48xf32>
    %400 = vector.shape_cast %399 : vector<1x16x48xf32> to vector<16x48xf32>
    %401 = vector.shape_cast %398 : vector<16x48xf32> to vector<1x16x48xf32>
    tpu.vector_store %arg13[%c1_136, %c0_137, %c0_138], %401 {strides = array<i32>} : memref<2x16x48xf32, #tpu.memory_space<vmem>>, vector<1x16x48xf32>,
    return
  }
}

</mosaic_0001>

<bundles_post_ra>
// kernel: tpu_custom_call.1
= control target key start
LH: loop header
LB: loop body
LE: loop exit
PB: predicated region body
PF: predicated region fallthrough
CT: control target
= control target key end

     0   :  { %18 = vsyncpa [#allocation3], 0  ;;  %s5891_s0 = inlined_call_operand.vmem [shape: f32[16,48], index: 0, kind: input, shape index: {}]   ;;  %s5892_s1 = inlined_call_operand.vmem [shape: f32[16,48], index: 1, kind: input, shape index: {}]   ;;  %s5893_s2 = inlined_call_operand.vmem [shape: f32[8,8], index: 2, kind: input, shape index: {}]   ;;  %s5894_s3 = inlined_call_operand.hbm [shape: f32[2,96,304], index: 3, kind: input, shape index: {}]   ;;  %s5895_s4 = inlined_call_operand.vmem [shape: f32[2,1,304], index: 4, kind: input, shape index: {}]   ;;  %s5896_s5 = inlined_call_operand.vmem [shape: f32[2,48,48], index: 5, kind: input, shape index: {}]   ;;  %s5897_s6 = inlined_call_operand.vmem [shape: f32[2,1,48], index: 6, kind: input, shape index: {}]   ;;  %s5898_s7 = inlined_call_operand.vmem [shape: f32[2,4,32], index: 7, kind: input, shape index: {}]   ;;  %s5899_s8 = inlined_call_operand.vmem [shape: f32[2,4,16], index: 8, kind: input, shape index: {}]   ;;  %s5900_s9 = inlined_call_operand.vmem [shape: f32[2,48,128], index: 9, kind: input, shape index: {}]   ;;  %s5901_s10 = inlined_call_operand.vmem [shape: f32[2,1,128], index: 10, kind: input, shape index: {}]   ;;  %s5902_s11 = inlined_call_operand.vmem [shape: f32[2,128,48], index: 11, kind: input, shape index: {}]   ;;  %s5903_s12 = inlined_call_operand.vmem [shape: f32[2,1,48], index: 12, kind: input, shape index: {}]   ;;  %s5904_s13 = inlined_call_operand.hbm [shape: f32[2,16,48], index: 13, kind: output, shape index: {}]  }
   0x1   :  { %19 = vsyncpa [#allocation4], 0  ;;  %s5020_s25 = smov [#allocation2]  }
   0x2   :  { %s31_s26 = sshll.u32 %s5020_s25, 4  ;;  %s32_s26 = int_to_ptr.vmem [resolvable:$true] %s31_s26 }
   0x3   :  { %s4984_s27 = scalar_lea.vmem %s32_s26, 9216  ;;  %p4989_p1 = scmp.lt.s32.totalorder %s32_s26, %s32_s26 }
   0x4   :  { %p4985_p0 = scmp.ne.s32.totalorder %s32_s26, %s4984_s27  ;;  %p4990_p2 = scmp.lt.s32.totalorder %s4984_s27, %s4984_s27 }
   0x6   :  { %p4991_p3 = por %p4990_p2, %p4989_p1 }
   0x8   :  { %p4992_p4 = pnand %p4991_p3, %p4985_p0 }
   0xa   :  { %4995 = shalt.err (!%p4992_p4)
}
   0xb   :  { %s5021_s28 = smov 384   ;;  %s5022_s29 = smov 24  }
   0xc   :  { %37 = dma.hbm_to_vmem [thread:$0]  %s5894_s3, 9216, %s32_s26, [#allocation3], %s5021_s28, %s5021_s28, %s5022_s29  }
   0xd   :  { %5016 = dma.done.wait [#allocation3], 9216  }
   0xe   :  { %5017 = vsyncadd [#allocation3], 4294958080  ;;  %v5023_v0 = vmov 0.0   ;;  %v59_v1 = vld [vmem:[%s5892_s1] sm:$0xff]  ;;  %v109_v2 = vld [vmem:[#allocation2 + $0x110] sm:$0xff]  ;;  %s5024_s17 = smov 48   ;;  %v113_v45 = vlaneseq }
   0xf   :  { %199 = vmatprep.mubr.f32.mxu0 %v5023_v0  ;;  %66 = vrot.lane.b32.xlu0 %v59_v1, %s5024_s17  ;;  %v108_v3 = vld [vmem:[#allocation2 + $0x108] sm:$0xff]  ;;  %v106_v4 = vld [vmem:[#allocation2 + $0xf8] sm:$0xff]  ;;  %v105_v5 = vld [vmem:[#allocation2 + $0xf0] sm:$0xff]  ;;  %vm72_vm0 = vcmask 392192   ;;  %vm128_vm1 = vcmask 785408   ;;  %vm5025_vm2 = vmmov 0  }
  0x10   :  { %143 = vmatprep.subr.mxu0 %v109_v2  ;;  %v60_v6 = vld [vmem:[%s5892_s1 + $0x8] sm:$0xff]  ;;  %v103_v7 = vld [vmem:[#allocation2 + $0xe0] sm:$0xff]  ;;  %v110_v8 = vld [vmem:[#allocation2 + $0x118] sm:$0xff]  ;;  %v5145_v46 = vshrl.u32 %v113_v45, 7  ;;  %s5026_s23 = smov 104   ;;  %s5027_s24 = smov 88  }
  0x11   :  { %144 = vmatpush1.msra.mxu0 %v108_v3  ;;  %4512 = vmatprep.subr.mxu1 %v110_v8  ;;  %v102_v9 = vld [vmem:[#allocation2 + $0xd8] sm:$0xff]  ;;  %v107_v10 = vld [vmem:[#allocation2 + $0x100] sm:$0xff]  ;;  %v100_v11 = vld [vmem:[#allocation2 + $0xc8] sm:$0xff]  ;;  %vm299_vm3 = vcmask 850944   ;;  %vm307_vm4 = vcmask 326656   ;;  %vm660_vm5 = vcmask 195584  }
  0x12   :  { %145 = vmatprep.subr.mxu0 %v106_v4  ;;  %4513 = vmatpush3.msra.mxu1 %v110_v8  ;;  %v99_v12 = vld [vmem:[#allocation2 + $0xc0] sm:$0xff]  ;;  %v104_v13 = vld [vmem:[#allocation2 + $0xe8] sm:$0xff]  ;;  %v97_v14 = vld [vmem:[#allocation2 + $0xb0] sm:$0xff]  ;;  %v5148_v47 = vsub.s32 1, %v5145_v46  ;;  %v5155_v51 = vsub.s32 2, %v5145_v46  ;;  %v5162_v53 = vsub.s32 0, %v5145_v46 }
  0x13   :  { %146 = vmatpush1.msra.mxu0 %v105_v5  ;;  %68 = vrot.lane.b32.xlu0 %v60_v6, %s5024_s17  ;;  %v96_v15 = vld [vmem:[#allocation2 + $0xa8] sm:$0xff]  ;;  %v101_v16 = vld [vmem:[#allocation2 + $0xd0] sm:$0xff]  ;;  %v94_v17 = vld [vmem:[#allocation2 + $0x98] sm:$0xff]  ;;  %vm611_vm6 = vcmask 64512   ;;  %s5028_s27 = smov 112   ;;  %s5029_s19 = smov 8  }
  0x14   :  { %147 = vmatprep.subr.mxu0 %v103_v7  ;;  %4514 = vmatprep.subr.mxu1 %v107_v10  ;;  %v93_v18 = vld [vmem:[#allocation2 + $0x90] sm:$0xff]  ;;  %v98_v19 = vld [vmem:[#allocation2 + $0xb8] sm:$0xff]  ;;  %v91_v20 = vld [vmem:[#allocation2 + $0x80] sm:$0xff]  ;;  %s5030_s1 = smov 16   ;;  %s5031_s26 = smov 32   ;;  %vm1313_vm7 = vcmask 130048  }
  0x15   :  { %148 = vmatpush1.msra.mxu0 %v102_v9  ;;  %4515 = vmatpush3.msra.mxu1 %v107_v10  ;;  %v90_v21 = vld [vmem:[#allocation2 + $0x78] sm:$0xff]  ;;  %v95_v22 = vld [vmem:[#allocation2 + $0xa0] sm:$0xff]  ;;  %v88_v23 = vld [vmem:[#allocation2 + $0x68] sm:$0xff]  ;;  %vm1638_vm8 = vcmask 261120   ;;  %s5032_s14 = smov 96  }
  0x16   :  { %149 = vmatprep.subr.mxu0 %v100_v11  ;;  %4516 = vmatprep.subr.mxu1 %v104_v13  ;;  %v87_v24 = vld [vmem:[#allocation2 + $0x60] sm:$0xff]  ;;  %v92_v25 = vld [vmem:[#allocation2 + $0x88] sm:$0xff]  ;;  %v85_v26 = vld [vmem:[#allocation2 + $0x50] sm:$0xff] }
  0x17   :  { %150 = vmatpush1.msra.mxu0 %v99_v12  ;;  %4517 = vmatpush3.msra.mxu1 %v104_v13  ;;  %v84_v27 = vld [vmem:[#allocation2 + $0x48] sm:$0xff]  ;;  %v89_v28 = vld [vmem:[#allocation2 + $0x70] sm:$0xff]  ;;  %v82_v29 = vld [vmem:[#allocation2 + $0x38] sm:$0xff] }
  0x18   :  { %151 = vmatprep.subr.mxu0 %v97_v14  ;;  %4518 = vmatprep.subr.mxu1 %v101_v16  ;;  %v81_v30 = vld [vmem:[#allocation2 + $0x30] sm:$0xff]  ;;  %v86_v31 = vld [vmem:[#allocation2 + $0x58] sm:$0xff]  ;;  %v79_v32 = vld [vmem:[#allocation2 + $0x20] sm:$0xff] }
  0x19   :  { %152 = vmatpush1.msra.mxu0 %v96_v15  ;;  %4519 = vmatpush3.msra.mxu1 %v101_v16  ;;  %v78_v33 = vld [vmem:[#allocation2 + $0x18] sm:$0xff]  ;;  %v83_v34 = vld [vmem:[#allocation2 + $0x40] sm:$0xff]  ;;  %v76_v35 = vld [vmem:[#allocation2 + $0x8] sm:$0xff] }
  0x1a   :  { %153 = vmatprep.subr.mxu0 %v94_v17  ;;  %4520 = vmatprep.subr.mxu1 %v98_v19  ;;  %v75_v36 = vld [vmem:[#allocation2] sm:$0xff]  ;;  %v80_v37 = vld [vmem:[#allocation2 + $0x28] sm:$0xff]  ;;  %v77_v38 = vld [vmem:[#allocation2 + $0x10] sm:$0xff] }
  0x1b   :  { %154 = vmatpush1.msra.mxu0 %v93_v18  ;;  %4521 = vmatpush3.msra.mxu1 %v98_v19  ;;  %v5123_v39 = vld [vmem:[%s5891_s0] sm:$0xff]  ;;  %v5135_v42 = vld [vmem:[%s5891_s0 + $0x8] sm:$0xff] }
  0x1c   :  { %155 = vmatprep.subr.mxu0 %v91_v20  ;;  %4522 = vmatprep.subr.mxu1 %v95_v22  ;;  %v111_v48 = vld [vmem:[%s5895_s4] sm:$0x7] }
  0x1d   :  { %156 = vmatpush1.msra.mxu0 %v90_v21  ;;  %4523 = vmatpush3.msra.mxu1 %v95_v22  ;;  %v120_v49 = vrot.slane %v111_v48, %v5148_v47  ;;  %v124_v57 = vrot.slane %v111_v48, %v5155_v51  ;;  %v116_v60 = vrot.slane %v111_v48, %v5162_v53  ;;  %v63_v21 = vld [vmem:[%s5893_s2] sm:$0xff] }
  0x1e   :  { %157 = vmatprep.subr.mxu0 %v88_v23  ;;  %4524 = vmatprep.subr.mxu1 %v92_v25 }
  0x1f   :  { %158 = vmatpush1.msra.mxu0 %v87_v24  ;;  %4525 = vmatpush3.msra.mxu1 %v92_v25 }
  0x20   :  { %159 = vmatprep.subr.mxu0 %v85_v26  ;;  %4526 = vmatprep.subr.mxu1 %v89_v28 }
  0x21   :  { %160 = vmatpush1.msra.mxu0 %v84_v27  ;;  %4527 = vmatpush3.msra.mxu1 %v89_v28 }
  0x22   :  { %161 = vmatprep.subr.mxu0 %v82_v29  ;;  %4528 = vmatprep.subr.mxu1 %v86_v31 }
  0x23   :  { %162 = vmatpush1.msra.mxu0 %v81_v30  ;;  %4529 = vmatpush3.msra.mxu1 %v86_v31 }
  0x24   :  { %163 = vmatprep.subr.mxu0 %v79_v32  ;;  %4530 = vmatprep.subr.mxu1 %v83_v34 }
  0x25   :  { %164 = vmatpush1.msra.mxu0 %v78_v33  ;;  %4531 = vmatpush3.msra.mxu1 %v83_v34 }
  0x26   :  { %165 = vmatprep.subr.mxu0 %v76_v35  ;;  %4532 = vmatprep.subr.mxu1 %v80_v37 }
  0x27   :  { %166 = vmatpush1.msra.mxu0 %v75_v36  ;;  %4533 = vmatpush3.msra.mxu1 %v80_v37 }
  0x28   :  { %4544 = vmatprep.subr.mxu0 %v5023_v0  ;;  %4534 = vmatprep.subr.mxu1 %v77_v38 }
  0x29   :  { %4535 = vmatpush3.msra.mxu1 %v77_v38 }
  0x2a   :  { %4539 = vmatprep.subr.mxu1 %v5023_v0 }
  0x81   :  { %v5125_v40 = vpop.permute.xlu0 %66 }
  0x82   :  { %v73_v41 = vsel %vm72_vm0, %v5123_v39, %v5125_v40 }
  0x83   :  { %4248 = vmatmul.mubr.msk.f32.vlgmr.msra.gmra.mxu0 %vm128_vm1, %v73_v41  ;;  %4536 = vmatprep.mubr.msk.f32.mxu1 %vm128_vm1, %v73_v41 }
  0x84   :  { %205 = vmatprep.mubr.f32.mxu0 %v5023_v0 }
  0x85   :  { %v5138_v43 = vpop.permute.xlu0 %68 }
  0x86   :  { %v74_v44 = vsel %vm72_vm0, %v5135_v42, %v5138_v43 }
  0x87   :  { %4249 = vmatmul.mubr.msk.f32.gmra.mxu0 %vm128_vm1, %v74_v44  ;;  %4537 = vmatmul.mubr.msk.f32.vlgmr.msra.gmra.mxu1 %vm128_vm1, %v74_v44 }
  0x88   :  { %4541 = vmatprep.mubr.msk.f32.mxu1 %vm5025_vm2, %v5023_v0  ;;  %4546 = vmatprep.mubr.msk.f32.mxu0 %vm5025_vm2, %v5023_v0 }
 0x143   :  { %v201_v50 = vpop.f32.mrf.mxu0 }
 0x144   :  { %v202_v63 = vadd.f32 %v201_v50, %v116_v60 }
 0x145   :  { %v203_v52 = vpop.f32.mrf.mxu0 }
 0x146   :  { %v5164_v54 = vadd.f32 %v203_v52, %v120_v49 }
 0x147   :  { %v207_v55 = vpop.f32.mrf.mxu0  ;;  %v4538_v56 = vpop.f32.mrf.mxu1 }
 0x148   :  { %291 = vrot.lane.b32.xlu1 %v5164_v54, %s5026_s23  ;;  %v284_v1 = vadd.f32 %v4538_v56, %v124_v57  ;;  %v208_v2 = vadd.f32 %v207_v55, %v116_v60 }
 0x149   :  { %v209_v58 = vpop.f32.mrf.mxu0  ;;  %v278_v59 = vpop.f32.mrf.mxu1 }
 0x14a   :  { %v5170_v61 = vadd.f32 %v209_v58, %v120_v49  ;;  %v279_v62 = vadd.f32 %v278_v59, %v124_v57 }
 0x14c   :  { %293 = vrot.lane.b32.xlu1 %v279_v62, %s5026_s23  ;;  %295 = vrot.lane.b32.xlu0 %v5170_v61, %s5026_s23 }
 0x150   :  { %297 = vrot.lane.b32.xlu1 %v284_v1, %s5026_s23  ;;  %305 = vrot.lane.b32.xlu0 %v202_v63, %s5027_s24 }
 0x154   :  { %658 = vrot.lane.b32.xlu0 %v202_v63, %s5022_s29  ;;  %383 = vrot.lane.b32.xlu1 %v208_v2, %s5027_s24 }
 0x158   :  { %737 = vrot.lane.b32.xlu1 %v208_v2, %s5022_s29 }
 0x1ba   :  { %v292_v3 = vpop.permute.xlu1 %291 }
 0x1be   :  { %v5180_v4 = vpop.permute.xlu1 %293  ;;  %v296_v5 = vpop.permute.xlu0 %295 }
 0x1bf   :  { %v300_v6 = vsel %vm299_vm3, %v292_v3, %v5180_v4 }
 0x1c0   :  { %459 = vrot.lane.b32.xlu0 %v300_v6, %s5027_s24 }
 0x1c2   :  { %v5185_v7 = vpop.permute.xlu1 %297  ;;  %v306_v8 = vpop.permute.xlu0 %305 }
 0x1c3   :  { %4540 = vmatpush3.xpose.msk.msra.mxu1 %vm307_vm4, %v306_v8  ;;  %v301_v9 = vsel %vm299_vm3, %v296_v5, %v5185_v7 }
 0x1c4   :  { %656 = vrot.lane.b32.xlu0 %v202_v63, %s5024_s17  ;;  %535 = vrot.lane.b32.xlu1 %v301_v9, %s5027_s24 }
 0x1c5   :  { %4549 = vmatprep.subr.mxu1 %v5023_v0 }
 0x1c6   :  { %4542 = vmatmul.mubr.msk.f32.vlgmr.msra.gmra.mxu1 %vm307_vm4, %v202_v63  ;;  %v384_v10 = vpop.permute.xlu1 %383  ;;  %v659_v11 = vpop.permute.xlu0 %658 }
 0x1c7   :  { %4545 = vmatpush3.xpose.msk.msra.mxu0 %vm307_vm4, %v384_v10  ;;  %4551 = vmatprep.mubr.msk.f32.mxu1 %vm5025_vm2, %v5023_v0 }
 0x1c8   :  { %815 = vrot.lane.b32.xlu0 %v300_v6, %s5022_s29  ;;  %735 = vrot.lane.b32.xlu1 %v208_v2, %s5024_s17 }
 0x1c9   :  { %4554 = vmatprep.subr.mxu0 %v5023_v0 }
 0x1ca   :  { %4547 = vmatmul.mubr.msk.f32.vlgmr.msra.gmra.mxu0 %vm307_vm4, %v208_v2  ;;  %v738_v12 = vpop.permute.xlu1 %737 }
 0x1cb   :  { %4556 = vmatprep.mubr.msk.f32.mxu0 %vm5025_vm2, %v5023_v0 }
 0x1cc   :  { %813 = vrot.lane.b32.xlu0 %v300_v6, %s5024_s17  ;;  %893 = vrot.lane.b32.xlu1 %v301_v9, %s5022_s29 }
 0x1d0   :  { %891 = vrot.lane.b32.xlu1 %v301_v9, %s5024_s17 }
 0x232   :  { %v460_v13 = vpop.permute.xlu0 %459 }
 0x233   :  { %4550 = vmatpush3.xpose.msk.msra.mxu1 %vm307_vm4, %v460_v13 }
 0x234   :  { %4559 = vmatprep.subr.mxu1 %v5023_v0 }
 0x236   :  { %4552 = vmatmul.mubr.msk.f32.vlgmr.msra.gmra.mxu1 %vm307_vm4, %v300_v6  ;;  %v657_v14 = vpop.permute.xlu0 %656  ;;  %v536_v15 = vpop.permute.xlu1 %535 }
 0x237   :  { %4555 = vmatpush3.xpose.msk.msra.mxu0 %vm307_vm4, %v536_v15  ;;  %4560 = vmatpush3.xpose.msk.msra.mxu1 %vm660_vm5, %v659_v11 }
 0x238   :  { %4561 = vmatprep.mubr.msk.f32.mxu1 %vm5025_vm2, %v5023_v0  ;;  %4569 = vmatprep.subr.mxu1 %v5023_v0 }
 0x239   :  { %4564 = vmatprep.subr.mxu0 %v5023_v0 }
 0x23a   :  { %4562 = vmatmul.mubr.msk.f32.vlgmr.msra.gmra.mxu1 %vm660_vm5, %v657_v14  ;;  %v816_v16 = vpop.permute.xlu0 %815  ;;  %4557 = vmatmul.mubr.msk.f32.vlgmr.msra.gmra.mxu0 %vm307_vm4, %v301_v9  ;;  %v736_v17 = vpop.permute.xlu1 %735 }
 0x23b   :  { %4565 = vmatpush3.xpose.msk.msra.mxu0 %vm660_vm5, %v738_v12  ;;  %4570 = vmatpush3.xpose.msk.msra.mxu1 %vm660_vm5, %v816_v16 }
 0x23c   :  { %4566 = vmatprep.mubr.msk.f32.mxu0 %vm5025_vm2, %v5023_v0  ;;  %4571 = vmatprep.mubr.msk.f32.mxu1 %vm5025_vm2, %v5023_v0 }
 0x23d   :  { %4579 = vmatprep.subr.mxu1 %v5023_v0  ;;  %4574 = vmatprep.subr.mxu0 %v5023_v0 }
 0x23e   :  { %v814_v18 = vpop.permute.xlu0 %813  ;;  %4567 = vmatmul.mubr.msk.f32.vlgmr.msra.gmra.mxu0 %vm660_vm5, %v736_v17  ;;  %v894_v19 = vpop.permute.xlu1 %893 }
 0x23f   :  { %4572 = vmatmul.mubr.msk.f32.vlgmr.msra.gmra.mxu1 %vm660_vm5, %v814_v18  ;;  %4575 = vmatpush3.xpose.msk.msra.mxu0 %vm660_vm5, %v894_v19 }
 0x240   :  { %4580 = vmatpush3.msra.mxu1 %v5164_v54  ;;  %4576 = vmatprep.mubr.msk.f32.mxu0 %vm5025_vm2, %v5023_v0 }
 0x241   :  { %4584 = vmatprep.subr.mxu0 %v5023_v0  ;;  %4581 = vmatprep.mubr.msk.f32.mxu1 %vm5025_vm2, %v5023_v0 }
 0x242   :  { %v892_v20 = vpop.permute.xlu1 %891  ;;  %4589 = vmatprep.subr.mxu1 %v5023_v0 }
 0x243   :  { %4577 = vmatmul.mubr.msk.f32.vlgmr.msra.gmra.mxu0 %vm660_vm5, %v892_v20 }
 0x244   :  { %4585 = vmatpush3.msra.mxu0 %v5170_v61  ;;  %4586 = vmatprep.mubr.msk.f32.mxu0 %vm5025_vm2, %v5023_v0 }
 0x245   :  { %4594 = vmatprep.subr.mxu0 %v5023_v0 }
 0x286   :  { %v378_v22 = vpop.f32.mrf.mxu1 }
 0x287   :  { %v379_v23 = vadd.f32 %v378_v22, %v63_v21 }
 0x288   :  { %v4543_v24 = vpop.f32.mrf.mxu1 }
 0x289   :  { %v612_v25 = vsel %vm611_vm6, %v379_v23, -inf }
 0x28a   :  { %613 = vmax.xlane.f32.xlu0 %v612_v25  ;;  %v455_v26 = vpop.f32.mrf.mxu0 }
 0x28b   :  { %v456_v27 = vadd.f32 %v455_v26, %v63_v21 }
 0x28c   :  { %v4548_v28 = vpop.f32.mrf.mxu0 }
 0x28d   :  { %v615_v29 = vsel %vm611_vm6, %v456_v27, -inf }
 0x28e   :  { %616 = vmax.xlane.f32.xlu1 %v615_v29 }
 0x2f6   :  { %v531_v30 = vpop.f32.mrf.mxu1 }
 0x2f7   :  { %v532_v31 = vadd.f32 %v531_v30, %v63_v21 }
 0x2f8   :  { %v4553_v32 = vpop.f32.mrf.mxu1 }
 0x2f9   :  { %v618_v33 = vsel %vm611_vm6, %v532_v31, -inf }
 0x2fa   :  { %619 = vmax.xlane.f32.xlu0 %v618_v33  ;;  %v607_v34 = vpop.f32.mrf.mxu0  ;;  %v731_v35 = vpop.f32.mrf.mxu1 }
 0x2fb   :  { %v608_v36 = vadd.f32 %v607_v34, %v63_v21  ;;  %v732_v37 = vadd.f32 %v731_v35, %v63_v21 }
 0x2fc   :  { %v4558_v38 = vpop.f32.mrf.mxu0  ;;  %v4563_v41 = vpop.f32.mrf.mxu1 }
 0x2fd   :  { %v969_v44 = vsel %vm611_vm6, %v732_v37, -inf  ;;  %v621_v45 = vsel %vm611_vm6, %v608_v36, -inf }
 0x2fe   :  { %970 = vmax.xlane.f32.xlu1 %v969_v44  ;;  %622 = vmax.xlane.f32.xlu0 %v621_v45  ;;  %v809_v48 = vpop.f32.mrf.mxu0 }
 0x2ff   :  { %v810_v49 = vadd.f32 %v809_v48, %v63_v21  ;;  %v887_v50 = vpop.f32.mrf.mxu1 }
 0x300   :  { %v888_v52 = vadd.f32 %v887_v50, %v63_v21  ;;  %v4568_v55 = vpop.f32.mrf.mxu0 }
 0x301   :  { %v4573_v56 = vpop.f32.mrf.mxu1  ;;  %v972_v57 = vsel %vm611_vm6, %v810_v49, -inf }
 0x302   :  { %973 = vmax.xlane.f32.xlu0 %v972_v57  ;;  %v975_v58 = vsel %vm611_vm6, %v888_v52, -inf }
 0x303   :  { %976 = vmax.xlane.f32.xlu1 %v975_v58  ;;  %v965_v59 = vpop.f32.mrf.mxu0 }
 0x304   :  { %v966_v60 = vadd.f32 %v965_v59, %v63_v21 }
 0x305   :  { %v4578_v62 = vpop.f32.mrf.mxu0 }
 0x306   :  { %v978_v63 = vsel %vm611_vm6, %v966_v60, -inf }
 0x307   :  { %979 = vmax.xlane.f32.xlu0 %v978_v63 }
 0x313   :  { %v614_v5 = vpop.xlane.xlu0 %613 }
 0x314   :  { %1316 = vrot.lane.b32.xlu1 %v5164_v54, %s5028_s27  ;;  %v624_v6 = vsub.f32 %v379_v23, %v614_v5 }
 0x316   :  { %v628_v8 = vmul.f32 1.442695, %v624_v6 }
 0x317   :  { %v617_v1 = vpop.xlane.xlu1 %616 }
 0x318   :  { %v625_v2 = vsub.f32 %v456_v27, %v617_v1 }
 0x31a   :  { %v630_v3 = vmul.f32 1.442695, %v625_v2 }
 0x31c   :  { %4871 = vpow2.f32 %v630_v3 }
 0x31d   :  { %4873 = vpow2.f32 %v628_v8 }
 0x329   :  { %v4872_v9 = vpop.eup %4871 }
 0x32a   :  { %v639_v10 = vsel %vm611_vm6, %v4872_v9, 0.0  ;;  %v4874_v11 = vpop.eup %4873 }
 0x32b   :  { %640 = vadd.xlane.f32.xlu0 %v639_v10  ;;  %v636_v12 = vsel %vm611_vm6, %v4874_v11, 0.0 }
 0x338   :  { %637 = vadd.xlane.f32.xlu1 %v636_v12 }
 0x383   :  { %v620_v13 = vpop.xlane.xlu0 %619 }
 0x384   :  { %v626_v14 = vsub.f32 %v532_v31, %v620_v13 }
 0x386   :  { %v632_v15 = vmul.f32 1.442695, %v626_v14 }
 0x387   :  { %v623_v54 = vpop.xlane.xlu0 %622  ;;  %v971_v16 = vpop.xlane.xlu1 %970 }
 0x388   :  { %4875 = vpow2.f32 %v632_v15  ;;  %v627_v17 = vsub.f32 %v608_v36, %v623_v54  ;;  %v981_v18 = vsub.f32 %v732_v37, %v971_v16 }
 0x38a   :  { %v634_v19 = vmul.f32 1.442695, %v627_v17  ;;  %v985_v20 = vmul.f32 1.442695, %v981_v18 }
 0x38b   :  { %v974_v21 = vpop.xlane.xlu0 %973 }
 0x38c   :  { %4877 = vpow2.f32 %v634_v19  ;;  %v982_v22 = vsub.f32 %v810_v49, %v974_v21  ;;  %v977_v23 = vpop.xlane.xlu1 %976 }
 0x38d   :  { %4879 = vpow2.f32 %v985_v20  ;;  %v983_v24 = vsub.f32 %v888_v52, %v977_v23  ;;  %v1646_v23 = vld [vmem:[%s5896_s5 + $0x28] sm:$0xff] }
 0x38e   :  { %v987_v25 = vmul.f32 1.442695, %v982_v22 }
 0x38f   :  { %v989_v26 = vmul.f32 1.442695, %v983_v24  ;;  %v1645_v24 = vld [vmem:[%s5896_s5 + $0x20] sm:$0xff] }
 0x390   :  { %4881 = vpow2.f32 %v987_v25  ;;  %v980_v27 = vpop.xlane.xlu0 %979  ;;  %v1317_v49 = vpop.permute.xlu1 %1316 }
 0x391   :  { %4883 = vpow2.f32 %v989_v26  ;;  %v984_v28 = vsub.f32 %v966_v60, %v980_v27  ;;  %v1644_v27 = vld [vmem:[%s5896_s5 + $0x18] sm:$0xff] }
 0x393   :  { %v991_v29 = vmul.f32 1.442695, %v984_v28 }
 0x395   :  { %v4876_v30 = vpop.eup %4875  ;;  %4885 = vpow2.f32 %v991_v29 }
 0x396   :  { %v642_v31 = vsel %vm611_vm6, %v4876_v30, 0.0 }
 0x397   :  { %643 = vadd.xlane.f32.xlu1 %v642_v31 }
 0x399   :  { %v4878_v32 = vpop.eup %4877 }
 0x39a   :  { %v4880_v33 = vpop.eup %4879  ;;  %v645_v34 = vsel %vm611_vm6, %v4878_v32, 0.0 }
 0x39b   :  { %646 = vadd.xlane.f32.xlu0 %v645_v34  ;;  %v993_v35 = vsel %vm611_vm6, %v4880_v33, 0.0  ;;  %v1643_v34 = vld [vmem:[%s5896_s5 + $0x10] sm:$0xff] }
 0x39c   :  { %994 = vadd.xlane.f32.xlu1 %v993_v35  ;;  %v1642_v35 = vld [vmem:[%s5896_s5 + $0x8] sm:$0xff] }
 0x39d   :  { %v4882_v36 = vpop.eup %4881 }
 0x39e   :  { %v4884_v37 = vpop.eup %4883  ;;  %v996_v38 = vsel %vm611_vm6, %v4882_v36, 0.0 }
 0x39f   :  { %997 = vadd.xlane.f32.xlu0 %v996_v38  ;;  %v999_v41 = vsel %vm611_vm6, %v4884_v37, 0.0 }
 0x3a0   :  { %1000 = vadd.xlane.f32.xlu1 %v999_v41 }
 0x3a2   :  { %v5260_v44 = vpop.eup %4885 }
 0x3a3   :  { %v1002_v45 = vsel %vm611_vm6, %v5260_v44, 0.0 }
 0x3a4   :  { %1003 = vadd.xlane.f32.xlu0 %v1002_v45 }
 0x3b1   :  { %1468 = vrot.lane.b32.xlu1 %v5180_v4, %s5028_s27 }
 0x3b4   :  { %v641_v48 = vpop.xlane.xlu0 %640 }
 0x3b5   :  { %4887 = vrcp.f32 %v641_v48  ;;  %1544 = vrot.lane.b32.xlu1 %v5185_v7, %s5028_s27 }
 0x3ba   :  { %1392 = vrot.lane.b32.xlu0 %v5170_v61, %s5028_s27 }
 0x3c1   :  { %v638_v50 = vpop.xlane.xlu1 %637 }
 0x3c2   :  { %v4888_v52 = vpop.eup %4887  ;;  %4889 = vrcp.f32 %v638_v50 }
 0x3c3   :  { %v651_v55 = vmul.f32 %v4888_v52, %v4872_v9 }
 0x3c5   :  { %4587 = vmatmul.mubr.msk.f32.vlgmr.msra.gmra.mxu0 %vm611_vm6, %v651_v55 }
 0x3c6   :  { %4595 = vmatpush3.msra.mxu0 %v5185_v7  ;;  %4596 = vmatprep.mubr.msk.f32.mxu0 %vm5025_vm2, %v5023_v0 }
 0x3c7   :  { %4604 = vmatprep.subr.mxu0 %v5023_v0 }
 0x3cf   :  { %v4890_v56 = vpop.eup %4889 }
 0x3d0   :  { %v649_v57 = vmul.f32 %v4890_v56, %v4874_v11 }
 0x3d2   :  { %4582 = vmatmul.mubr.msk.f32.vlgmr.msra.gmra.mxu1 %vm611_vm6, %v649_v57 }
 0x3d3   :  { %4590 = vmatpush3.msra.mxu1 %v5180_v4  ;;  %4591 = vmatprep.mubr.msk.f32.mxu1 %vm5025_vm2, %v5023_v0 }
 0x3d4   :  { %4599 = vmatprep.subr.mxu1 %v5023_v0 }
 0x420   :  { %v644_v61 = vpop.xlane.xlu1 %643 }
 0x421   :  { %4891 = vrcp.f32 %v644_v61  ;;  %v4276_v61 = vld [vmem:[%s5897_s6] ss:$0 sm:$0xff] }
 0x424   :  { %v647_v58 = vpop.xlane.xlu0 %646 }
 0x425   :  { %4893 = vrcp.f32 %v647_v58  ;;  %v995_v7 = vpop.xlane.xlu1 %994 }
 0x426   :  { %4895 = vrcp.f32 %v995_v7 }
 0x428   :  { %v998_v59 = vpop.xlane.xlu0 %997 }
 0x429   :  { %4897 = vrcp.f32 %v998_v59  ;;  %v1001_v60 = vpop.xlane.xlu1 %1000 }
 0x42a   :  { %4899 = vrcp.f32 %v1001_v60 }
 0x42d   :  { %v1004_v62 = vpop.xlane.xlu0 %1003  ;;  %v1469_v3 = vpop.permute.xlu1 %1468 }
 0x42e   :  { %v4892_v63 = vpop.eup %4891  ;;  %4901 = vrcp.f32 %v1004_v62 }
 0x42f   :  { %v653_v1 = vmul.f32 %v4892_v63, %v4876_v30 }
 0x431   :  { %4592 = vmatmul.mubr.msk.f32.vlgmr.msra.gmra.mxu1 %vm611_vm6, %v653_v1  ;;  %v1393_v8 = vpop.permute.xlu0 %1392  ;;  %v1545_v13 = vpop.permute.xlu1 %1544 }
 0x432   :  { %v4894_v4 = vpop.eup %4893  ;;  %4600 = vmatpush3.msra.mxu1 %v1317_v49  ;;  %4601 = vmatprep.mubr.msk.f32.mxu1 %vm5025_vm2, %v5023_v0 }
 0x433   :  { %v4896_v2 = vpop.eup %4895  ;;  %4609 = vmatprep.subr.mxu1 %v5023_v0  ;;  %v655_v5 = vmul.f32 %v4894_v4, %v4878_v32 }
 0x434   :  { %v1006_v6 = vmul.f32 %v4896_v2, %v4880_v33 }
 0x435   :  { %4597 = vmatmul.mubr.msk.f32.vlgmr.msra.gmra.mxu0 %vm611_vm6, %v655_v5 }
 0x436   :  { %v4898_v9 = vpop.eup %4897  ;;  %4602 = vmatmul.mubr.msk.f32.vlgmr.msra.gmra.mxu1 %vm611_vm6, %v1006_v6  ;;  %4605 = vmatpush3.msra.mxu0 %v1393_v8 }
 0x437   :  { %v4900_v10 = vpop.eup %4899  ;;  %4610 = vmatpush3.msra.mxu1 %v1469_v3  ;;  %4606 = vmatprep.mubr.msk.f32.mxu0 %vm5025_vm2, %v5023_v0  ;;  %v1008_v11 = vmul.f32 %v4898_v9, %v4882_v36  ;;  %v1641_v36 = vld [vmem:[%s5896_s5] sm:$0xff] }
 0x438   :  { %4614 = vmatprep.subr.mxu0 %v5023_v0  ;;  %4611 = vmatprep.mubr.msk.f32.mxu1 %vm5025_vm2, %v5023_v0  ;;  %v1010_v12 = vmul.f32 %v4900_v10, %v4884_v37 }
 0x439   :  { %4607 = vmatmul.mubr.msk.f32.vlgmr.msra.gmra.mxu0 %vm611_vm6, %v1008_v11 }
 0x43a   :  { %4615 = vmatpush3.msra.mxu0 %v1545_v13  ;;  %4612 = vmatmul.mubr.msk.f32.vlgmr.msra.gmra.mxu1 %vm611_vm6, %v1010_v12 }
 0x43b   :  { %v4902_v14 = vpop.eup %4901  ;;  %4616 = vmatprep.mubr.msk.f32.mxu0 %vm5025_vm2, %v5023_v0  ;;  %4619 = vmatprep.subr.mxu0 %v1646_v23 }
 0x43c   :  { %v1012_v15 = vmul.f32 %v4902_v14, %v5260_v44 }
 0x43e   :  { %4617 = vmatmul.mubr.msk.f32.vlgmr.msra.gmra.mxu0 %vm611_vm6, %v1012_v15 }
 0x43f   :  { %4620 = vmatpush3.msra.mxu0 %v1646_v23  ;;  %v5363_v23 = vld [vmem:[%s5899_s8] sm:$0xf] }
 0x440   :  { %4621 = vmatprep.subr.mxu0 %v1645_v24 }
 0x441   :  { %4622 = vmatpush3.msra.mxu0 %v1645_v24  ;;  %v1824_v24 = vrot.slane %v5363_v23, %v5162_v53 }
 0x442   :  { %4623 = vmatprep.subr.mxu0 %v1644_v27 }
 0x443   :  { %4624 = vmatpush3.msra.mxu0 %v1644_v27 }
 0x444   :  { %4625 = vmatprep.subr.mxu0 %v1643_v34 }
 0x445   :  { %4626 = vmatpush3.msra.mxu0 %v1643_v34  ;;  %v1844_v34 = vld [vmem:[%s5900_s9 + $0x8] sm:$0xff] }
 0x446   :  { %4627 = vmatprep.subr.mxu0 %v1642_v35 }
 0x447   :  { %4628 = vmatpush3.msra.mxu0 %v1642_v35  ;;  %v1843_v35 = vld [vmem:[%s5900_s9] sm:$0xff] }
 0x448   :  { %4629 = vmatprep.subr.mxu0 %v1641_v36 }
 0x449   :  { %4630 = vmatpush3.msra.mxu0 %v1641_v36  ;;  %v1962_v36 = vld [vmem:[%s5902_s11 + $0x78] sm:$0xff] }
 0x44a   :  { %4649 = vmatprep.subr.mxu1 %v1962_v36 }
 0x44b   :  { %4650 = vmatpush3.msra.mxu1 %v1962_v36 }
 0x485   :  { %v1155_v54 = vpop.f32.mrf.mxu0 }
 0x487   :  { %v4588_v16 = vpop.f32.mrf.mxu0 }
 0x492   :  { %v1082_v17 = vpop.f32.mrf.mxu1 }
 0x494   :  { %v4583_v18 = vpop.f32.mrf.mxu1 }
 0x4f1   :  { %v1228_v19 = vpop.f32.mrf.mxu1 }
 0x4f3   :  { %v4593_v20 = vpop.f32.mrf.mxu1 }
 0x4f5   :  { %v1301_v21 = vpop.f32.mrf.mxu0 }
 0x4f6   :  { %v1388_v22 = vpop.f32.mrf.mxu1 }
 0x4f7   :  { %v4598_v25 = vpop.f32.mrf.mxu0 }
 0x4f8   :  { %v4603_v26 = vpop.f32.mrf.mxu1 }
 0x4f9   :  { %v1464_v28 = vpop.f32.mrf.mxu0 }
 0x4fa   :  { %v1540_v29 = vpop.f32.mrf.mxu1 }
 0x4fb   :  { %v4608_v30 = vpop.f32.mrf.mxu0  ;;  %1622 = vrot.lane.b32.xlu0 %v1540_v29, %s5029_s19  ;;  %v1848_v29 = vld [vmem:[%s5900_s9 + $0x28] sm:$0xff] }
 0x4fc   :  { %v4613_v31 = vpop.f32.mrf.mxu1  ;;  %v1847_v30 = vld [vmem:[%s5900_s9 + $0x20] sm:$0xff]  ;;  %4634 = vmatprep.subr.mxu0 %v1848_v29 }
 0x4fd   :  { %v1834_v31 = vrot.slane %v5363_v23, %v5148_v47 }
 0x4fe   :  { %v1616_v32 = vpop.f32.mrf.mxu0 }
 0x4ff   :  { %1307 = vrot.lane.b32.xlu0 %v1228_v19, %s5030_s1  ;;  %1624 = vrot.lane.b32.xlu1 %v1616_v32, %s5029_s19  ;;  %v1846_v32 = vld [vmem:[%s5900_s9 + $0x18] sm:$0xff] }
 0x500   :  { %v4618_v33 = vpop.f32.mrf.mxu0 }
 0x501   :  { %v1845_v33 = vld [vmem:[%s5900_s9 + $0x10] sm:$0xff] }
 0x503   :  { %1309 = vrot.lane.b32.xlu1 %v1301_v21, %s5030_s1 }
 0x56d   :  { %v1623_v37 = vpop.permute.xlu0 %1622 }
 0x56e   :  { %v1628_v38 = vsel %vm611_vm6, %v1388_v22, %v1623_v37  ;;  %v1961_v37 = vld [vmem:[%s5902_s11 + $0x70] sm:$0xff] }
 0x56f   :  { %1632 = vrot.lane.b32.xlu0 %v1628_v38, %s5031_s26  ;;  %v1960_v38 = vld [vmem:[%s5902_s11 + $0x68] sm:$0xff]  ;;  %4651 = vmatprep.subr.mxu1 %v1961_v37 }
 0x570   :  { %4652 = vmatpush3.msra.mxu1 %v1961_v37 }
 0x571   :  { %v1625_v41 = vpop.permute.xlu1 %1624  ;;  %v1308_v45 = vpop.permute.xlu0 %1307  ;;  %4653 = vmatprep.subr.mxu1 %v1960_v38 }
 0x572   :  { %v1629_v44 = vsel %vm611_vm6, %v1464_v28, %v1625_v41  ;;  %v1314_v48 = vsel %vm1313_vm7, %v1082_v17, %v1308_v45  ;;  %4654 = vmatpush3.msra.mxu1 %v1960_v38 }
 0x573   :  { %1634 = vrot.lane.b32.xlu1 %v1629_v44, %s5031_s26 }
 0x575   :  { %v1310_v49 = vpop.permute.xlu1 %1309 }
 0x576   :  { %v1315_v55 = vsel %vm1313_vm7, %v1155_v54, %v1310_v49 }
 0x5e1   :  { %v1633_v50 = vpop.permute.xlu0 %1632 }
 0x5e2   :  { %v1639_v52 = vsel %vm1638_vm8, %v1314_v48, %v1633_v50 }
 0x5e3   :  { %4631 = vmatprep.mubr.msk.f32.mxu0 %vm72_vm0, %v1639_v52 }
 0x5e5   :  { %v1635_v56 = vpop.permute.xlu1 %1634 }
 0x5e6   :  { %v1640_v57 = vsel %vm1638_vm8, %v1315_v55, %v1635_v56 }
 0x5e7   :  { %4632 = vmatmul.mubr.msk.f32.vlgmr.msra.gmra.mxu0 %vm72_vm0, %v1640_v57 }
 0x5e8   :  { %4635 = vmatpush3.msra.mxu0 %v1848_v29  ;;  %v1948_v29 = vld [vmem:[%s5902_s11 + $0x8] sm:$0xff] }
 0x5e9   :  { %4636 = vmatprep.subr.mxu0 %v1847_v30 }
 0x5ea   :  { %4637 = vmatpush3.msra.mxu0 %v1847_v30  ;;  %v1947_v30 = vld [vmem:[%s5902_s11] sm:$0xff] }
 0x5eb   :  { %4638 = vmatprep.subr.mxu0 %v1846_v32 }
 0x5ec   :  { %4639 = vmatpush3.msra.mxu0 %v1846_v32 }
 0x5ed   :  { %4640 = vmatprep.subr.mxu0 %v1845_v33 }
 0x5ee   :  { %4641 = vmatpush3.msra.mxu0 %v1845_v33 }
 0x5ef   :  { %4642 = vmatprep.subr.mxu0 %v1844_v34 }
 0x5f0   :  { %4643 = vmatpush3.msra.mxu0 %v1844_v34 }
 0x5f1   :  { %4644 = vmatprep.subr.mxu0 %v1843_v35 }
 0x5f2   :  { %4645 = vmatpush3.msra.mxu0 %v1843_v35 }
 0x6a7   :  { %v4633_v58 = vpop.f32.mrf.mxu0 }
 0x6a8   :  { %v1732_v7 = vadd.f32 %v4633_v58, %v4276_v61 }
 0x6a9   :  { %v1726_v59 = vpop.f32.mrf.mxu0 }
 0x6aa   :  { %v1736_v60 = vadd.f32 %v1732_v7, %v5135_v42  ;;  %v1727_v62 = vadd.f32 %v4276_v61, %v1726_v59  ;;  %v5403_v59 = vld [vmem:[%s5898_s7] sm:$0xf] }
 0x6ac   :  { %v1735_v63 = vadd.f32 %v1727_v62, %v5123_v39  ;;  %1782 = vrot.lane.b32.xlu1 %v1736_v60, %s5032_s14  ;;  %v1742_v42 = vsel %vm1638_vm8, %v1736_v60, 0.0  ;;  %v1769_v62 = vrot.slane %v5403_v59, %v5162_v53 }
 0x6ae   :  { %1780 = vrot.lane.b32.xlu0 %v1735_v63, %s5032_s14  ;;  %v1739_v5 = vsel %vm1638_vm8, %v1735_v63, 0.0 }
 0x71e   :  { %v1783_v1 = vpop.permute.xlu1 %1782 }
 0x71f   :  { %v1789_v4 = vsel %vm1313_vm7, %v1783_v1, 0.0 }
 0x720   :  { %1790 = vadd.xlane.f32.xlu1 %v1789_v4  ;;  %v1781_v2 = vpop.permute.xlu0 %1780 }
 0x721   :  { %v1786_v3 = vsel %vm1313_vm7, %v1781_v2, 0.0 }
 0x722   :  { %1787 = vadd.xlane.f32.xlu0 %v1786_v3 }
 0x726   :  { %1740 = vadd.xlane.f32.xlu0 %v1739_v5  ;;  %v1775_v5 = vrot.slane %v5403_v59, %v5148_v47 }
 0x72a   :  { %1743 = vadd.xlane.f32.xlu0 %v1742_v42 }
 0x7a9   :  { %v1791_v39 = vpop.xlane.xlu1 %1790 }
 0x7aa   :  { %v1794_v6 = vmul.f32 0.0625, %v1791_v39 }
 0x7ab   :  { %v1788_v8 = vpop.xlane.xlu0 %1787 }
 0x7ac   :  { %v5340_v9 = vsub.f32 %v1736_v60, %v1794_v6  ;;  %v1793_v10 = vmul.f32 0.0625, %v1788_v8 }
 0x7ae   :  { %v5342_v11 = vsub.f32 %v1735_v63, %v1793_v10  ;;  %v1798_v12 = vmul.f32 %v5340_v9, %v5340_v9 }
 0x7af   :  { %v1741_v14 = vpop.xlane.xlu0 %1740 }
 0x7b0   :  { %1803 = vrot.lane.b32.xlu0 %v1798_v12, %s5032_s14  ;;  %v1797_v13 = vmul.f32 %v5342_v11, %v5342_v11  ;;  %v1746_v15 = vmul.f32 0.03125, %v1741_v14 }
 0x7b2   :  { %1801 = vrot.lane.b32.xlu1 %v1797_v13, %s5032_s14  ;;  %v5350_v16 = vsub.f32 %v1735_v63, %v1746_v15 }
 0x7b3   :  { %v1744_v54 = vpop.xlane.xlu0 %1743 }
 0x7b4   :  { %v1747_v17 = vmul.f32 0.03125, %v1744_v54  ;;  %v1750_v19 = vmul.f32 %v5350_v16, %v5350_v16 }
 0x7b6   :  { %v5352_v18 = vsub.f32 %v1736_v60, %v1747_v17  ;;  %v1752_v20 = vsel %vm1638_vm8, %v1750_v19, 0.0  ;;  %v1957_v19 = vld [vmem:[%s5902_s11 + $0x50] sm:$0xff] }
 0x7b8   :  { %v1751_v21 = vmul.f32 %v5352_v18, %v5352_v18 }
 0x7ba   :  { %v1755_v22 = vsel %vm1638_vm8, %v1751_v21, 0.0  ;;  %v1955_v21 = vld [vmem:[%s5902_s11 + $0x40] sm:$0xff] }
 0x7d6   :  { %1753 = vadd.xlane.f32.xlu1 %v1752_v20  ;;  %v1956_v20 = vld [vmem:[%s5902_s11 + $0x48] sm:$0xff] }
 0x7da   :  { %1756 = vadd.xlane.f32.xlu1 %v1755_v22  ;;  %v1954_v22 = vld [vmem:[%s5902_s11 + $0x38] sm:$0xff] }
 0x7eb   :  { %1826 = vrot.lane.b32.xlu1 %v1824_v24, %s5031_s26  ;;  %v1953_v24 = vld [vmem:[%s5902_s11 + $0x30] sm:$0xff] }
 0x822   :  { %v1804_v27 = vpop.permute.xlu0 %1803 }
 0x823   :  { %v1810_v28 = vsel %vm1313_vm7, %v1804_v27, 0.0  ;;  %v1950_v27 = vld [vmem:[%s5902_s11 + $0x18] sm:$0xff] }
 0x824   :  { %v1802_v25 = vpop.permute.xlu1 %1801 }
 0x825   :  { %v1807_v26 = vsel %vm1313_vm7, %v1802_v25, 0.0  ;;  %v1952_v25 = vld [vmem:[%s5902_s11 + $0x28] sm:$0xff] }
 0x826   :  { %1808 = vadd.xlane.f32.xlu0 %v1807_v26  ;;  %v1951_v26 = vld [vmem:[%s5902_s11 + $0x20] sm:$0xff] }
 0x82a   :  { %1811 = vadd.xlane.f32.xlu0 %v1810_v28  ;;  %v1949_v28 = vld [vmem:[%s5902_s11 + $0x10] sm:$0xff] }
 0x840   :  { %1836 = vrot.lane.b32.xlu0 %v1834_v31, %s5031_s26  ;;  %v4279_v31 = vld [vmem:[%s5901_s10] ss:$0 sm:$0xff] }
 0x85f   :  { %v1754_v41 = vpop.xlane.xlu1 %1753 }
 0x860   :  { %v1758_v44 = vmul.f32 0.03125, %v1754_v41 }
 0x862   :  { %v1760_v48 = vadd.f32 1e-12, %v1758_v44 }
 0x863   :  { %v1757_v45 = vpop.xlane.xlu1 %1756 }
 0x864   :  { %v1759_v49 = vmul.f32 0.03125, %v1757_v45  ;;  %4903 = vrsqrt.f32 %v1760_v48 }
 0x866   :  { %v1761_v50 = vadd.f32 1e-12, %v1759_v49 }
 0x867   :  { %v1827_v4 = vpop.permute.xlu1 %1826 }
 0x868   :  { %4905 = vrsqrt.f32 %v1761_v50 }
 0x871   :  { %v4904_v7 = vpop.eup %4903 }
 0x872   :  { %v1764_v60 = vmul.f32 %v4904_v7, %v5350_v16 }
 0x874   :  { %v1770_v3 = vmul.f32 %v1769_v62, %v1764_v60 }
 0x875   :  { %v4906_v63 = vpop.eup %4905 }
 0x876   :  { %v1765_v42 = vmul.f32 %v4906_v63, %v5352_v18  ;;  %v1776_v13 = vadd.f32 %v1775_v5, %v1770_v3  ;;  %v1958_v18 = vld [vmem:[%s5902_s11 + $0x58] sm:$0xff] }
 0x878   :  { %v1771_v14 = vmul.f32 %v1769_v62, %v1765_v42 }
 0x87a   :  { %v1777_v16 = vadd.f32 %v1775_v5, %v1771_v14 }
 0x8af   :  { %v1809_v52 = vpop.xlane.xlu0 %1808 }
 0x8b0   :  { %v1813_v55 = vmul.f32 0.0625, %v1809_v52 }
 0x8b2   :  { %v1815_v56 = vadd.f32 1e-12, %v1813_v55 }
 0x8b3   :  { %v1812_v57 = vpop.xlane.xlu0 %1811 }
 0x8b4   :  { %4907 = vrsqrt.f32 %v1815_v56  ;;  %v1814_v61 = vmul.f32 0.0625, %v1812_v57  ;;  %v4282_v56 = vld [vmem:[%s5903_s12] ss:$0 sm:$0xff] }
 0x8b6   :  { %v1816_v58 = vadd.f32 1e-12, %v1814_v61 }
 0x8b7   :  { %v1837_v39 = vpop.permute.xlu0 %1836 }
 0x8b8   :  { %4909 = vrsqrt.f32 %v1816_v58 }
 0x8c1   :  { %v4908_v1 = vpop.eup %4907 }
 0x8c2   :  { %v1819_v2 = vmul.f32 %v4908_v1, %v5342_v11 }
 0x8c4   :  { %v1829_v6 = vmul.f32 %v1827_v4, %v1819_v2 }
 0x8c5   :  { %v4910_v8 = vpop.eup %4909 }
 0x8c6   :  { %v1820_v10 = vmul.f32 %v4910_v8, %v5340_v9  ;;  %v1839_v12 = vadd.f32 %v1837_v39, %v1829_v6  ;;  %v1959_v9 = vld [vmem:[%s5902_s11 + $0x60] sm:$0xff] }
 0x8c7   :  { %4655 = vmatprep.subr.mxu1 %v1959_v9 }
 0x8c8   :  { %v1830_v15 = vmul.f32 %v1827_v4, %v1820_v10  ;;  %v5414_v54 = vsel %vm1638_vm8, %v1776_v13, %v1839_v12  ;;  %4656 = vmatpush3.msra.mxu1 %v1959_v9 }
 0x8c9   :  { %4646 = vmatprep.mubr.msk.f32.mxu0 %vm72_vm0, %v5414_v54  ;;  %4657 = vmatprep.subr.mxu1 %v1958_v18 }
 0x8ca   :  { %v1840_v11 = vadd.f32 %v1837_v39, %v1830_v15  ;;  %4658 = vmatpush3.msra.mxu1 %v1958_v18 }
 0x8cb   :  { %4659 = vmatprep.subr.mxu1 %v1957_v19 }
 0x8cc   :  { %v5419_v17 = vsel %vm1638_vm8, %v1777_v16, %v1840_v11  ;;  %4660 = vmatpush3.msra.mxu1 %v1957_v19 }
 0x8cd   :  { %4647 = vmatmul.mubr.msk.f32.vlgmr.msra.gmra.mxu0 %vm72_vm0, %v5419_v17  ;;  %4661 = vmatprep.subr.mxu1 %v1956_v20 }
 0x8ce   :  { %2278 = vmatprep.mubr.f32.mxu0 %v5023_v0  ;;  %4662 = vmatpush3.msra.mxu1 %v1956_v20 }
 0x8cf   :  { %4663 = vmatprep.subr.mxu1 %v1955_v21 }
 0x8d0   :  { %4664 = vmatpush3.msra.mxu1 %v1955_v21 }
 0x8d1   :  { %4665 = vmatprep.subr.mxu1 %v1954_v22 }
 0x8d2   :  { %4666 = vmatpush3.msra.mxu1 %v1954_v22 }
 0x8d3   :  { %4667 = vmatprep.subr.mxu1 %v1953_v24 }
 0x8d4   :  { %4668 = vmatpush3.msra.mxu1 %v1953_v24 }
 0x8d5   :  { %4669 = vmatprep.subr.mxu1 %v1952_v25 }
 0x8d6   :  { %4670 = vmatpush3.msra.mxu1 %v1952_v25 }
 0x8d7   :  { %4671 = vmatprep.subr.mxu1 %v1951_v26 }
 0x8d8   :  { %4672 = vmatpush3.msra.mxu1 %v1951_v26  ;;  %v2188_v26 = vld [vmem:[#allocation2 + $0x230] sm:$0xff] }
 0x8d9   :  { %4673 = vmatprep.subr.mxu1 %v1950_v27  ;;  %2222 = vmatprep.subr.mxu0 %v2188_v26 }
 0x8da   :  { %4674 = vmatpush3.msra.mxu1 %v1950_v27  ;;  %v2130_v27 = vrot.slane %v5363_v23, %v5155_v51 }
 0x8db   :  { %4675 = vmatprep.subr.mxu1 %v1949_v28 }
 0x8dc   :  { %4676 = vmatpush3.msra.mxu1 %v1949_v28  ;;  %v2187_v28 = vld [vmem:[#allocation2 + $0x228] sm:$0xff] }
 0x8dd   :  { %4677 = vmatprep.subr.mxu1 %v1948_v29  ;;  %2223 = vmatpush1.msra.mxu0 %v2187_v28 }
 0x8de   :  { %4678 = vmatpush3.msra.mxu1 %v1948_v29  ;;  %v2185_v29 = vld [vmem:[#allocation2 + $0x218] sm:$0xff] }
 0x8df   :  { %4679 = vmatprep.subr.mxu1 %v1947_v30  ;;  %2224 = vmatprep.subr.mxu0 %v2185_v29 }
 0x8e0   :  { %4680 = vmatpush3.msra.mxu1 %v1947_v30  ;;  %v2184_v30 = vld [vmem:[#allocation2 + $0x210] sm:$0xff] }
 0x8e1   :  { %4711 = vmatprep.subr.mxu1 %v5023_v0  ;;  %2225 = vmatpush1.msra.mxu0 %v2184_v30 }
 0x98d   :  { %v4648_v32 = vpop.f32.mrf.mxu0 }
 0x98e   :  { %v1934_v33 = vadd.f32 %v4648_v32, %v4279_v31  ;;  %v2181_v32 = vld [vmem:[#allocation2 + $0x1f8] sm:$0xff] }
 0x98f   :  { %v1928_v34 = vpop.f32.mrf.mxu0 }
 0x990   :  { %v1940_v35 = vmul.f32 0.70710677, %v1934_v33  ;;  %v1929_v36 = vadd.f32 %v4279_v31, %v1928_v34  ;;  %v1938_v49 = vmul.f32 0.5, %v1934_v33  ;;  %v2182_v31 = vld [vmem:[#allocation2 + $0x200] sm:$0xff]  ;;  %v5506_v33 = vsub.s32 3, %v5145_v46  ;;  %v2179_v34 = vld [vmem:[#allocation2 + $0x1e8] sm:$0xff] }
 0x991   :  { %2226 = vmatprep.subr.mxu0 %v2182_v31  ;;  %v2167_v46 = vld [vmem:[#allocation2 + $0x188] sm:$0xff] }
 0x992   :  { %4911 = verf.f32 %v1940_v35  ;;  %v1939_v37 = vmul.f32 0.70710677, %v1929_v36  ;;  %v1937_v45 = vmul.f32 0.5, %v1929_v36  ;;  %2227 = vmatpush1.msra.mxu0 %v2181_v32  ;;  %v2178_v35 = vld [vmem:[#allocation2 + $0x1e0] sm:$0xff]  ;;  %v2176_v36 = vld [vmem:[#allocation2 + $0x1d0] sm:$0xff] }
 0x993   :  { %2228 = vmatprep.subr.mxu0 %v2179_v34  ;;  %v2180_v34 = vld [vmem:[#allocation2 + $0x1f0] sm:$0xff] }
 0x994   :  { %4913 = verf.f32 %v1939_v37  ;;  %v2175_v37 = vld [vmem:[#allocation2 + $0x1c8] sm:$0xff]  ;;  %2229 = vmatpush1.msra.mxu0 %v2178_v35  ;;  %v2177_v35 = vld [vmem:[#allocation2 + $0x1d8] sm:$0xff] }
 0x995   :  { %2230 = vmatprep.subr.mxu0 %v2176_v36  ;;  %v2174_v36 = vld [vmem:[#allocation2 + $0x1c0] sm:$0xff] }
 0x996   :  { %2231 = vmatpush1.msra.mxu0 %v2175_v37  ;;  %v2171_v37 = vld [vmem:[#allocation2 + $0x1a8] sm:$0xff] }
 0x99f   :  { %v4912_v38 = vpop.eup %4911 }
 0x9a0   :  { %v1944_v44 = vadd.f32 1.0, %v4912_v38  ;;  %v2173_v38 = vld [vmem:[#allocation2 + $0x1b8] sm:$0xff] }
 0x9a1   :  { %v4914_v41 = vpop.eup %4913  ;;  %2232 = vmatprep.subr.mxu0 %v2173_v38  ;;  %v2168_v38 = vld [vmem:[#allocation2 + $0x190] sm:$0xff] }
 0x9a2   :  { %v1943_v48 = vadd.f32 1.0, %v4914_v41  ;;  %v1946_v52 = vmul.f32 %v1944_v44, %v1938_v49  ;;  %v2172_v41 = vld [vmem:[#allocation2 + $0x1b0] sm:$0xff]  ;;  %v2140_v44 = vrot.slane %v5363_v23, %v5506_v33  ;;  %v2166_v49 = vld [vmem:[#allocation2 + $0x180] sm:$0xff] }
 0x9a3   :  { %2233 = vmatpush1.msra.mxu0 %v2172_v41  ;;  %v2160_v23 = vld [vmem:[#allocation2 + $0x150] sm:$0xff]  ;;  %v2162_v41 = vld [vmem:[#allocation2 + $0x160] sm:$0xff] }
 0x9a4   :  { %v1945_v50 = vmul.f32 %v1943_v48, %v1937_v45  ;;  %v2170_v45 = vld [vmem:[#allocation2 + $0x1a0] sm:$0xff]  ;;  %v2169_v48 = vld [vmem:[#allocation2 + $0x198] sm:$0xff] }
 0x9a5   :  { %2234 = vmatprep.subr.mxu0 %v2170_v45  ;;  %v2156_v45 = vld [vmem:[#allocation2 + $0x130] sm:$0xff] }
 0x9a6   :  { %4681 = vmatprep.mubr.f32.mxu1 %v1945_v50  ;;  %2235 = vmatpush1.msra.mxu0 %v2169_v48  ;;  %v2164_v50 = vld [vmem:[#allocation2 + $0x170] sm:$0xff]  ;;  %v4283_v48 = vld [vmem:[%s5895_s4 + $0x3] sm:$0x7] }
 0x9a7   :  { %4682 = vmatmul.mubr.f32.vlgmr.msra.gmra.mxu1 %v1946_v52  ;;  %2236 = vmatprep.subr.mxu0 %v2167_v46  ;;  %v2163_v52 = vld [vmem:[#allocation2 + $0x168] sm:$0xff]  ;;  %v2200_v46 = vrot.slane %v4283_v48, %v5148_v47 }
 0x9a8   :  { %4713 = vmatprep.mubr.msk.f32.mxu1 %vm5025_vm2, %v5023_v0  ;;  %2237 = vmatpush1.msra.mxu0 %v2166_v49 }
 0x9a9   :  { %2238 = vmatprep.subr.mxu0 %v2164_v50 }
 0x9aa   :  { %2239 = vmatpush1.msra.mxu0 %v2163_v52 }
 0xa67   :  { %v4683_v55 = vpop.f32.mrf.mxu1 }
 0xa68   :  { %v2042_v58 = vadd.f32 %v4683_v55, %v4282_v56  ;;  %v2161_v55 = vld [vmem:[#allocation2 + $0x158] sm:$0xff] }
 0xa69   :  { %v2036_v57 = vpop.f32.mrf.mxu1  ;;  %2240 = vmatprep.subr.mxu0 %v2161_v55 }
 0xa6a   :  { %v2037_v61 = vadd.f32 %v4282_v56, %v2036_v57  ;;  %v2046_v60 = vadd.f32 %v2042_v58, %v5419_v17  ;;  %2241 = vmatpush1.msra.mxu0 %v2160_v23  ;;  %v2158_v56 = vld [vmem:[#allocation2 + $0x140] sm:$0xff]  ;;  %v2157_v57 = vld [vmem:[#allocation2 + $0x138] sm:$0xff] }
 0xa6b   :  { %2242 = vmatprep.subr.mxu0 %v2158_v56  ;;  %v2154_v58 = vld [vmem:[#allocation2 + $0x120] sm:$0xff]  ;;  %v2196_v56 = vrot.slane %v4283_v48, %v5162_v53 }
 0xa6c   :  { %v2045_v7 = vadd.f32 %v2037_v61, %v5414_v54  ;;  %v2050_v3 = vsel %vm1638_vm8, %v2046_v60, 0.0  ;;  %2243 = vmatpush1.msra.mxu0 %v2157_v57  ;;  %v2155_v61 = vld [vmem:[#allocation2 + $0x128] sm:$0xff] }
 0xa6d   :  { %2244 = vmatprep.subr.mxu0 %v2155_v61 }
 0xa6e   :  { %2087 = vrot.lane.b32.xlu1 %v2045_v7, %s5032_s14  ;;  %v2047_v2 = vsel %vm1638_vm8, %v2045_v7, 0.0  ;;  %2245 = vmatpush1.msra.mxu0 %v2154_v58 }
 0xa72   :  { %2089 = vrot.lane.b32.xlu1 %v2046_v60, %s5032_s14 }
 0xae0   :  { %v2088_v62 = vpop.permute.xlu1 %2087 }
 0xae1   :  { %v2093_v63 = vsel %vm1313_vm7, %v2088_v62, 0.0 }
 0xae2   :  { %2094 = vadd.xlane.f32.xlu0 %v2093_v63 }
 0xae4   :  { %v2090_v1 = vpop.permute.xlu1 %2089 }
 0xae5   :  { %v2096_v4 = vsel %vm1313_vm7, %v2090_v1, 0.0 }
 0xae6   :  { %2097 = vadd.xlane.f32.xlu1 %v2096_v4  ;;  %2048 = vadd.xlane.f32.xlu0 %v2047_v2 }
 0xaea   :  { %2051 = vadd.xlane.f32.xlu1 %v2050_v3 }
 0xb6b   :  { %v2095_v5 = vpop.xlane.xlu0 %2094 }
 0xb6c   :  { %v2099_v42 = vmul.f32 0.0625, %v2095_v5 }
 0xb6e   :  { %v5480_v39 = vsub.f32 %v2045_v7, %v2099_v42 }
 0xb6f   :  { %v2098_v6 = vpop.xlane.xlu1 %2097  ;;  %v2049_v14 = vpop.xlane.xlu0 %2048 }
 0xb70   :  { %v2100_v8 = vmul.f32 0.0625, %v2098_v6  ;;  %v2103_v10 = vmul.f32 %v5480_v39, %v5480_v39  ;;  %v2053_v15 = vmul.f32 0.03125, %v2049_v14 }
 0xb72   :  { %v5484_v12 = vsub.f32 %v2046_v60, %v2100_v8  ;;  %2107 = vrot.lane.b32.xlu0 %v2103_v10, %s5032_s14  ;;  %v5490_v11 = vsub.f32 %v2045_v7, %v2053_v15  ;;  %v2189_v7 = vld [vmem:[#allocation2 + $0x238] sm:$0xff]  ;;  %v2076_v15 = vrot.slane %v5403_v59, %v5155_v51 }
 0xb73   :  { %v2052_v54 = vpop.xlane.xlu1 %2051  ;;  %4684 = vmatprep.subr.mxu0 %v2189_v7 }
 0xb74   :  { %v2104_v13 = vmul.f32 %v5484_v12, %v5484_v12  ;;  %v2054_v16 = vmul.f32 0.03125, %v2052_v54  ;;  %v2057_v9 = vmul.f32 %v5490_v11, %v5490_v11 }
 0xb76   :  { %2109 = vrot.lane.b32.xlu1 %v2104_v13, %s5032_s14  ;;  %v5492_v17 = vsub.f32 %v2046_v60, %v2054_v16  ;;  %v2059_v18 = vsel %vm1638_vm8, %v2057_v9, 0.0 }
 0xb78   :  { %v2058_v19 = vmul.f32 %v5492_v17, %v5492_v17 }
 0xb7a   :  { %v2062_v20 = vsel %vm1638_vm8, %v2058_v19, 0.0 }
 0xb91   :  { %2060 = vadd.xlane.f32.xlu0 %v2059_v18 }
 0xb95   :  { %2063 = vadd.xlane.f32.xlu0 %v2062_v20  ;;  %v2082_v20 = vrot.slane %v5403_v59, %v5506_v33 }
 0xbe4   :  { %v2108_v21 = vpop.permute.xlu0 %2107 }
 0xbe5   :  { %v2113_v22 = vsel %vm1313_vm7, %v2108_v21, 0.0 }
 0xbe6   :  { %2114 = vadd.xlane.f32.xlu1 %v2113_v22 }
 0xbe8   :  { %v2110_v24 = vpop.permute.xlu1 %2109 }
 0xbe9   :  { %v2116_v25 = vsel %vm1313_vm7, %v2110_v24, 0.0 }
 0xbea   :  { %2117 = vadd.xlane.f32.xlu0 %v2116_v25 }
 0xbf7   :  { %2132 = vrot.lane.b32.xlu1 %v2130_v27, %s5031_s26 }
 0xc00   :  { %2142 = vrot.lane.b32.xlu0 %v2140_v44, %s5031_s26  ;;  %v2159_v44 = vld [vmem:[#allocation2 + $0x148] sm:$0xff] }
 0xc1a   :  { %v2061_v60 = vpop.xlane.xlu0 %2060 }
 0xc1b   :  { %v2065_v62 = vmul.f32 0.03125, %v2061_v60 }
 0xc1d   :  { %v2067_v1 = vadd.f32 1e-12, %v2065_v62 }
 0xc1e   :  { %v2064_v63 = vpop.xlane.xlu0 %2063 }
 0xc1f   :  { %v2066_v4 = vmul.f32 0.03125, %v2064_v63  ;;  %4915 = vrsqrt.f32 %v2067_v1 }
 0xc21   :  { %v2068_v2 = vadd.f32 1e-12, %v2066_v4 }
 0xc23   :  { %4917 = vrsqrt.f32 %v2068_v2 }
 0xc2c   :  { %v4916_v13 = vpop.eup %4915 }
 0xc2d   :  { %v2071_v14 = vmul.f32 %v4916_v13, %v5490_v11 }
 0xc2f   :  { %v2077_v19 = vmul.f32 %v2076_v15, %v2071_v14 }
 0xc30   :  { %v4918_v54 = vpop.eup %4917 }
 0xc31   :  { %v2072_v21 = vmul.f32 %v4918_v54, %v5492_v17  ;;  %v2083_v11 = vadd.f32 %v2082_v20, %v2077_v19 }
 0xc33   :  { %v2078_v28 = vmul.f32 %v2076_v15, %v2072_v21 }
 0xc35   :  { %v2084_v31 = vadd.f32 %v2082_v20, %v2078_v28 }
 0xc6f   :  { %v2115_v3 = vpop.xlane.xlu1 %2114 }
 0xc70   :  { %v2119_v5 = vmul.f32 0.0625, %v2115_v3 }
 0xc72   :  { %v2121_v42 = vadd.f32 1e-12, %v2119_v5 }
 0xc73   :  { %v2118_v6 = vpop.xlane.xlu0 %2117  ;;  %v2133_v9 = vpop.permute.xlu1 %2132 }
 0xc74   :  { %4919 = vrsqrt.f32 %v2121_v42  ;;  %v2120_v8 = vmul.f32 0.0625, %v2118_v6 }
 0xc76   :  { %v2122_v10 = vadd.f32 1e-12, %v2120_v8 }
 0xc77   :  { %v2143_v22 = vpop.permute.xlu0 %2142 }
 0xc78   :  { %4921 = vrsqrt.f32 %v2122_v10 }
 0xc81   :  { %v4920_v16 = vpop.eup %4919 }
 0xc82   :  { %v2125_v18 = vmul.f32 %v4920_v16, %v5480_v39  ;;  %v2186_v39 = vld [vmem:[#allocation2 + $0x220] sm:$0xff] }
 0xc84   :  { %v2135_v24 = vmul.f32 %v2133_v9, %v2125_v18 }
 0xc85   :  { %v4922_v25 = vpop.eup %4921 }
 0xc86   :  { %v2126_v26 = vmul.f32 %v4922_v25, %v5484_v12  ;;  %v2145_v27 = vadd.f32 %v2143_v22, %v2135_v24  ;;  %v2183_v12 = vld [vmem:[#allocation2 + $0x208] sm:$0xff]  ;;  %v4975_v24 = vld [vmem:[%s5893_s2] sm:$0xff] }
 0xc88   :  { %v2136_v29 = vmul.f32 %v2133_v9, %v2126_v26  ;;  %v5520_v30 = vsel %vm1638_vm8, %v2083_v11, %v2145_v27 }
 0xc89   :  { %2149 = vst.msk [vmem:[#allocation5] sm:$0xff] %vm72_vm0, %v5520_v30  ;;  %v2151_v59 = vsel %vm72_vm0, %v5520_v30, %v5125_v40 }
 0xc8a   :  { %v2146_v17 = vadd.f32 %v2143_v22, %v2136_v29  ;;  %4284 = vmatmul.mubr.msk.f32.vlgmr.msra.gmra.mxu0 %vm128_vm1, %v2151_v59 }
 0xc8b   :  { %4685 = vmatpush3.msra.mxu0 %v2189_v7  ;;  %2284 = vmatprep.mubr.f32.mxu0 %v5023_v0  ;;  %v2204_v7 = vrot.slane %v4283_v48, %v5155_v51 }
 0xc8c   :  { %4686 = vmatprep.subr.mxu0 %v2186_v39  ;;  %v5530_v32 = vsel %vm1638_vm8, %v2084_v31, %v2146_v17 }
 0xc8d   :  { %4687 = vmatpush3.msra.mxu0 %v2186_v39  ;;  %2150 = vst.msk [vmem:[#allocation5 + $0x8] sm:$0xff] %vm72_vm0, %v5530_v32  ;;  %v2152_v40 = vsel %vm72_vm0, %v5530_v32, %v5138_v43  ;;  %v2165_v43 = vld [vmem:[#allocation2 + $0x178] sm:$0xff] }
 0xc8e   :  { %4688 = vmatprep.subr.mxu0 %v2183_v12  ;;  %4285 = vmatmul.mubr.msk.f32.gmra.mxu0 %vm128_vm1, %v2152_v40 }
 0xc8f   :  { %4689 = vmatpush3.msra.mxu0 %v2183_v12  ;;  %4708 = vmatprep.mubr.msk.f32.mxu0 %vm128_vm1, %v2151_v59 }
 0xc90   :  { %4690 = vmatprep.subr.mxu0 %v2180_v34 }
 0xc91   :  { %4691 = vmatpush3.msra.mxu0 %v2180_v34 }
 0xc92   :  { %4692 = vmatprep.subr.mxu0 %v2177_v35 }
 0xc93   :  { %4693 = vmatpush3.msra.mxu0 %v2177_v35 }
 0xc94   :  { %4694 = vmatprep.subr.mxu0 %v2174_v36 }
 0xc95   :  { %4695 = vmatpush3.msra.mxu0 %v2174_v36 }
 0xc96   :  { %4696 = vmatprep.subr.mxu0 %v2171_v37 }
 0xc97   :  { %4697 = vmatpush3.msra.mxu0 %v2171_v37 }
 0xc98   :  { %4698 = vmatprep.subr.mxu0 %v2168_v38 }
 0xc99   :  { %4699 = vmatpush3.msra.mxu0 %v2168_v38 }
 0xc9a   :  { %4700 = vmatprep.subr.mxu0 %v2165_v43 }
 0xc9b   :  { %4701 = vmatpush3.msra.mxu0 %v2165_v43 }
 0xc9c   :  { %4702 = vmatprep.subr.mxu0 %v2162_v41 }
 0xc9d   :  { %4703 = vmatpush3.msra.mxu0 %v2162_v41 }
 0xc9e   :  { %4704 = vmatprep.subr.mxu0 %v2159_v44 }
 0xc9f   :  { %4705 = vmatpush3.msra.mxu0 %v2159_v44 }
 0xca0   :  { %4706 = vmatprep.subr.mxu0 %v2156_v45 }
 0xca1   :  { %4707 = vmatpush3.msra.mxu0 %v2156_v45 }
 0xca2   :  { %4709 = vmatmul.mubr.msk.f32.vlgmr.msra.gmra.mxu0 %vm128_vm1, %v2152_v40  ;;  %4736 = vmatprep.subr.mxu0 %v5023_v0 }
 0xca3   :  { %4738 = vmatprep.mubr.msk.f32.mxu0 %vm5025_vm2, %v5023_v0 }
 0xd4a   :  { %v2280_v49 = vpop.f32.mrf.mxu0 }
 0xd4b   :  { %v2281_v61 = vadd.f32 %v2280_v49, %v2196_v56 }
 0xd4c   :  { %v2282_v50 = vpop.f32.mrf.mxu0 }
 0xd4d   :  { %v5547_v52 = vadd.f32 %v2282_v50, %v2200_v46 }
 0xd4e   :  { %v2286_v55 = vpop.f32.mrf.mxu0 }
 0xd4f   :  { %2370 = vrot.lane.b32.xlu1 %v5547_v52, %s5026_s23  ;;  %v2287_v1 = vadd.f32 %v2286_v55, %v2196_v56 }
 0xd50   :  { %v2288_v23 = vpop.f32.mrf.mxu0 }
 0xd51   :  { %v5552_v57 = vadd.f32 %v2288_v23, %v2200_v46 }
 0xd53   :  { %2374 = vrot.lane.b32.xlu0 %v5552_v57, %s5026_s23 }
 0xd57   :  { %2383 = vrot.lane.b32.xlu0 %v2281_v61, %s5027_s24 }
 0xd62   :  { %v4710_v58 = vpop.f32.mrf.mxu0 }
 0xd63   :  { %v2363_v63 = vadd.f32 %v4710_v58, %v2204_v7 }
 0xd64   :  { %v2357_v60 = vpop.f32.mrf.mxu0 }
 0xd65   :  { %v2358_v62 = vadd.f32 %v2357_v60, %v2204_v7 }
 0xd67   :  { %2372 = vrot.lane.b32.xlu1 %v2358_v62, %s5026_s23 }
 0xd6b   :  { %2376 = vrot.lane.b32.xlu1 %v2363_v63, %s5026_s23 }
 0xd6f   :  { %2460 = vrot.lane.b32.xlu1 %v2287_v1, %s5027_s24 }
 0xdc1   :  { %v2371_v3 = vpop.permute.xlu1 %2370 }
 0xdc5   :  { %v2375_v4 = vpop.permute.xlu0 %2374 }
 0xdc9   :  { %v2384_v2 = vpop.permute.xlu0 %2383 }
 0xdca   :  { %4712 = vmatpush3.xpose.msk.msra.mxu1 %vm307_vm4, %v2384_v2 }
 0xdcb   :  { %4716 = vmatprep.subr.mxu1 %v5023_v0 }
 0xdcd   :  { %4714 = vmatmul.mubr.msk.f32.vlgmr.msra.gmra.mxu1 %vm307_vm4, %v2281_v61 }
 0xdce   :  { %4718 = vmatprep.mubr.msk.f32.mxu1 %vm5025_vm2, %v5023_v0 }
 0xdd9   :  { %v5566_v5 = vpop.permute.xlu1 %2372 }
 0xdda   :  { %v2378_v42 = vsel %vm299_vm3, %v2371_v3, %v5566_v5 }
 0xddb   :  { %2536 = vrot.lane.b32.xlu0 %v2378_v42, %s5027_s24 }
 0xddd   :  { %v5571_v6 = vpop.permute.xlu1 %2376 }
 0xdde   :  { %v2379_v8 = vsel %vm299_vm3, %v2375_v4, %v5571_v6 }
 0xddf   :  { %2612 = vrot.lane.b32.xlu1 %v2379_v8, %s5027_s24  ;;  %2734 = vrot.lane.b32.xlu0 %v2281_v61, %s5022_s29 }
 0xde1   :  { %v2461_v10 = vpop.permute.xlu1 %2460 }
 0xde2   :  { %4717 = vmatpush3.xpose.msk.msra.mxu1 %vm307_vm4, %v2461_v10 }
 0xde3   :  { %2812 = vrot.lane.b32.xlu1 %v2287_v1, %s5022_s29  ;;  %2732 = vrot.lane.b32.xlu0 %v2281_v61, %s5024_s17 }
 0xde4   :  { %4721 = vmatprep.subr.mxu1 %v5023_v0 }
 0xde5   :  { %4719 = vmatmul.mubr.msk.f32.vlgmr.msra.gmra.mxu1 %vm307_vm4, %v2287_v1 }
 0xde6   :  { %4723 = vmatprep.mubr.msk.f32.mxu1 %vm5025_vm2, %v5023_v0 }
 0xde7   :  { %2810 = vrot.lane.b32.xlu1 %v2287_v1, %s5024_s17  ;;  %2890 = vrot.lane.b32.xlu0 %v2378_v42, %s5022_s29 }
 0xdeb   :  { %2968 = vrot.lane.b32.xlu1 %v2379_v8, %s5022_s29  ;;  %2888 = vrot.lane.b32.xlu0 %v2378_v42, %s5024_s17 }
 0xdef   :  { %2966 = vrot.lane.b32.xlu1 %v2379_v8, %s5024_s17 }
 0xe4d   :  { %v2537_v13 = vpop.permute.xlu0 %2536 }
 0xe4e   :  { %4722 = vmatpush3.xpose.msk.msra.mxu1 %vm307_vm4, %v2537_v13 }
 0xe4f   :  { %4726 = vmatprep.subr.mxu1 %v5023_v0 }
 0xe51   :  { %v2613_v14 = vpop.permute.xlu1 %2612  ;;  %4724 = vmatmul.mubr.msk.f32.vlgmr.msra.gmra.mxu1 %vm307_vm4, %v2378_v42  ;;  %v2735_v15 = vpop.permute.xlu0 %2734 }
 0xe52   :  { %4727 = vmatpush3.xpose.msk.msra.mxu1 %vm307_vm4, %v2613_v14  ;;  %4728 = vmatprep.mubr.msk.f32.mxu1 %vm5025_vm2, %v5023_v0 }
 0xe53   :  { %4731 = vmatprep.subr.mxu1 %v5023_v0 }
 0xe55   :  { %v2813_v54 = vpop.permute.xlu1 %2812  ;;  %4729 = vmatmul.mubr.msk.f32.vlgmr.msra.gmra.mxu1 %vm307_vm4, %v2379_v8  ;;  %v2733_v16 = vpop.permute.xlu0 %2732 }
 0xe56   :  { %4732 = vmatpush3.xpose.msk.msra.mxu1 %vm660_vm5, %v2735_v15  ;;  %4737 = vmatpush3.xpose.msk.msra.mxu0 %vm660_vm5, %v2813_v54 }
 0xe57   :  { %4733 = vmatprep.mubr.msk.f32.mxu1 %vm5025_vm2, %v5023_v0  ;;  %4741 = vmatprep.subr.mxu1 %v5023_v0 }
 0xe58   :  { %4746 = vmatprep.subr.mxu0 %v5023_v0 }
 0xe59   :  { %v2811_v9 = vpop.permute.xlu1 %2810  ;;  %4734 = vmatmul.mubr.msk.f32.vlgmr.msra.gmra.mxu1 %vm660_vm5, %v2733_v16  ;;  %v2891_v18 = vpop.permute.xlu0 %2890 }
 0xe5a   :  { %4739 = vmatmul.mubr.msk.f32.vlgmr.msra.gmra.mxu0 %vm660_vm5, %v2811_v9  ;;  %4742 = vmatpush3.xpose.msk.msra.mxu1 %vm660_vm5, %v2891_v18 }
 0xe5b   :  { %4743 = vmatprep.mubr.msk.f32.mxu1 %vm5025_vm2, %v5023_v0  ;;  %4751 = vmatprep.subr.mxu1 %v5023_v0 }
 0xe5c   :  { %4748 = vmatprep.mubr.msk.f32.mxu0 %vm5025_vm2, %v5023_v0 }
 0xe5d   :  { %v2969_v19 = vpop.permute.xlu1 %2968  ;;  %v2889_v20 = vpop.permute.xlu0 %2888 }
 0xe5e   :  { %4744 = vmatmul.mubr.msk.f32.vlgmr.msra.gmra.mxu1 %vm660_vm5, %v2889_v20  ;;  %4747 = vmatpush3.xpose.msk.msra.mxu0 %vm660_vm5, %v2969_v19 }
 0xe5f   :  { %4752 = vmatpush3.msra.mxu1 %v5547_v52  ;;  %4756 = vmatprep.subr.mxu0 %v5023_v0 }
 0xe60   :  { %4753 = vmatprep.mubr.msk.f32.mxu1 %vm5025_vm2, %v5023_v0  ;;  %4761 = vmatprep.subr.mxu1 %v5023_v0 }
 0xe61   :  { %v2967_v21 = vpop.permute.xlu1 %2966 }
 0xe62   :  { %4749 = vmatmul.mubr.msk.f32.vlgmr.msra.gmra.mxu0 %vm660_vm5, %v2967_v21 }
 0xe63   :  { %4757 = vmatpush3.msra.mxu0 %v5552_v57  ;;  %4758 = vmatprep.mubr.msk.f32.mxu0 %vm5025_vm2, %v5023_v0 }
 0xe64   :  { %4766 = vmatprep.subr.mxu0 %v5023_v0 }
 0xe8d   :  { %v2455_v22 = vpop.f32.mrf.mxu1 }
 0xe8e   :  { %v2456_v25 = vadd.f32 %v4975_v24, %v2455_v22 }
 0xe8f   :  { %v4715_v26 = vpop.f32.mrf.mxu1 }
 0xe90   :  { %v2688_v11 = vsel %vm611_vm6, %v2456_v25, -inf }
 0xe91   :  { %2689 = vmax.xlane.f32.xlu0 %v2688_v11 }
 0xea5   :  { %v2532_v27 = vpop.f32.mrf.mxu1 }
 0xea6   :  { %v2533_v28 = vadd.f32 %v4975_v24, %v2532_v27 }
 0xea7   :  { %v4720_v29 = vpop.f32.mrf.mxu1 }
 0xea8   :  { %v2691_v59 = vsel %vm611_vm6, %v2533_v28, -inf }
 0xea9   :  { %2692 = vmax.xlane.f32.xlu1 %v2691_v59 }
 0xf11   :  { %v2608_v39 = vpop.f32.mrf.mxu1 }
 0xf12   :  { %v2609_v17 = vadd.f32 %v4975_v24, %v2608_v39 }
 0xf13   :  { %v4725_v31 = vpop.f32.mrf.mxu1 }
 0xf14   :  { %v2694_v12 = vsel %vm611_vm6, %v2609_v17, -inf }
 0xf15   :  { %2695 = vmax.xlane.f32.xlu0 %v2694_v12  ;;  %v2684_v40 = vpop.f32.mrf.mxu1 }
 0xf16   :  { %v2685_v34 = vadd.f32 %v4975_v24, %v2684_v40 }
 0xf17   :  { %v4730_v35 = vpop.f32.mrf.mxu1 }
 0xf18   :  { %v2697_v36 = vsel %vm611_vm6, %v2685_v34, -inf }
 0xf19   :  { %2698 = vmax.xlane.f32.xlu0 %v2697_v36  ;;  %v2806_v37 = vpop.f32.mrf.mxu1 }
 0xf1a   :  { %v5630_v38 = vadd.f32 %v4975_v24, %v2806_v37  ;;  %v2884_v43 = vpop.f32.mrf.mxu0  ;;  %v2690_v1 = vpop.xlane.xlu0 %2689 }
 0xf1b   :  { %v2885_v41 = vadd.f32 %v4975_v24, %v2884_v43  ;;  %v4735_v44 = vpop.f32.mrf.mxu1  ;;  %v2700_v4 = vsub.f32 %v2456_v25, %v2690_v1 }
 0xf1c   :  { %v4740_v45 = vpop.f32.mrf.mxu0  ;;  %v3044_v48 = vsel %vm611_vm6, %v5630_v38, -inf }
 0xf1d   :  { %3045 = vmax.xlane.f32.xlu1 %v3044_v48  ;;  %v3047_v46 = vsel %vm611_vm6, %v2885_v41, -inf  ;;  %v2704_v2 = vmul.f32 1.442695, %v2700_v4 }
 0xf1e   :  { %3048 = vmax.xlane.f32.xlu0 %v3047_v46  ;;  %v2962_v49 = vpop.f32.mrf.mxu1 }
 0xf1f   :  { %v2963_v50 = vadd.f32 %v4975_v24, %v2962_v49 }
 0xf20   :  { %v4745_v55 = vpop.f32.mrf.mxu1 }
 0xf21   :  { %v3050_v23 = vsel %vm611_vm6, %v2963_v50, -inf }
 0xf22   :  { %v3040_v56 = vpop.f32.mrf.mxu0  ;;  %3051 = vmax.xlane.f32.xlu1 %v3050_v23 }
 0xf23   :  { %v3041_v61 = vadd.f32 %v4975_v24, %v3040_v56 }
 0xf24   :  { %v4750_v58 = vpop.f32.mrf.mxu0 }
 0xf25   :  { %v3053_v7 = vsel %vm611_vm6, %v3041_v61, -inf }
 0xf26   :  { %3054 = vmax.xlane.f32.xlu0 %v3053_v7 }
 0xf32   :  { %v2693_v60 = vpop.xlane.xlu1 %2692 }
 0xf33   :  { %v2701_v62 = vsub.f32 %v2533_v28, %v2693_v60  ;;  %3390 = vrot.lane.b32.xlu1 %v5547_v52, %s5028_s27 }
 0xf35   :  { %v2706_v63 = vmul.f32 1.442695, %v2701_v62 }
 0xf37   :  { %4923 = vpow2.f32 %v2706_v63 }
 0xf38   :  { %4925 = vpow2.f32 %v2704_v2 }
 0xf44   :  { %v4924_v3 = vpop.eup %4923 }
 0xf45   :  { %v2715_v42 = vsel %vm611_vm6, %v4924_v3, 0.0  ;;  %v4926_v8 = vpop.eup %4925 }
 0xf46   :  { %2716 = vadd.xlane.f32.xlu0 %v2715_v42  ;;  %v2712_v10 = vsel %vm611_vm6, %v4926_v8, 0.0 }
 0xf57   :  { %2713 = vadd.xlane.f32.xlu1 %v2712_v10 }
 0xf9e   :  { %v2696_v13 = vpop.xlane.xlu0 %2695 }
 0xf9f   :  { %v2702_v14 = vsub.f32 %v2609_v17, %v2696_v13 }
 0xfa1   :  { %v2708_v15 = vmul.f32 1.442695, %v2702_v14 }
 0xfa2   :  { %v2699_v54 = vpop.xlane.xlu0 %2698 }
 0xfa3   :  { %4927 = vpow2.f32 %v2708_v15  ;;  %v2703_v18 = vsub.f32 %v2685_v34, %v2699_v54 }
 0xfa5   :  { %v2710_v24 = vmul.f32 1.442695, %v2703_v18 }
 0xfa6   :  { %v3046_v39 = vpop.xlane.xlu1 %3045 }
 0xfa7   :  { %v3049_v52 = vpop.xlane.xlu0 %3048  ;;  %v3056_v17 = vsub.f32 %v5630_v38, %v3046_v39  ;;  %v4313_v39 = vld [vmem:[%s5896_s5 + $0x38] sm:$0xff] }
 0xfa8   :  { %v3057_v16 = vsub.f32 %v2885_v41, %v3049_v52 }
 0xfa9   :  { %v3060_v40 = vmul.f32 1.442695, %v3056_v17 }
 0xfaa   :  { %v3062_v9 = vmul.f32 1.442695, %v3057_v16 }
 0xfab   :  { %v3052_v31 = vpop.xlane.xlu1 %3051 }
 0xfac   :  { %4929 = vpow2.f32 %v3062_v9  ;;  %v3058_v34 = vsub.f32 %v2963_v50, %v3052_v31  ;;  %v4312_v31 = vld [vmem:[%s5896_s5 + $0x30] sm:$0xff] }
 0xfae   :  { %v3064_v35 = vmul.f32 1.442695, %v3058_v34 }
 0xfaf   :  { %v3055_v19 = vpop.xlane.xlu0 %3054  ;;  %v3391_v36 = vpop.permute.xlu1 %3390 }
 0xfb0   :  { %v4928_v20 = vpop.eup %4927  ;;  %v3059_v21 = vsub.f32 %v3041_v61, %v3055_v19 }
 0xfb1   :  { %v2718_v22 = vsel %vm611_vm6, %v4928_v20, 0.0 }
 0xfb2   :  { %v3066_v25 = vmul.f32 1.442695, %v3059_v21  ;;  %2719 = vadd.xlane.f32.xlu1 %v2718_v22 }
 0xfb4   :  { %4931 = vpow2.f32 %v3066_v25 }
 0xfb5   :  { %4933 = vpow2.f32 %v2710_v24 }
 0xfb9   :  { %v5642_v26 = vpop.eup %4929 }
 0xfba   :  { %v3071_v11 = vsel %vm611_vm6, %v5642_v26, 0.0 }
 0xfbb   :  { %3072 = vadd.xlane.f32.xlu0 %v3071_v11 }
 0xfc1   :  { %v5646_v27 = vpop.eup %4931 }
 0xfc2   :  { %v3077_v28 = vsel %vm611_vm6, %v5646_v27, 0.0  ;;  %v4934_v29 = vpop.eup %4933 }
 0xfc3   :  { %3542 = vrot.lane.b32.xlu1 %v5566_v5, %s5028_s27  ;;  %3078 = vadd.xlane.f32.xlu0 %v3077_v28  ;;  %v2721_v59 = vsel %vm611_vm6, %v4934_v29, 0.0  ;;  %v4316_v28 = vld [vmem:[%s5896_s5 + $0x50] sm:$0xff] }
 0xfc7   :  { %2722 = vadd.xlane.f32.xlu0 %v2721_v59  ;;  %v4314_v59 = vld [vmem:[%s5896_s5 + $0x40] sm:$0xff] }
 0xfcf   :  { %v2717_v12 = vpop.xlane.xlu0 %2716 }
 0xfd0   :  { %4935 = vrcp.f32 %v2717_v12 }
 0xfd1   :  { %4937 = vpow2.f32 %v3060_v40 }
 0xfd2   :  { %4939 = vpow2.f32 %v3064_v35 }
 0xfdd   :  { %v4936_v37 = vpop.eup %4935  ;;  %3466 = vrot.lane.b32.xlu0 %v5552_v57, %s5028_s27 }
 0xfde   :  { %v2727_v43 = vmul.f32 %v4936_v37, %v4924_v3  ;;  %v4938_v38 = vpop.eup %4937 }
 0xfdf   :  { %v3068_v44 = vsel %vm611_vm6, %v4938_v38, 0.0  ;;  %v4940_v45 = vpop.eup %4939 }
 0xfe0   :  { %v2714_v41 = vpop.xlane.xlu1 %2713  ;;  %4759 = vmatmul.mubr.msk.f32.vlgmr.msra.gmra.mxu0 %vm611_vm6, %v2727_v43  ;;  %v3074_v48 = vsel %vm611_vm6, %v4940_v45, 0.0 }
 0xfe1   :  { %4941 = vrcp.f32 %v2714_v41  ;;  %4767 = vmatpush3.msra.mxu0 %v5571_v6  ;;  %4768 = vmatprep.mubr.msk.f32.mxu0 %vm5025_vm2, %v5023_v0 }
 0xfe2   :  { %4776 = vmatprep.subr.mxu0 %v5023_v0 }
 0xfe7   :  { %3069 = vadd.xlane.f32.xlu1 %v3068_v44 }
 0xfeb   :  { %3075 = vadd.xlane.f32.xlu1 %v3074_v48  ;;  %v4319_v48 = vld [vmem:[%s5897_s6 + $0x1] ss:$0 sm:$0xff] }
 0xfee   :  { %v4942_v57 = vpop.eup %4941 }
 0xfef   :  { %v2725_v46 = vmul.f32 %v4942_v57, %v4926_v8 }
 0xff1   :  { %4754 = vmatmul.mubr.msk.f32.vlgmr.msra.gmra.mxu1 %vm611_vm6, %v2725_v46 }
 0xff2   :  { %4762 = vmatpush3.msra.mxu1 %v5566_v5  ;;  %4763 = vmatprep.mubr.msk.f32.mxu1 %vm5025_vm2, %v5023_v0 }
 0xff3   :  { %4771 = vmatprep.subr.mxu1 %v5023_v0 }
 0xffc   :  { %3618 = vrot.lane.b32.xlu1 %v5571_v6, %s5028_s27 }
0x103b   :  { %v2720_v49 = vpop.xlane.xlu1 %2719 }
0x103c   :  { %4943 = vrcp.f32 %v2720_v49 }
0x103f   :  { %v3543_v62 = vpop.permute.xlu1 %3542 }
0x1044   :  { %v3073_v50 = vpop.xlane.xlu0 %3072 }
0x1049   :  { %v4944_v55 = vpop.eup %4943 }
0x104a   :  { %v2729_v23 = vmul.f32 %v4944_v55, %v4928_v20 }
0x104c   :  { %4764 = vmatmul.mubr.msk.f32.vlgmr.msra.gmra.mxu1 %vm611_vm6, %v2729_v23  ;;  %v3079_v56 = vpop.xlane.xlu0 %3078 }
0x104d   :  { %4772 = vmatpush3.msra.mxu1 %v3391_v36  ;;  %4773 = vmatprep.mubr.msk.f32.mxu1 %vm5025_vm2, %v5023_v0 }
0x104e   :  { %4781 = vmatprep.subr.mxu1 %v5023_v0 }
0x1050   :  { %v2723_v5 = vpop.xlane.xlu0 %2722 }
0x1051   :  { %4945 = vrcp.f32 %v2723_v5 }
0x1052   :  { %4947 = vrcp.f32 %v3073_v50 }
0x1053   :  { %4949 = vrcp.f32 %v3079_v56 }
0x1054   :  { %v3467_v7 = vpop.permute.xlu0 %3466 }
0x105e   :  { %v4946_v61 = vpop.eup %4945 }
0x105f   :  { %v2731_v58 = vmul.f32 %v4946_v61, %v4934_v29  ;;  %v4948_v6 = vpop.eup %4947  ;;  %v4315_v29 = vld [vmem:[%s5896_s5 + $0x48] sm:$0xff] }
0x1060   :  { %v3083_v60 = vmul.f32 %v4948_v6, %v5642_v26  ;;  %v4950_v4 = vpop.eup %4949 }
0x1061   :  { %4769 = vmatmul.mubr.msk.f32.vlgmr.msra.gmra.mxu0 %vm611_vm6, %v2731_v58  ;;  %v3087_v3 = vmul.f32 %v4950_v4, %v5646_v27  ;;  %v4317_v27 = vld [vmem:[%s5896_s5 + $0x58] sm:$0xff] }
0x1062   :  { %4777 = vmatpush3.msra.mxu0 %v3467_v7  ;;  %4778 = vmatprep.mubr.msk.f32.mxu0 %vm5025_vm2, %v5023_v0 }
0x1063   :  { %4786 = vmatprep.subr.mxu0 %v5023_v0 }
0x1065   :  { %4779 = vmatmul.mubr.msk.f32.vlgmr.msra.gmra.mxu0 %vm611_vm6, %v3083_v60 }
0x1066   :  { %4788 = vmatprep.mubr.msk.f32.mxu0 %vm5025_vm2, %v5023_v0 }
0x1070   :  { %v3070_v63 = vpop.xlane.xlu1 %3069 }
0x1071   :  { %4951 = vrcp.f32 %v3070_v63 }
0x1074   :  { %v3076_v1 = vpop.xlane.xlu1 %3075 }
0x1075   :  { %4953 = vrcp.f32 %v3076_v1 }
0x1078   :  { %v3619_v2 = vpop.permute.xlu1 %3618 }
0x1079   :  { %4787 = vmatpush3.msra.mxu0 %v3619_v2 }
0x107a   :  { %4789 = vmatmul.mubr.msk.f32.vlgmr.msra.gmra.mxu0 %vm611_vm6, %v3087_v3 }
0x107e   :  { %v4952_v42 = vpop.eup %4951 }
0x107f   :  { %v3081_v8 = vmul.f32 %v4952_v42, %v4938_v38 }
0x1081   :  { %4774 = vmatmul.mubr.msk.f32.vlgmr.msra.gmra.mxu1 %vm611_vm6, %v3081_v8 }
0x1082   :  { %v4954_v10 = vpop.eup %4953  ;;  %4782 = vmatpush3.msra.mxu1 %v3543_v62  ;;  %4783 = vmatprep.mubr.msk.f32.mxu1 %vm5025_vm2, %v5023_v0 }
0x1083   :  { %v3085_v13 = vmul.f32 %v4954_v10, %v4940_v45  ;;  %4791 = vmatprep.subr.mxu1 %v4317_v27 }
0x1085   :  { %4784 = vmatmul.mubr.msk.f32.vlgmr.msra.gmra.mxu1 %vm611_vm6, %v3085_v13 }
0x1086   :  { %4792 = vmatpush3.msra.mxu1 %v4317_v27  ;;  %v4325_v27 = vld [vmem:[%s5900_s9 + $0x38] sm:$0xff] }
0x1087   :  { %4793 = vmatprep.subr.mxu1 %v4316_v28 }
0x1088   :  { %4794 = vmatpush3.msra.mxu1 %v4316_v28  ;;  %v4324_v28 = vld [vmem:[%s5900_s9 + $0x30] sm:$0xff] }
0x1089   :  { %4795 = vmatprep.subr.mxu1 %v4315_v29 }
0x108a   :  { %4796 = vmatpush3.msra.mxu1 %v4315_v29  ;;  %v4349_v29 = vld [vmem:[%s5902_s11 + $0xf8] sm:$0xff] }
0x108b   :  { %4797 = vmatprep.subr.mxu1 %v4314_v59 }
0x108c   :  { %4798 = vmatpush3.msra.mxu1 %v4314_v59  ;;  %v4348_v59 = vld [vmem:[%s5902_s11 + $0xf0] sm:$0xff] }
0x108d   :  { %4799 = vmatprep.subr.mxu1 %v4313_v39 }
0x108e   :  { %4800 = vmatpush3.msra.mxu1 %v4313_v39  ;;  %v4347_v39 = vld [vmem:[%s5902_s11 + $0xe8] sm:$0xff] }
0x108f   :  { %4801 = vmatprep.subr.mxu1 %v4312_v31 }
0x1090   :  { %4802 = vmatpush3.msra.mxu1 %v4312_v31 }
0x1091   :  { %4821 = vmatprep.subr.mxu1 %v4349_v29 }
0x10a0   :  { %v3230_v14 = vpop.f32.mrf.mxu0 }
0x10a2   :  { %v4760_v15 = vpop.f32.mrf.mxu0 }
0x10b1   :  { %v3157_v54 = vpop.f32.mrf.mxu1 }
0x10b3   :  { %v4755_v52 = vpop.f32.mrf.mxu1 }
0x110c   :  { %v3303_v16 = vpop.f32.mrf.mxu1 }
0x110e   :  { %v4765_v9 = vpop.f32.mrf.mxu1 }
0x110f   :  { %v5754_v9 = vld [vmem:[%s5899_s8 + $0x4] sm:$0xf] }
0x1121   :  { %v3376_v18 = vpop.f32.mrf.mxu0 }
0x1123   :  { %v4770_v19 = vpop.f32.mrf.mxu0 }
0x1125   :  { %v3538_v20 = vpop.f32.mrf.mxu0 }
0x1127   :  { %v4780_v21 = vpop.f32.mrf.mxu0 }
0x113a   :  { %v3690_v22 = vpop.f32.mrf.mxu0 }
0x113b   :  { %3698 = vrot.lane.b32.xlu1 %v3690_v22, %s5029_s19 }
0x113c   :  { %v4790_v24 = vpop.f32.mrf.mxu0 }
0x113d   :  { %v4329_v24 = vld [vmem:[%s5900_s9 + $0x58] sm:$0xff] }
0x113e   :  { %4806 = vmatprep.subr.mxu0 %v4329_v24 }
0x113f   :  { %3384 = vrot.lane.b32.xlu1 %v3376_v18, %s5030_s1  ;;  %v3899_v18 = vrot.slane %v5754_v9, %v5162_v53  ;;  %4807 = vmatpush3.msra.mxu0 %v4329_v24 }
0x1141   :  { %v3462_v0 = vpop.f32.mrf.mxu1 }
0x1143   :  { %v4775_v25 = vpop.f32.mrf.mxu1 }
0x1144   :  { %v3909_v25 = vrot.slane %v5754_v9, %v5148_v47 }
0x1145   :  { %v3614_v26 = vpop.f32.mrf.mxu1 }
0x1146   :  { %3696 = vrot.lane.b32.xlu0 %v3614_v26, %s5029_s19  ;;  %v4327_v26 = vld [vmem:[%s5900_s9 + $0x48] sm:$0xff] }
0x1147   :  { %v4785_v11 = vpop.f32.mrf.mxu1 }
0x1148   :  { %v4326_v11 = vld [vmem:[%s5900_s9 + $0x40] sm:$0xff] }
0x114a   :  { %3382 = vrot.lane.b32.xlu0 %v3303_v16, %s5030_s1 }
0x11ad   :  { %v3699_v17 = vpop.permute.xlu1 %3698 }
0x11ae   :  { %v3703_v12 = vsel %vm611_vm6, %v3538_v20, %v3699_v17 }
0x11af   :  { %3708 = vrot.lane.b32.xlu1 %v3703_v12, %s5031_s26 }
0x11b1   :  { %v3385_v35 = vpop.permute.xlu1 %3384 }
0x11b2   :  { %v3389_v38 = vsel %vm1313_vm7, %v3230_v14, %v3385_v35 }
0x11b8   :  { %v3697_v40 = vpop.permute.xlu0 %3696 }
0x11b9   :  { %v3702_v34 = vsel %vm611_vm6, %v3462_v0, %v3697_v40  ;;  %v4328_v0 = vld [vmem:[%s5900_s9 + $0x50] sm:$0xff] }
0x11ba   :  { %3706 = vrot.lane.b32.xlu0 %v3702_v34, %s5031_s26  ;;  %4808 = vmatprep.subr.mxu0 %v4328_v0 }
0x11bb   :  { %4809 = vmatpush3.msra.mxu0 %v4328_v0 }
0x11bc   :  { %v3383_v36 = vpop.permute.xlu0 %3382  ;;  %4810 = vmatprep.subr.mxu0 %v4327_v26 }
0x11bd   :  { %v3388_v43 = vsel %vm1313_vm7, %v3157_v54, %v3383_v36  ;;  %4811 = vmatpush3.msra.mxu0 %v4327_v26 }
0x11be   :  { %4812 = vmatprep.subr.mxu0 %v4326_v11 }
0x11bf   :  { %4813 = vmatpush3.msra.mxu0 %v4326_v11 }
0x11c0   :  { %4814 = vmatprep.subr.mxu0 %v4325_v27 }
0x11c1   :  { %4815 = vmatpush3.msra.mxu0 %v4325_v27 }
0x11c2   :  { %4816 = vmatprep.subr.mxu0 %v4324_v28 }
0x11c3   :  { %4817 = vmatpush3.msra.mxu0 %v4324_v28 }
0x1221   :  { %v3709_v37 = vpop.permute.xlu1 %3708 }
0x1222   :  { %v3713_v45 = vsel %vm1638_vm8, %v3389_v38, %v3709_v37 }
0x122c   :  { %v3707_v41 = vpop.permute.xlu0 %3706 }
0x122d   :  { %v3712_v44 = vsel %vm1638_vm8, %v3388_v43, %v3707_v41 }
0x122e   :  { %4803 = vmatprep.mubr.msk.f32.mxu1 %vm72_vm0, %v3712_v44 }
0x122f   :  { %4804 = vmatmul.mubr.msk.f32.vlgmr.msra.gmra.mxu1 %vm72_vm0, %v3713_v45 }
0x1230   :  { %4822 = vmatpush3.msra.mxu1 %v4349_v29 }
0x1231   :  { %4823 = vmatprep.subr.mxu1 %v4348_v59 }
0x1232   :  { %4824 = vmatpush3.msra.mxu1 %v4348_v59 }
0x1233   :  { %4825 = vmatprep.subr.mxu1 %v4347_v39 }
0x1234   :  { %4826 = vmatpush3.msra.mxu1 %v4347_v39 }
0x12ef   :  { %v4805_v57 = vpop.f32.mrf.mxu1 }
0x12f0   :  { %v3807_v46 = vadd.f32 %v4805_v57, %v4319_v48 }
0x12f1   :  { %v3801_v49 = vpop.f32.mrf.mxu1 }
0x12f2   :  { %v3811_v50 = vadd.f32 %v3807_v46, %v5530_v32  ;;  %v3802_v55 = vadd.f32 %v4319_v48, %v3801_v49  ;;  %v5794_v48 = vld [vmem:[%s5898_s7 + $0x4] sm:$0xf] }
0x12f3   :  { %v3845_v46 = vrot.slane %v5794_v48, %v5162_v53 }
0x12f4   :  { %v3810_v23 = vadd.f32 %v3802_v55, %v5520_v30  ;;  %3858 = vrot.lane.b32.xlu1 %v3811_v50, %s5032_s14  ;;  %v3819_v32 = vsel %vm1638_vm8, %v3811_v50, 0.0 }
0x12f6   :  { %3856 = vrot.lane.b32.xlu0 %v3810_v23, %s5032_s14  ;;  %v3816_v6 = vsel %vm1638_vm8, %v3810_v23, 0.0 }
0x1366   :  { %v3859_v56 = vpop.permute.xlu1 %3858 }
0x1367   :  { %v3865_v5 = vsel %vm1313_vm7, %v3859_v56, 0.0 }
0x1368   :  { %3866 = vadd.xlane.f32.xlu1 %v3865_v5  ;;  %v3857_v61 = vpop.permute.xlu0 %3856  ;;  %v3851_v5 = vrot.slane %v5794_v48, %v5148_v47 }
0x1369   :  { %v3862_v58 = vsel %vm1313_vm7, %v3857_v61, 0.0 }
0x136a   :  { %3863 = vadd.xlane.f32.xlu0 %v3862_v58 }
0x136e   :  { %3817 = vadd.xlane.f32.xlu0 %v3816_v6 }
0x1372   :  { %3820 = vadd.xlane.f32.xlu0 %v3819_v32 }
0x13f1   :  { %v3867_v7 = vpop.xlane.xlu1 %3866 }
0x13f2   :  { %v3869_v30 = vmul.f32 0.0625, %v3867_v7 }
0x13f3   :  { %v3864_v60 = vpop.xlane.xlu0 %3863 }
0x13f4   :  { %v5731_v62 = vsub.f32 %v3811_v50, %v3869_v30  ;;  %v3868_v63 = vmul.f32 0.0625, %v3864_v60 }
0x13f6   :  { %v3873_v1 = vmul.f32 %v5731_v62, %v5731_v62  ;;  %v5735_v4 = vsub.f32 %v3810_v23, %v3868_v63 }
0x13f7   :  { %v3818_v3 = vpop.xlane.xlu0 %3817 }
0x13f8   :  { %v3872_v2 = vmul.f32 %v5735_v4, %v5735_v4  ;;  %3878 = vrot.lane.b32.xlu0 %v3873_v1, %s5032_s14  ;;  %v3822_v42 = vmul.f32 0.03125, %v3818_v3  ;;  %v4345_v3 = vld [vmem:[%s5902_s11 + $0xd8] sm:$0xff] }
0x13fa   :  { %3876 = vrot.lane.b32.xlu1 %v3872_v2, %s5032_s14  ;;  %v5741_v10 = vsub.f32 %v3810_v23, %v3822_v42  ;;  %v4344_v42 = vld [vmem:[%s5902_s11 + $0xd0] sm:$0xff] }
0x13fb   :  { %v3821_v8 = vpop.xlane.xlu0 %3820 }
0x13fc   :  { %v3823_v13 = vmul.f32 0.03125, %v3821_v8  ;;  %v3826_v15 = vmul.f32 %v5741_v10, %v5741_v10  ;;  %v4343_v8 = vld [vmem:[%s5902_s11 + $0xc8] sm:$0xff] }
0x13fe   :  { %v5743_v14 = vsub.f32 %v3811_v50, %v3823_v13  ;;  %v3828_v54 = vsel %vm1638_vm8, %v3826_v15, 0.0  ;;  %v4341_v13 = vld [vmem:[%s5902_s11 + $0xb8] sm:$0xff]  ;;  %v4339_v15 = vld [vmem:[%s5902_s11 + $0xa8] sm:$0xff] }
0x1400   :  { %v3827_v52 = vmul.f32 %v5743_v14, %v5743_v14 }
0x1402   :  { %v3831_v16 = vsel %vm1638_vm8, %v3827_v52, 0.0  ;;  %v4337_v52 = vld [vmem:[%s5902_s11 + $0x98] sm:$0xff] }
0x141e   :  { %3829 = vadd.xlane.f32.xlu1 %v3828_v54  ;;  %v4338_v54 = vld [vmem:[%s5902_s11 + $0xa0] sm:$0xff] }
0x1422   :  { %3832 = vadd.xlane.f32.xlu1 %v3831_v16  ;;  %v4336_v16 = vld [vmem:[%s5902_s11 + $0x90] sm:$0xff] }
0x1433   :  { %3901 = vrot.lane.b32.xlu1 %v3899_v18, %s5031_s26  ;;  %v4335_v18 = vld [vmem:[%s5902_s11 + $0x88] sm:$0xff] }
0x146a   :  { %v3879_v21 = vpop.permute.xlu0 %3878 }
0x146b   :  { %v3885_v22 = vsel %vm1313_vm7, %v3879_v21, 0.0 }
0x146c   :  { %v3877_v19 = vpop.permute.xlu1 %3876 }
0x146d   :  { %v3882_v20 = vsel %vm1313_vm7, %v3877_v19, 0.0  ;;  %v4334_v19 = vld [vmem:[%s5902_s11 + $0x80] sm:$0xff] }
0x146e   :  { %3883 = vadd.xlane.f32.xlu0 %v3882_v20  ;;  %v4331_v20 = vld [vmem:[%s5901_s10 + $0x1] ss:$0 sm:$0xff] }
0x1472   :  { %3886 = vadd.xlane.f32.xlu0 %v3885_v22 }
0x1488   :  { %3911 = vrot.lane.b32.xlu0 %v3909_v25, %s5031_s26 }
0x14a7   :  { %v3830_v17 = vpop.xlane.xlu1 %3829 }
0x14a8   :  { %v3834_v31 = vmul.f32 0.03125, %v3830_v17 }
0x14aa   :  { %v3836_v40 = vadd.f32 1e-12, %v3834_v31 }
0x14ab   :  { %v3833_v12 = vpop.xlane.xlu1 %3832 }
0x14ac   :  { %v3835_v34 = vmul.f32 0.03125, %v3833_v12  ;;  %4955 = vrsqrt.f32 %v3836_v40  ;;  %v4351_v40 = vld [vmem:[%s5903_s12 + $0x1] ss:$0 sm:$0xff]  ;;  %s5033_s12 = smov [#allocation5]  }
0x14ae   :  { %v3837_v35 = vadd.f32 1e-12, %v3835_v34 }
0x14af   :  { %v3902_v55 = vpop.permute.xlu1 %3901 }
0x14b0   :  { %4957 = vrsqrt.f32 %v3837_v35 }
0x14b9   :  { %v4956_v45 = vpop.eup %4955 }
0x14ba   :  { %v3840_v57 = vmul.f32 %v4956_v45, %v5741_v10  ;;  %v4342_v10 = vld [vmem:[%s5902_s11 + $0xc0] sm:$0xff] }
0x14bc   :  { %v3846_v56 = vmul.f32 %v3845_v46, %v3840_v57 }
0x14bd   :  { %v4958_v49 = vpop.eup %4957 }
0x14be   :  { %v3841_v61 = vmul.f32 %v4958_v49, %v5743_v14  ;;  %v3852_v60 = vadd.f32 %v3851_v5, %v3846_v56  ;;  %v4340_v14 = vld [vmem:[%s5902_s11 + $0xb0] sm:$0xff] }
0x14c0   :  { %v3847_v63 = vmul.f32 %v3845_v46, %v3841_v61 }
0x14c2   :  { %v3853_v2 = vadd.f32 %v3851_v5, %v3847_v63 }
0x14f7   :  { %v3884_v36 = vpop.xlane.xlu0 %3883 }
0x14f8   :  { %v3888_v37 = vmul.f32 0.0625, %v3884_v36 }
0x14fa   :  { %v3890_v43 = vadd.f32 1e-12, %v3888_v37 }
0x14fb   :  { %v3887_v41 = vpop.xlane.xlu0 %3886 }
0x14fc   :  { %4959 = vrsqrt.f32 %v3890_v43  ;;  %v3889_v38 = vmul.f32 0.0625, %v3887_v41 }
0x14fe   :  { %v3891_v44 = vadd.f32 1e-12, %v3889_v38 }
0x14ff   :  { %v3912_v58 = vpop.permute.xlu0 %3911 }
0x1500   :  { %4961 = vrsqrt.f32 %v3891_v44 }
0x1509   :  { %v4960_v50 = vpop.eup %4959 }
0x150a   :  { %v3894_v23 = vmul.f32 %v4960_v50, %v5735_v4 }
0x150c   :  { %v3904_v6 = vmul.f32 %v3902_v55, %v3894_v23 }
0x150d   :  { %v4962_v32 = vpop.eup %4961 }
0x150e   :  { %v3895_v7 = vmul.f32 %v4962_v32, %v5731_v62  ;;  %v3914_v30 = vadd.f32 %v3912_v58, %v3904_v6  ;;  %v4346_v62 = vld [vmem:[%s5902_s11 + $0xe0] sm:$0xff] }
0x150f   :  { %4827 = vmatprep.subr.mxu1 %v4346_v62 }
0x1510   :  { %v3905_v53 = vmul.f32 %v3902_v55, %v3895_v7  ;;  %v5805_v1 = vsel %vm1638_vm8, %v3852_v60, %v3914_v30  ;;  %4828 = vmatpush3.msra.mxu1 %v4346_v62 }
0x1511   :  { %4818 = vmatprep.mubr.msk.f32.mxu0 %vm72_vm0, %v5805_v1  ;;  %4829 = vmatprep.subr.mxu1 %v4345_v3 }
0x1512   :  { %v3915_v4 = vadd.f32 %v3912_v58, %v3905_v53  ;;  %4830 = vmatpush3.msra.mxu1 %v4345_v3 }
0x1513   :  { %4831 = vmatprep.subr.mxu1 %v4344_v42 }
0x1514   :  { %v5810_v47 = vsel %vm1638_vm8, %v3853_v2, %v3915_v4  ;;  %4832 = vmatpush3.msra.mxu1 %v4344_v42 }
0x1515   :  { %4819 = vmatmul.mubr.msk.f32.vlgmr.msra.gmra.mxu0 %vm72_vm0, %v5810_v47  ;;  %4833 = vmatprep.subr.mxu1 %v4343_v8 }
0x1516   :  { %4834 = vmatpush3.msra.mxu1 %v4343_v8 }
0x1517   :  { %4835 = vmatprep.subr.mxu1 %v4342_v10 }
0x1518   :  { %4836 = vmatpush3.msra.mxu1 %v4342_v10 }
0x1519   :  { %4837 = vmatprep.subr.mxu1 %v4341_v13 }
0x151a   :  { %4838 = vmatpush3.msra.mxu1 %v4341_v13  ;;  %v4209_v13 = vrot.slane %v5754_v9, %v5155_v51 }
0x151b   :  { %4839 = vmatprep.subr.mxu1 %v4340_v14 }
0x151c   :  { %4840 = vmatpush3.msra.mxu1 %v4340_v14  ;;  %v4219_v14 = vrot.slane %v5754_v9, %v5506_v33  ;;  %v4155_v9 = vrot.slane %v5794_v48, %v5155_v51 }
0x151d   :  { %4841 = vmatprep.subr.mxu1 %v4339_v15 }
0x151e   :  { %4842 = vmatpush3.msra.mxu1 %v4339_v15 }
0x151f   :  { %4843 = vmatprep.subr.mxu1 %v4338_v54 }
0x1520   :  { %4844 = vmatpush3.msra.mxu1 %v4338_v54 }
0x1521   :  { %4845 = vmatprep.subr.mxu1 %v4337_v52 }
0x1522   :  { %4846 = vmatpush3.msra.mxu1 %v4337_v52 }
0x1523   :  { %4847 = vmatprep.subr.mxu1 %v4336_v16 }
0x1524   :  { %4848 = vmatpush3.msra.mxu1 %v4336_v16 }
0x1525   :  { %4849 = vmatprep.subr.mxu1 %v4335_v18 }
0x1526   :  { %4850 = vmatpush3.msra.mxu1 %v4335_v18 }
0x1527   :  { %4851 = vmatprep.subr.mxu1 %v4334_v19 }
0x1528   :  { %4852 = vmatpush3.msra.mxu1 %v4334_v19 }
0x15d5   :  { %v4820_v21 = vpop.f32.mrf.mxu0 }
0x15d6   :  { %v4011_v22 = vadd.f32 %v4820_v21, %v4331_v20 }
0x15d7   :  { %v4005_v24 = vpop.f32.mrf.mxu0 }
0x15d8   :  { %v4017_v0 = vmul.f32 0.70710677, %v4011_v22  ;;  %v4006_v25 = vadd.f32 %v4331_v20, %v4005_v24  ;;  %v4015_v39 = vmul.f32 0.5, %v4011_v22 }
0x15da   :  { %4963 = verf.f32 %v4017_v0  ;;  %v4016_v26 = vmul.f32 0.70710677, %v4006_v25  ;;  %v4014_v29 = vmul.f32 0.5, %v4006_v25 }
0x15dc   :  { %4965 = verf.f32 %v4016_v26 }
0x15e7   :  { %v4964_v11 = vpop.eup %4963 }
0x15e8   :  { %v4021_v28 = vadd.f32 1.0, %v4964_v11 }
0x15e9   :  { %v4966_v27 = vpop.eup %4965 }
0x15ea   :  { %v4020_v59 = vadd.f32 1.0, %v4966_v27  ;;  %v4023_v31 = vmul.f32 %v4021_v28, %v4015_v39  ;;  %v4161_v39 = vrot.slane %v5794_v48, %v5506_v33 }
0x15ec   :  { %v4022_v17 = vmul.f32 %v4020_v59, %v4014_v29 }
0x15ee   :  { %4853 = vmatprep.mubr.f32.mxu1 %v4022_v17 }
0x15ef   :  { %4854 = vmatmul.mubr.f32.vlgmr.msra.gmra.mxu1 %v4023_v31 }
0x16af   :  { %v4855_v12 = vpop.f32.mrf.mxu1 }
0x16b0   :  { %v4121_v36 = vadd.f32 %v4855_v12, %v4351_v40 }
0x16b1   :  { %v4115_v34 = vpop.f32.mrf.mxu1 }
0x16b2   :  { %v4116_v35 = vadd.f32 %v4351_v40, %v4115_v34  ;;  %v4125_v43 = vadd.f32 %v4121_v36, %v5810_v47 }
0x16b4   :  { %v4124_v37 = vadd.f32 %v4116_v35, %v5805_v1  ;;  %v4129_v46 = vsel %vm1638_vm8, %v4125_v43, 0.0 }
0x16b6   :  { %4166 = vrot.lane.b32.xlu1 %v4124_v37, %s5032_s14  ;;  %v4126_v57 = vsel %vm1638_vm8, %v4124_v37, 0.0 }
0x16ba   :  { %4168 = vrot.lane.b32.xlu1 %v4125_v43, %s5032_s14 }
0x1728   :  { %v4167_v41 = vpop.permute.xlu1 %4166 }
0x1729   :  { %v4172_v38 = vsel %vm1313_vm7, %v4167_v41, 0.0 }
0x172a   :  { %4173 = vadd.xlane.f32.xlu0 %v4172_v38 }
0x172c   :  { %v4169_v44 = vpop.permute.xlu1 %4168 }
0x172d   :  { %v4175_v45 = vsel %vm1313_vm7, %v4169_v44, 0.0 }
0x172e   :  { %4176 = vadd.xlane.f32.xlu1 %v4175_v45  ;;  %4127 = vadd.xlane.f32.xlu0 %v4126_v57 }
0x1732   :  { %4130 = vadd.xlane.f32.xlu0 %v4129_v46 }
0x17b3   :  { %v4174_v49 = vpop.xlane.xlu0 %4173 }
0x17b4   :  { %v4178_v30 = vmul.f32 0.0625, %v4174_v49 }
0x17b6   :  { %v4180_v60 = vsub.f32 %v4124_v37, %v4178_v30 }
0x17b7   :  { %v4128_v50 = vpop.xlane.xlu0 %4127  ;;  %v4177_v63 = vpop.xlane.xlu1 %4176 }
0x17b8   :  { %v4132_v55 = vmul.f32 0.03125, %v4128_v50  ;;  %v4182_v53 = vmul.f32 %v4180_v60, %v4180_v60  ;;  %v4179_v1 = vmul.f32 0.0625, %v4177_v63 }
0x17ba   :  { %v4134_v23 = vsub.f32 %v4124_v37, %v4132_v55  ;;  %v4181_v4 = vsub.f32 %v4125_v43, %v4179_v1 }
0x17bb   :  { %v4131_v56 = vpop.xlane.xlu0 %4130 }
0x17bc   :  { %v4133_v5 = vmul.f32 0.03125, %v4131_v56  ;;  %v4136_v61 = vmul.f32 %v4134_v23, %v4134_v23  ;;  %v4183_v2 = vmul.f32 %v4181_v4, %v4181_v4 }
0x17be   :  { %v4135_v58 = vsub.f32 %v4125_v43, %v4133_v5  ;;  %v4138_v6 = vsel %vm1638_vm8, %v4136_v61, 0.0 }
0x17bf   :  { %4139 = vadd.xlane.f32.xlu1 %v4138_v6 }
0x17c0   :  { %v4137_v32 = vmul.f32 %v4135_v58, %v4135_v58 }
0x17c2   :  { %v4141_v7 = vsel %vm1638_vm8, %v4137_v32, 0.0 }
0x17c3   :  { %4142 = vadd.xlane.f32.xlu0 %v4141_v7 }
0x17d0   :  { %4186 = vrot.lane.b32.xlu1 %v4182_v53, %s5032_s14 }
0x17d9   :  { %4188 = vrot.lane.b32.xlu0 %v4183_v2, %s5032_s14 }
0x1848   :  { %v4140_v47 = vpop.xlane.xlu1 %4139 }
0x1849   :  { %v4144_v15 = vmul.f32 0.03125, %v4140_v47 }
0x184b   :  { %v4146_v54 = vadd.f32 1e-12, %v4144_v15 }
0x184c   :  { %v4187_v62 = vpop.permute.xlu1 %4186  ;;  %v4143_v3 = vpop.xlane.xlu0 %4142 }
0x184d   :  { %v4192_v42 = vsel %vm1313_vm7, %v4187_v62, 0.0  ;;  %v4145_v52 = vmul.f32 0.03125, %v4143_v3  ;;  %4967 = vrsqrt.f32 %v4146_v54 }
0x184e   :  { %4193 = vadd.xlane.f32.xlu1 %v4192_v42 }
0x184f   :  { %v4147_v16 = vadd.f32 1e-12, %v4145_v52 }
0x1850   :  { %v4189_v8 = vpop.permute.xlu0 %4188 }
0x1851   :  { %v4195_v10 = vsel %vm1313_vm7, %v4189_v8, 0.0  ;;  %4969 = vrsqrt.f32 %v4147_v16 }
0x1852   :  { %4196 = vadd.xlane.f32.xlu0 %v4195_v10 }
0x185a   :  { %v4968_v0 = vpop.eup %4967 }
0x185b   :  { %v4150_v25 = vmul.f32 %v4968_v0, %v4134_v23 }
0x185d   :  { %v4156_v59 = vmul.f32 %v4155_v9, %v4150_v25 }
0x185e   :  { %v4970_v26 = vpop.eup %4969 }
0x185f   :  { %4211 = vrot.lane.b32.xlu1 %v4209_v13, %s5031_s26  ;;  %v4151_v29 = vmul.f32 %v4970_v26, %v4135_v58  ;;  %v4162_v35 = vadd.f32 %v4161_v39, %v4156_v59 }
0x1861   :  { %v4157_v34 = vmul.f32 %v4155_v9, %v4151_v29 }
0x1863   :  { %v4163_v51 = vadd.f32 %v4161_v39, %v4157_v34 }
0x1868   :  { %4221 = vrot.lane.b32.xlu0 %v4219_v14, %s5031_s26  ;;  %s4236_s26 = sshll.u32 %s5033_s12, 4  ;;  %s4237_s26 = int_to_ptr.vmem [resolvable:$true] %s4236_s26 }
0x1869   :  { %s4996_s14 = scalar_lea.vmem %s4237_s26, 512  ;;  %p5001_p6 = scmp.lt.s32.totalorder %s4237_s26, %s4237_s26 }
0x186a   :  { %p4997_p5 = scmp.ne.s32.totalorder %s4237_s26, %s4996_s14  ;;  %p5002_p7 = scmp.lt.s32.totalorder %s4996_s14, %s4996_s14 }
0x186c   :  { %p5003_p8 = por %p5002_p7, %p5001_p6 }
0x186e   :  { %p5004_p9 = pnand %p5003_p8, %p4997_p5 }
0x18d7   :  { %v4194_v18 = vpop.xlane.xlu1 %4193 }
0x18d8   :  { %v4198_v19 = vmul.f32 0.0625, %v4194_v18 }
0x18da   :  { %v4200_v20 = vadd.f32 1e-12, %v4198_v19 }
0x18db   :  { %v4197_v21 = vpop.xlane.xlu0 %4196  ;;  %v4212_v27 = vpop.permute.xlu1 %4211 }
0x18dc   :  { %4971 = vrsqrt.f32 %v4200_v20  ;;  %v4199_v22 = vmul.f32 0.0625, %v4197_v21 }
0x18de   :  { %v4201_v24 = vadd.f32 1e-12, %v4199_v22 }
0x18df   :  { %v4222_v17 = vpop.permute.xlu0 %4221 }
0x18e0   :  { %4973 = vrsqrt.f32 %v4201_v24 }
0x18e9   :  { %v4972_v11 = vpop.eup %4971 }
0x18ea   :  { %v4204_v28 = vmul.f32 %v4972_v11, %v4180_v60 }
0x18ec   :  { %v4214_v31 = vmul.f32 %v4212_v27, %v4204_v28 }
0x18ed   :  { %v4974_v12 = vpop.eup %4973 }
0x18ee   :  { %v4205_v40 = vmul.f32 %v4974_v12, %v4181_v4  ;;  %v4224_v36 = vadd.f32 %v4222_v17, %v4214_v31 }
0x18f0   :  { %v4215_v37 = vmul.f32 %v4212_v27, %v4205_v40  ;;  %v4226_v43 = vsel %vm1638_vm8, %v4162_v35, %v4224_v36 }
0x18f1   :  { %4229 = vst.msk [vmem:[#allocation5 + $0x10] sm:$0xff] %vm72_vm0, %v4226_v43 }
0x18f2   :  { %v4225_v41 = vadd.f32 %v4222_v17, %v4215_v37 }
0x18f4   :  { %v4227_v38 = vsel %vm1638_vm8, %v4163_v51, %v4225_v41 }
0x18f5   :  { %4230 = vst.msk [vmem:[#allocation5 + $0x18] sm:$0xff] %vm72_vm0, %v4227_v38 }
0x18f6   :  { %5007 = shalt.err (!%p5004_p9)
}
0x18f7   :  { %s5034_s22 = smov 128  }
0x18f8   :  { %4242 = dma.vmem_to_hbm [thread:$0]  %s4237_s26, 512, %s5904_s13, [#allocation4], %s5034_s22, %s5034_s22, %s5029_s19  }
0x18f9   :  { %5018 = dma.done.wait [#allocation4], 512  }
0x18fa   :  { %5019 = vsyncadd [#allocation4], 4294966784 }
0x18fb   :  { %4246 = vsyncpa [#allocation3], 1 }
0x18fc   :  { %4247 = vsyncpa [#allocation4], 1 }

</bundles_post_ra>
